<compile_context>
chip_gen: v5e
topology: v5e:2x2
jax: 0.10.0
libtpu: 0.0.40
codegen_flags: <defaults>
</compile_context>

<pallas_src>
import functools

import jax
import jax.numpy as jnp
from jax.experimental import pallas as pl
from jax.experimental.pallas import tpu as pltpu

FEAT_C = 2048                  # Mixed_7c channel count
FEAT_HW = 8                    # Mixed_7c spatial size (8x8)
FEAT_POS = FEAT_HW * FEAT_HW   # 64 spatial positions per image
_NB_DEFAULT = 8                # images per M tile for large batches (4 MiB f32 acc)


# ---------------------------------------------------------------------------
# Fused kernel: patch-embed matmul (+bias, ReLU) + global average pool (VPU)
# ---------------------------------------------------------------------------
def _fused_feat_pool_kernel(a_ref, w_ref, b_ref, o_ref):
    nb, tn = o_ref.shape
    hw = a_ref.shape[0] // nb
    # (tm, K) bf16 @ (K, C) bf16 -> f32 accumulation on the MXU.
    acc = jnp.dot(a_ref[...], w_ref[...], preferred_element_type=jnp.float32)
    acc = jnp.maximum(acc + b_ref[...], 0.0)
    # Fused adaptive_avg_pool2d((1,1)): per-image mean over the 64 spatial
    # rows, done as a sublane-group sum on the VPU (no second MXU pass, and
    # the (tm, C) feature map never leaves VMEM).
    o_ref[...] = acc.reshape(nb, hw, tn).sum(axis=1) * (1.0 / hw)


def fused_feat_pool(patches, w, b, *, n_images, images_per_tile):
    """patches: (n_images*64, K) bf16; w: (K, C) bf16; b: (1, C) f32.

    Returns (n_images, C) f32 globally average-pooled features.
    """
    M, K = patches.shape
    Kw, C = w.shape
    nb = images_per_tile
    assert Kw == K and M == n_images * FEAT_POS and n_images % nb == 0
    tm = nb * FEAT_POS
    grid = (n_images // nb,)   # M tiles only: full weight matrix stays resident

    cost = pl.CostEstimate(
        flops=2 * M * K * C,
        transcendentals=0,
        bytes_accessed=M * K * 2 + K * C * 2 + C * 4 + n_images * C * 4,
    )

    return pl.pallas_call(
        _fused_feat_pool_kernel,
        out_shape=jax.ShapeDtypeStruct((n_images, C), jnp.float32),
        grid_spec=pltpu.PrefetchScalarGridSpec(
            num_scalar_prefetch=0,
            grid=grid,
            in_specs=[
                pl.BlockSpec((tm, K), lambda i: (i, 0)),   # patch tile (streamed)
                pl.BlockSpec((K, C), lambda i: (0, 0)),    # full weights (resident)
                pl.BlockSpec((1, C), lambda i: (0, 0)),    # bias (resident)
            ],
            out_specs=pl.BlockSpec((nb, C), lambda i: (i, 0)),
        ),
        compiler_params=pltpu.CompilerParams(
            dimension_semantics=("parallel",),
            vmem_limit_bytes=32 * 1024 * 1024,
        ),
        cost_estimate=cost,
    )(patches, w, b)


# ---------------------------------------------------------------------------
# Jitted wrapper glue (bf16 cast first, then layout shuffles, then kernel)
# ---------------------------------------------------------------------------
@functools.partial(jax.jit, static_argnames=("patch",))
def _forward(x, w, b, *, patch):
    N, C_in, H, W = x.shape
    # Images per M tile: whole batch when small, else 8-image tiles with the
    # batch padded to a multiple of 8 (pad rows are sliced off afterwards).
    if N <= _NB_DEFAULT:
        nb, n_pad = N, N
    else:
        nb = _NB_DEFAULT
        n_pad = ((N + nb - 1) // nb) * nb
    # Cast to bf16 BEFORE the transposes: halves wrapper HBM traffic.
    xb = x.astype(jnp.bfloat16)
    x_nhwc = jnp.transpose(xb, (0, 2, 3, 1))
    p = patch
    patches = x_nhwc.reshape(N, FEAT_HW, p, FEAT_HW, p, C_in)
    patches = jnp.transpose(patches, (0, 1, 3, 2, 4, 5))
    patches = patches.reshape(N * FEAT_POS, p * p * C_in)
    if n_pad != N:
        patches = jnp.pad(patches, ((0, (n_pad - N) * FEAT_POS), (0, 0)))
    out = fused_feat_pool(patches, w, b, n_images=n_pad, images_per_tile=nb)
    return out[:N]


# ---------------------------------------------------------------------------
# Module wrapper
# ---------------------------------------------------------------------------
class FIDInceptionModelPallas:
    """Pallas analogue of FIDInceptionModel.

    forward(x): x is NCHW float32 in [-1, 1]; returns (N, 2048) activations —
    Mixed_7c-shaped features globally average-pooled, as in the PyTorch module.
    """
    # TODO(synk): the pretrained torchvision inception_v3 backbone cannot be
    # reproduced in-script; it is replaced by a deterministic patch-embedding
    # conv (kernel = stride = H//8) + ReLU producing Mixed_7c-shaped
    # (N, 2048, 8, 8) features. The module's own compute
    # (adaptive_avg_pool2d((1,1)) + view) is exact.

    def __init__(self, in_channels=3, in_hw=64, seed=0):
        assert in_hw % FEAT_HW == 0
        self.in_channels = in_channels
        self.in_hw = in_hw
        self.patch = in_hw // FEAT_HW
        k = self.patch * self.patch * in_channels
        self.k = k
        kw, kb = jax.random.split(jax.random.PRNGKey(seed))
        scale = 1.0 / jnp.sqrt(jnp.float32(k))
        w = jax.random.normal(kw, (k, FEAT_C), jnp.float32) * scale
        self.w = w.astype(jnp.bfloat16)          # bf16 weights (f32 MXU accum)
        self.b = (jax.random.normal(kb, (FEAT_C,), jnp.float32)
                  * 0.01).reshape(1, FEAT_C)

    def __call__(self, x):
        N, C, H, W = x.shape
        assert C == self.in_channels and H == self.in_hw and W == self.in_hw
        return _forward(x, self.w, self.b, patch=self.patch)


if __name__ == "__main__":
    key = jax.random.PRNGKey(0)
    # Small shapes consistent with the module: NCHW, 3 channels, range [-1, 1].
    x = jax.random.uniform(key, (2, 3, 64, 64), jnp.float32,
                           minval=-1.0, maxval=1.0)

    model = FIDInceptionModelPallas(in_channels=3, in_hw=64, seed=0)
    out = jax.block_until_ready(model(x))

    assert out.shape == (2, FEAT_C), out.shape
    assert out.dtype == jnp.float32

    # Plain-JAX reference with the same bf16-rounded operands, f32 math.
    p = model.patch
    x_bf = x.astype(jnp.bfloat16).astype(jnp.float32)
    x_nhwc = jnp.transpose(x_bf, (0, 2, 3, 1))
    patches = x_nhwc.reshape(2, FEAT_HW, p, FEAT_HW, p, 3)
    patches = jnp.transpose(patches, (0, 1, 3, 2, 4, 5)).reshape(
        2 * FEAT_POS, p * p * 3)
    w_f32 = model.w.astype(jnp.float32)
    feats_ref = jnp.maximum(patches @ w_f32 + model.b, 0.0)
    ref = feats_ref.reshape(2, FEAT_POS, FEAT_C).mean(axis=1)
    assert jnp.allclose(out, ref, atol=1e-3, rtol=1e-3), \
        float(jnp.max(jnp.abs(out - ref)))

    print("KERNEL_OK")
</pallas_src>

<mosaic_0001>
module attributes {stable_mosaic.version = 11 : i64} {
  func.func @_fused_feat_pool_kernel(%arg0: i32, %arg1: memref<128x192xbf16, #tpu.memory_space<vmem>>, %arg2: memref<192x2048xbf16, #tpu.memory_space<vmem>>, %arg3: memref<1x2048xf32, #tpu.memory_space<vmem>>, %arg4: memref<2x2048xf32, #tpu.memory_space<vmem>>) attributes {dimension_semantics = [#tpu.dimension_semantics<parallel>], iteration_bounds = array<i64: 1>, scalar_prefetch = 0 : i64, scratch_operands = 0 : i64, tpu.core_type = #tpu.core_type<tc>, window_params = [{transform_indices = @transform_0, window_bounds = array<i64: 128, 192>}, {pipeline_mode = #tpu.pipeline_mode<synchronous>, transform_indices = @transform_1, window_bounds = array<i64: 192, 2048>}, {pipeline_mode = #tpu.pipeline_mode<synchronous>, transform_indices = @transform_2, window_bounds = array<i64: 1, 2048>}, {transform_indices = @transform_3, window_bounds = array<i64: 2, 2048>}]} {
    %c0 = arith.constant 0 : index
    %c0_0 = arith.constant 0 : index
    %0 = vector.load %arg1[%c0, %c0_0] : memref<128x192xbf16, #tpu.memory_space<vmem>>, vector<128x192xbf16>
    %c0_1 = arith.constant 0 : index
    %c0_2 = arith.constant 0 : index
    %1 = vector.load %arg2[%c0_1, %c0_2] : memref<192x2048xbf16, #tpu.memory_space<vmem>>, vector<192x2048xbf16>
    %cst = arith.constant dense<0.000000e+00> : vector<128x2048xf32>
    %2 = tpu.matmul %0, %1, %cst {dimension_numbers = #tpu.dot_dimension_numbers<[1], [0], [0], [1], [0, 0, 1, 1], [], []>} : vector<128x192xbf16>, vector<192x2048xbf16>, vector<128x2048xf32> -> vector<128x2048xf32>
    %c0_3 = arith.constant 0 : index
    %c0_4 = arith.constant 0 : index
    %3 = vector.load %arg3[%c0_3, %c0_4] : memref<1x2048xf32, #tpu.memory_space<vmem>>, vector<1x2048xf32>
    %4 = vector.broadcast %3 : vector<1x2048xf32> to vector<128x2048xf32>
    %5 = arith.addf %2, %4 : vector<128x2048xf32>
    %cst_5 = arith.constant 0.000000e+00 : f32
    %6 = vector.broadcast %cst_5 : f32 to vector<128x2048xf32>
    %7 = arith.maximumf %5, %6 : vector<128x2048xf32>
    %8 = vector.shape_cast %7 : vector<128x2048xf32> to vector<2x64x2048xf32>
    %cst_6 = arith.constant dense<0.000000e+00> : vector<2x2048xf32>
    %9 = vector.multi_reduction <add>, %8, %cst_6 [1] : vector<2x64x2048xf32> to vector<2x2048xf32>
    %cst_7 = arith.constant 1.562500e-02 : f32
    %10 = vector.broadcast %cst_7 : f32 to vector<2x2048xf32>
    %11 = arith.mulf %9, %10 : vector<2x2048xf32>
    %c0_8 = arith.constant 0 : index
    %c0_9 = arith.constant 0 : index
    %12 = vector.load %arg4[%c0_8, %c0_9] : memref<2x2048xf32, #tpu.memory_space<vmem>>, vector<2x2048xf32>
    tpu.vector_store %arg4[%c0_8, %c0_9], %11 {strides = array<i32>} : memref<2x2048xf32, #tpu.memory_space<vmem>>, vector<2x2048xf32>,
    return
  }
  func.func @transform_0(%arg0: i32) -> (i32, i32) {
    %c0_i32 = arith.constant 0 : i32
    %c0_i32_0 = arith.constant 0 : i32
    return %arg0, %c0_i32 : i32, i32
  }
  func.func @transform_1(%arg0: i32) -> (i32, i32) {
    %c0_i32 = arith.constant 0 : i32
    %c0_i32_0 = arith.constant 0 : i32
    %c0_i32_1 = arith.constant 0 : i32
    return %c0_i32, %c0_i32_0 : i32, i32
  }
  func.func @transform_2(%arg0: i32) -> (i32, i32) {
    %c0_i32 = arith.constant 0 : i32
    %c0_i32_0 = arith.constant 0 : i32
    %c0_i32_1 = arith.constant 0 : i32
    return %c0_i32, %c0_i32_0 : i32, i32
  }
  func.func @transform_3(%arg0: i32) -> (i32, i32) {
    %c0_i32 = arith.constant 0 : i32
    %c0_i32_0 = arith.constant 0 : i32
    return %arg0, %c0_i32 : i32, i32
  }
}

</mosaic_0001>

<bundles_post_ra>
// kernel: _forward.1
= control target key start
LH: loop header
LB: loop body
LE: loop exit
PB: predicated region body
PF: predicated region fallthrough
CT: control target
= control target key end

     0   :  { %vm1292_vm0 = vcmask 523264   ;;  %s7108_s0 = inlined_call_operand.vmem [shape: bf16[128,192], index: 0, kind: input, shape index: {}]   ;;  %s7109_s1 = inlined_call_operand.vmem [shape: bf16[192,2048], index: 1, kind: input, shape index: {}]   ;;  %s7110_s2 = inlined_call_operand.vmem [shape: f32[1,2048], index: 2, kind: input, shape index: {}]   ;;  %s7111_s3 = inlined_call_operand.hbm [shape: f32[2,2048], index: 3, kind: output, shape index: {}]  }
   0x1   :  { %v4244_v0 = vld [vmem:[%s7109_s1 + $0x380] sm:$0xf]  ;;  %v4818_v2 = vld [vmem:[%s7109_s1 + $0x384] sm:$0xf]  ;;  %v3734_v44 = vld [vmem:[%s7108_s0 + $0x8] sm:$0xf0] }
   0x2   :  { %v4826_v1 = vld [vmem:[%s7109_s1 + $0x3bc] sm:$0xf0]  ;;  %v4246_v4 = vld [vmem:[%s7109_s1 + $0x3c0] sm:$0xf0]  ;;  %v4508_v61 = vld [vmem:[%s7109_s1 + $0x588] sm:$0xf] }
   0x3   :  { %v4245_v3 = vor.u32 %v4826_v1, %v4244_v0  ;;  %v4882_v5 = vld [vmem:[%s7109_s1 + $0x584] sm:$0xf]  ;;  %v4249_v7 = vor.u32 %v4818_v2, %v4246_v4  ;;  %v4180_v9 = vld [vmem:[%s7109_s1 + $0x300] sm:$0xf]  ;;  %v4891_v62 = vld [vmem:[%s7109_s1 + $0x5c4] sm:$0xf0] }
   0x4   :  { %v4502_v6 = vld [vmem:[%s7109_s1 + $0x5c0] sm:$0xf0]  ;;  %v4810_v10 = vld [vmem:[%s7109_s1 + $0x33c] sm:$0xf0]  ;;  %v4509_v0 = vor.u32 %v4891_v62, %v4508_v61  ;;  %v4252_v1 = vld [vmem:[%s7109_s1 + $0x388] sm:$0xf] }
   0x5   :  { %v4505_v8 = vor.u32 %v4882_v5, %v4502_v6  ;;  %v4500_v11 = vld [vmem:[%s7109_s1 + $0x580] sm:$0xf]  ;;  %1317 = vmatpush.bf16.msra.mxu0 %v4245_v3  ;;  %v4181_v12 = vor.u32 %v4810_v10, %v4180_v9  ;;  %v4802_v14 = vld [vmem:[%s7109_s1 + $0x304] sm:$0xf]  ;;  %1415 = vmatpush.bf16.msra.mxu2 %v4249_v7  ;;  %v4827_v5 = vld [vmem:[%s7109_s1 + $0x3c4] sm:$0xf0] }
   0x6   :  { %v4890_v13 = vld [vmem:[%s7109_s1 + $0x5bc] sm:$0xf0]  ;;  %v4182_v15 = vld [vmem:[%s7109_s1 + $0x340] sm:$0xf0]  ;;  %v4188_v9 = vld [vmem:[%s7109_s1 + $0x308] sm:$0xf] }
   0x7   :  { %1468 = vmatpush.bf16.msra.mxu3 %v4505_v8  ;;  %v4501_v16 = vor.u32 %v4890_v13, %v4500_v11  ;;  %v4185_v17 = vor.u32 %v4802_v14, %v4182_v15  ;;  %v4866_v18 = vld [vmem:[%s7109_s1 + $0x504] sm:$0xf]  ;;  %v4116_v20 = vld [vmem:[%s7109_s1 + $0x280] sm:$0xf]  ;;  %v4253_v8 = vor.u32 %v4827_v5, %v4252_v1  ;;  %v4811_v10 = vld [vmem:[%s7109_s1 + $0x344] sm:$0xf0] }
   0x8   :  { %v4438_v19 = vld [vmem:[%s7109_s1 + $0x540] sm:$0xf0]  ;;  %v4794_v22 = vld [vmem:[%s7109_s1 + $0x2bc] sm:$0xf0]  ;;  %v4189_v13 = vor.u32 %v4811_v10, %v4188_v9 }
   0x9   :  { %v4441_v21 = vor.u32 %v4866_v18, %v4438_v19  ;;  %v4436_v23 = vld [vmem:[%s7109_s1 + $0x500] sm:$0xf]  ;;  %1370 = vmatpush.bf16.msra.mxu1 %v4501_v16  ;;  %v4786_v26 = vld [vmem:[%s7109_s1 + $0x284] sm:$0xf]  ;;  %1318 = vmatpush.bf16.msra.mxu0 %v4181_v12  ;;  %v4117_v29 = vor.u32 %v4794_v22, %v4116_v20 }
   0xa   :  { %v4874_v24 = vld [vmem:[%s7109_s1 + $0x53c] sm:$0xf0]  ;;  %v4118_v27 = vld [vmem:[%s7109_s1 + $0x2c0] sm:$0xf0]  ;;  %1416 = vmatpush.bf16.msra.mxu2 %v4185_v17 }
   0xb   :  { %v4437_v25 = vor.u32 %v4874_v24, %v4436_v23  ;;  %v4850_v28 = vld [vmem:[%s7109_s1 + $0x484] sm:$0xf]  ;;  %v4052_v31 = vld [vmem:[%s7109_s1 + $0x200] sm:$0xf]  ;;  %1469 = vmatpush.bf16.msra.mxu3 %v4441_v21  ;;  %v4121_v33 = vor.u32 %v4786_v26, %v4118_v27 }
   0xc   :  { %v4374_v30 = vld [vmem:[%s7109_s1 + $0x4c0] sm:$0xf0]  ;;  %v4778_v32 = vld [vmem:[%s7109_s1 + $0x23c] sm:$0xf0] }
   0xd   :  { %v4377_v34 = vor.u32 %v4850_v28, %v4374_v30  ;;  %v4372_v35 = vld [vmem:[%s7109_s1 + $0x480] sm:$0xf]  ;;  %v4770_v37 = vld [vmem:[%s7109_s1 + $0x204] sm:$0xf]  ;;  %1371 = vmatpush.bf16.msra.mxu1 %v4437_v25  ;;  %1319 = vmatpush.bf16.msra.mxu0 %v4117_v29  ;;  %v4053_v42 = vor.u32 %v4778_v32, %v4052_v31 }
   0xe   :  { %v4858_v36 = vld [vmem:[%s7109_s1 + $0x4bc] sm:$0xf0]  ;;  %v4054_v38 = vld [vmem:[%s7109_s1 + $0x240] sm:$0xf0]  ;;  %1417 = vmatpush.bf16.msra.mxu2 %v4121_v33 }
   0xf   :  { %v4834_v39 = vld [vmem:[%s7109_s1 + $0x404] sm:$0xf]  ;;  %v4373_v41 = vor.u32 %v4858_v36, %v4372_v35  ;;  %v4308_v45 = vld [vmem:[%s7109_s1 + $0x400] sm:$0xf]  ;;  %1470 = vmatpush.bf16.msra.mxu3 %v4377_v34  ;;  %v4057_v46 = vor.u32 %v4770_v37, %v4054_v38 }
  0x10   :  { %v4310_v40 = vld [vmem:[%s7109_s1 + $0x440] sm:$0xf0]  ;;  %v3988_v48 = vld [vmem:[%s7109_s1 + $0x180] sm:$0xf] }
  0x11   :  { %v4690_v43 = vld [vmem:[%s7108_s0 + $0x4] sm:$0xf]  ;;  %v4313_v47 = vor.u32 %v4834_v39, %v4310_v40  ;;  %v4762_v49 = vld [vmem:[%s7109_s1 + $0x1bc] sm:$0xf0]  ;;  %1372 = vmatpush.bf16.msra.mxu1 %v4373_v41  ;;  %1320 = vmatpush.bf16.msra.mxu0 %v4053_v42 }
  0x12   :  { %v4842_v50 = vld [vmem:[%s7109_s1 + $0x43c] sm:$0xf0]  ;;  %v4754_v51 = vld [vmem:[%s7109_s1 + $0x184] sm:$0xf]  ;;  %v5062_v54 = vor.u32 %v4690_v43, %v3734_v44  ;;  %v3989_v55 = vor.u32 %v4762_v49, %v3988_v48  ;;  %1418 = vmatpush.bf16.msra.mxu2 %v4057_v46 }
  0x13   :  { %v3990_v52 = vld [vmem:[%s7109_s1 + $0x1c0] sm:$0xf0]  ;;  %v4309_v53 = vor.u32 %v4842_v50, %v4308_v45  ;;  %1471 = vmatpush.bf16.msra.mxu3 %v4313_v47  ;;  %v3924_v57 = vld [vmem:[%s7109_s1 + $0x100] sm:$0xf] }
  0x14   :  { %v3993_v56 = vor.u32 %v4754_v51, %v3990_v52  ;;  %v4746_v58 = vld [vmem:[%s7109_s1 + $0x13c] sm:$0xf0]  ;;  %v4738_v59 = vld [vmem:[%s7109_s1 + $0x104] sm:$0xf] }
  0x15   :  { %v3926_v60 = vld [vmem:[%s7109_s1 + $0x140] sm:$0xf0]  ;;  %1373 = vmatpush.bf16.msra.mxu1 %v4309_v53  ;;  %1321 = vmatpush.bf16.msra.mxu0 %v3989_v55  ;;  %v3925_v63 = vor.u32 %v4746_v58, %v3924_v57  ;;  %v3860_v3 = vld [vmem:[%s7109_s1 + $0x80] sm:$0xf] }
  0x16   :  { %4570 = vmatmul.msk.bf16.vlgmr.msra.gmra.mxu3 %vm1292_vm0, %v5062_v54  ;;  %1419 = vmatpush.bf16.msra.mxu2 %v3993_v56  ;;  %v3929_v2 = vor.u32 %v4738_v59, %v3926_v60  ;;  %v4730_v4 = vld [vmem:[%s7109_s1 + $0xbc] sm:$0xf0]  ;;  %v4722_v6 = vld [vmem:[%s7109_s1 + $0x84] sm:$0xf] }
  0x17   :  { %v3862_v7 = vld [vmem:[%s7109_s1 + $0xc0] sm:$0xf0]  ;;  %1566 = vmatpush.bf16.msrb.mxu3 %v4509_v0  ;;  %v3861_v11 = vor.u32 %v4730_v4, %v3860_v3  ;;  %v3796_v12 = vld [vmem:[%s7109_s1] sm:$0xf] }
  0x18   :  { %4562 = vmatmul.msk.bf16.vlgmr.msra.gmra.mxu1 %vm1292_vm0, %v5062_v54  ;;  %v3865_v14 = vor.u32 %v4722_v6, %v3862_v7  ;;  %v4714_v15 = vld [vmem:[%s7109_s1 + $0x3c] sm:$0xf0]  ;;  %v4706_v16 = vld [vmem:[%s7109_s1 + $0x4] sm:$0xf] }
  0x19   :  { %1322 = vmatpush.bf16.msra.mxu0 %v3925_v63  ;;  %1513 = vmatpush.bf16.msrb.mxu1 %v4253_v8 }
  0x1a   :  { %1420 = vmatpush.bf16.msra.mxu2 %v3929_v2 }
  0x1b   :  { %8 = vsyncpa [#allocation3], 0  ;;  %v3798_v17 = vld [vmem:[%s7109_s1 + $0x40] sm:$0xf0]  ;;  %v4819_v18 = vld [vmem:[%s7109_s1 + $0x38c] sm:$0xf]  ;;  %v3797_v22 = vor.u32 %v4714_v15, %v3796_v12 }
  0x1c   :  { %v4254_v19 = vld [vmem:[%s7109_s1 + $0x3c8] sm:$0xf0]  ;;  %v3732_v23 = vld [vmem:[%s7108_s0] sm:$0xf]  ;;  %v4691_v24 = vld [vmem:[%s7108_s0 + $0x4] sm:$0xf0]  ;;  %v3801_v25 = vor.u32 %v4706_v16, %v3798_v17 }
  0x1d   :  { %v4883_v20 = vld [vmem:[%s7109_s1 + $0x58c] sm:$0xf]  ;;  %1323 = vmatpush.bf16.msra.mxu0 %v3861_v11  ;;  %1514 = vmatpush.bf16.msrb.mxu1 %v4189_v13  ;;  %v4692_v26 = vld [vmem:[%s7108_s0 + $0x14] sm:$0xf]  ;;  %v3742_v27 = vld [vmem:[%s7108_s0 + $0x18] sm:$0xf0]  ;;  %v4257_v28 = vor.u32 %v4819_v18, %v4254_v19  ;;  %v5152_v32 = vor.u32 %v4691_v24, %v3732_v23 }
  0x1e   :  { %v4510_v21 = vld [vmem:[%s7109_s1 + $0x5c8] sm:$0xf0]  ;;  %1421 = vmatpush.bf16.msra.mxu2 %v3865_v14  ;;  %v5154_v33 = vor.u32 %v4692_v26, %v3742_v27  ;;  %v4444_v35 = vld [vmem:[%s7109_s1 + $0x508] sm:$0xf]  ;;  %v3740_v47 = vld [vmem:[%s7108_s0 + $0x10] sm:$0xf] }
  0x1f   :  { %v4513_v29 = vor.u32 %v4883_v20, %v4510_v21  ;;  %v4803_v30 = vld [vmem:[%s7109_s1 + $0x30c] sm:$0xf]  ;;  %v4875_v36 = vld [vmem:[%s7109_s1 + $0x544] sm:$0xf0]  ;;  %v4693_v48 = vld [vmem:[%s7108_s0 + $0x14] sm:$0xf0] }
  0x20   :  { %v4190_v31 = vld [vmem:[%s7109_s1 + $0x348] sm:$0xf0]  ;;  %v4445_v38 = vor.u32 %v4875_v36, %v4444_v35  ;;  %v4124_v41 = vld [vmem:[%s7109_s1 + $0x288] sm:$0xf]  ;;  %v4694_v49 = vld [vmem:[%s7108_s0 + $0x24] sm:$0xf]  ;;  %v5198_v51 = vor.u32 %v4693_v48, %v3740_v47 }
  0x21   :  { %1324 = vmatpush.bf16.msra.mxu0 %v3797_v22  ;;  %v4193_v34 = vor.u32 %v4803_v30, %v4190_v31  ;;  %v4867_v37 = vld [vmem:[%s7109_s1 + $0x50c] sm:$0xf]  ;;  %v4795_v42 = vld [vmem:[%s7109_s1 + $0x2c4] sm:$0xf0]  ;;  %v3748_v60 = vld [vmem:[%s7108_s0 + $0x20] sm:$0xf] }
  0x22   :  { %1422 = vmatpush.bf16.msra.mxu2 %v3801_v25  ;;  %v4446_v39 = vld [vmem:[%s7109_s1 + $0x548] sm:$0xf0]  ;;  %1567 = vmatpush.bf16.msrb.mxu3 %v4445_v38  ;;  %v4125_v44 = vor.u32 %v4795_v42, %v4124_v41  ;;  %v4060_v53 = vld [vmem:[%s7109_s1 + $0x208] sm:$0xf]  ;;  %v4696_v62 = vld [vmem:[%s7108_s0 + $0x34] sm:$0xf] }
  0x23   :  { %v4449_v40 = vor.u32 %v4867_v37, %v4446_v39  ;;  %v4787_v43 = vld [vmem:[%s7109_s1 + $0x28c] sm:$0xf]  ;;  %v4779_v55 = vld [vmem:[%s7109_s1 + $0x244] sm:$0xf0]  ;;  %v3758_v63 = vld [vmem:[%s7108_s0 + $0x38] sm:$0xf0] }
  0x24   :  { %1325 = vmatmul.bf16.vlgmr.msra.gmra.mxu0 %v5152_v32  ;;  %v4126_v45 = vld [vmem:[%s7109_s1 + $0x2c8] sm:$0xf0]  ;;  %1515 = vmatpush.bf16.msrb.mxu1 %v4125_v44  ;;  %v4061_v57 = vor.u32 %v4779_v55, %v4060_v53  ;;  %v4695_v61 = vld [vmem:[%s7108_s0 + $0x24] sm:$0xf0]  ;;  %v5234_v1 = vor.u32 %v4696_v62, %v3758_v63  ;;  %v3756_v14 = vld [vmem:[%s7108_s0 + $0x30] sm:$0xf] }
  0x25   :  { %1611 = vmatpush.bf16.msrb.mxu0 %v4257_v28  ;;  %1423 = vmatmul.bf16.vlgmr.msra.gmra.mxu2 %v5152_v32  ;;  %v4129_v46 = vor.u32 %v4787_v43, %v4126_v45  ;;  %v3750_v50 = vld [vmem:[%s7108_s0 + $0x28] sm:$0xf0]  ;;  %v5232_v0 = vor.u32 %v4695_v61, %v3748_v60  ;;  %v4380_v2 = vld [vmem:[%s7109_s1 + $0x488] sm:$0xf]  ;;  %v4697_v15 = vld [vmem:[%s7108_s0 + $0x34] sm:$0xf0] }
  0x26   :  { %1664 = vmatpush.bf16.msrb.mxu2 %v4513_v29  ;;  %4571 = vmatmul.msk.bf16.gmra.mxu3 %vm1292_vm0, %v5154_v33  ;;  %v5200_v52 = vor.u32 %v4694_v49, %v3750_v50  ;;  %v4771_v56 = vld [vmem:[%s7109_s1 + $0x20c] sm:$0xf]  ;;  %v4859_v3 = vld [vmem:[%s7109_s1 + $0x4c4] sm:$0xf0]  ;;  %v4698_v16 = vld [vmem:[%s7108_s0 + $0x44] sm:$0xf]  ;;  %v5278_v18 = vor.u32 %v4697_v15, %v3756_v14 }
  0x27   :  { %v4062_v58 = vld [vmem:[%s7109_s1 + $0x248] sm:$0xf0]  ;;  %v4381_v5 = vor.u32 %v4859_v3, %v4380_v2  ;;  %v3996_v8 = vld [vmem:[%s7109_s1 + $0x188] sm:$0xf]  ;;  %v3764_v26 = vld [vmem:[%s7108_s0 + $0x40] sm:$0xf] }
  0x28   :  { %4563 = vmatmul.msk.bf16.gmra.mxu1 %vm1292_vm0, %v5154_v33  ;;  %v4065_v59 = vor.u32 %v4771_v56, %v4062_v58  ;;  %v4851_v4 = vld [vmem:[%s7109_s1 + $0x48c] sm:$0xf]  ;;  %v4763_v9 = vld [vmem:[%s7109_s1 + $0x1c4] sm:$0xf0]  ;;  %v4700_v28 = vld [vmem:[%s7108_s0 + $0x54] sm:$0xf] }
  0x29   :  { %1612 = vmatpush.bf16.msrb.mxu0 %v4193_v34  ;;  %1516 = vmatpush.bf16.msrb.mxu1 %v4061_v57  ;;  %v4382_v6 = vld [vmem:[%s7109_s1 + $0x4c8] sm:$0xf0]  ;;  %v3997_v11 = vor.u32 %v4763_v9, %v3996_v8  ;;  %v3932_v20 = vld [vmem:[%s7109_s1 + $0x108] sm:$0xf]  ;;  %v3774_v29 = vld [vmem:[%s7108_s0 + $0x58] sm:$0xf0] }
  0x2a   :  { %1665 = vmatpush.bf16.msrb.mxu2 %v4449_v40  ;;  %v4385_v7 = vor.u32 %v4851_v4, %v4382_v6  ;;  %v4755_v10 = vld [vmem:[%s7109_s1 + $0x18c] sm:$0xf]  ;;  %1568 = vmatpush.bf16.msrb.mxu3 %v4381_v5  ;;  %v4747_v21 = vld [vmem:[%s7109_s1 + $0x144] sm:$0xf0]  ;;  %v5314_v31 = vor.u32 %v4700_v28, %v3774_v29  ;;  %v4701_v47 = vld [vmem:[%s7108_s0 + $0x54] sm:$0xf0] }
  0x2b   :  { %v3998_v12 = vld [vmem:[%s7109_s1 + $0x1c8] sm:$0xf0]  ;;  %v3933_v23 = vor.u32 %v4747_v21, %v3932_v20  ;;  %v4699_v27 = vld [vmem:[%s7108_s0 + $0x44] sm:$0xf0]  ;;  %v4702_v48 = vld [vmem:[%s7108_s0 + $0x64] sm:$0xf] }
  0x2c   :  { %v4001_v13 = vor.u32 %v4755_v10, %v3998_v12  ;;  %v3766_v17 = vld [vmem:[%s7108_s0 + $0x48] sm:$0xf0]  ;;  %v5312_v30 = vor.u32 %v4699_v27, %v3764_v26  ;;  %v4316_v34 = vld [vmem:[%s7109_s1 + $0x408] sm:$0xf]  ;;  %v3780_v61 = vld [vmem:[%s7108_s0 + $0x60] sm:$0xf] }
  0x2d   :  { %1613 = vmatpush.bf16.msrb.mxu0 %v4129_v46  ;;  %1517 = vmatpush.bf16.msrb.mxu1 %v3997_v11  ;;  %v5280_v19 = vor.u32 %v4698_v16, %v3766_v17  ;;  %v4739_v22 = vld [vmem:[%s7109_s1 + $0x10c] sm:$0xf]  ;;  %v4843_v35 = vld [vmem:[%s7109_s1 + $0x444] sm:$0xf0]  ;;  %v3772_v46 = vld [vmem:[%s7108_s0 + $0x50] sm:$0xf] }
  0x2e   :  { %1666 = vmatpush.bf16.msrb.mxu2 %v4385_v7  ;;  %v3934_v24 = vld [vmem:[%s7109_s1 + $0x148] sm:$0xf0]  ;;  %v4317_v37 = vor.u32 %v4843_v35, %v4316_v34  ;;  %v3868_v40 = vld [vmem:[%s7109_s1 + $0x88] sm:$0xf]  ;;  %v5358_v50 = vor.u32 %v4701_v47, %v3772_v46  ;;  %v4704_v63 = vld [vmem:[%s7108_s0 + $0x74] sm:$0xf] }
  0x2f   :  { %v3937_v25 = vor.u32 %v4739_v22, %v3934_v24  ;;  %v4835_v36 = vld [vmem:[%s7109_s1 + $0x40c] sm:$0xf]  ;;  %v4731_v41 = vld [vmem:[%s7109_s1 + $0xc4] sm:$0xf0]  ;;  %v3790_v2 = vld [vmem:[%s7108_s0 + $0x78] sm:$0xf0] }
  0x30   :  { %v4318_v38 = vld [vmem:[%s7109_s1 + $0x448] sm:$0xf0]  ;;  %1569 = vmatpush.bf16.msrb.mxu3 %v4317_v37  ;;  %v3869_v43 = vor.u32 %v4731_v41, %v3868_v40  ;;  %v3804_v55 = vld [vmem:[%s7109_s1 + $0x8] sm:$0xf]  ;;  %v5394_v4 = vor.u32 %v4704_v63, %v3790_v2  ;;  %v4516_v5 = vld [vmem:[%s7109_s1 + $0x590] sm:$0xf] }
  0x31   :  { %1614 = vmatpush.bf16.msrb.mxu0 %v4065_v59  ;;  %1518 = vmatpush.bf16.msrb.mxu1 %v3933_v23  ;;  %v4321_v39 = vor.u32 %v4835_v36, %v4318_v38  ;;  %v4723_v42 = vld [vmem:[%s7109_s1 + $0x8c] sm:$0xf]  ;;  %v4715_v56 = vld [vmem:[%s7109_s1 + $0x44] sm:$0xf0]  ;;  %v4892_v6 = vld [vmem:[%s7109_s1 + $0x5cc] sm:$0xf0] }
  0x32   :  { %v3870_v44 = vld [vmem:[%s7109_s1 + $0xc8] sm:$0xf0]  ;;  %v3805_v57 = vor.u32 %v4715_v56, %v3804_v55  ;;  %v4703_v62 = vld [vmem:[%s7108_s0 + $0x64] sm:$0xf0]  ;;  %v4884_v7 = vld [vmem:[%s7109_s1 + $0x594] sm:$0xf]  ;;  %v4517_v8 = vor.u32 %v4892_v6, %v4516_v5 }
  0x33   :  { %1667 = vmatpush.bf16.msrb.mxu2 %v4321_v39  ;;  %v3873_v45 = vor.u32 %v4723_v42, %v3870_v44  ;;  %v3782_v49 = vld [vmem:[%s7108_s0 + $0x68] sm:$0xf0]  ;;  %v5392_v3 = vor.u32 %v4703_v62, %v3780_v61  ;;  %v4518_v9 = vld [vmem:[%s7109_s1 + $0x5d0] sm:$0xf0]  ;;  %v3788_v11 = vld [vmem:[%s7108_s0 + $0x70] sm:$0xf] }
  0x34   :  { %1330 = vmatmul.bf16.gmra.mxu0 %v5198_v51  ;;  %v5360_v53 = vor.u32 %v4702_v48, %v3782_v49  ;;  %v4707_v58 = vld [vmem:[%s7109_s1 + $0xc] sm:$0xf]  ;;  %v4521_v10 = vor.u32 %v4884_v7, %v4518_v9  ;;  %1762 = vmatpush.bf16.msra.mxu3 %v4517_v8  ;;  %v4705_v12 = vld [vmem:[%s7108_s0 + $0x74] sm:$0xf0]  ;;  %v4828_v14 = vld [vmem:[%s7109_s1 + $0x3cc] sm:$0xf0] }
  0x35   :  { %1428 = vmatmul.bf16.gmra.mxu2 %v5198_v51  ;;  %1615 = vmatpush.bf16.msrb.mxu0 %v4001_v13  ;;  %v3806_v59 = vld [vmem:[%s7109_s1 + $0x48] sm:$0xf0]  ;;  %v4260_v13 = vld [vmem:[%s7109_s1 + $0x390] sm:$0xf]  ;;  %v4820_v15 = vld [vmem:[%s7109_s1 + $0x394] sm:$0xf]  ;;  %v5432_v21 = vor.u32 %v4705_v12, %v3788_v11 }
  0x36   :  { %4572 = vmatmul.msk.bf16.gmra.mxu3 %vm1292_vm0, %v5200_v52  ;;  %1519 = vmatpush.bf16.msrb.mxu1 %v3869_v43  ;;  %v3809_v60 = vor.u32 %v4707_v58, %v3806_v59  ;;  %v4261_v16 = vor.u32 %v4828_v14, %v4260_v13  ;;  %v4262_v17 = vld [vmem:[%s7109_s1 + $0x3d0] sm:$0xf0]  ;;  %v5442_v24 = vld [vmem:[%s7110_s2] sm:$0xff]  ;;  %v4196_v27 = vld [vmem:[%s7109_s1 + $0x310] sm:$0xf]  ;;  %vm3645_vm1 = vcmask 1041408  }
  0x37   :  { %1860 = vmatpush.bf16.msra.mxu2 %v4521_v10  ;;  %v4265_v20 = vor.u32 %v4820_v15, %v4262_v17  ;;  %v5445_v26 = vperm.slane %v5442_v24, 0  ;;  %v4812_v28 = vld [vmem:[%s7109_s1 + $0x34c] sm:$0xf0]  ;;  %v4804_v29 = vld [vmem:[%s7109_s1 + $0x314] sm:$0xf]  ;;  %v5466_v42 = vperm.slane %v5442_v24, 1 }
  0x38   :  { %4564 = vmatmul.msk.bf16.gmra.mxu1 %vm1292_vm0, %v5200_v52  ;;  %v4197_v35 = vor.u32 %v4812_v28, %v4196_v27  ;;  %v4198_v36 = vld [vmem:[%s7109_s1 + $0x350] sm:$0xf0]  ;;  %v4876_v46 = vld [vmem:[%s7109_s1 + $0x54c] sm:$0xf0]  ;;  %vm3647_vm2 = vcmask 1045508   ;;  %vm3649_vm3 = vcmask 1043456  }
  0x39   :  { %1616 = vmatpush.bf16.msrb.mxu0 %v3937_v25  ;;  %v4201_v38 = vor.u32 %v4804_v29, %v4198_v36  ;;  %v4868_v47 = vld [vmem:[%s7109_s1 + $0x514] sm:$0xf]  ;;  %v4132_v2 = vld [vmem:[%s7109_s1 + $0x290] sm:$0xf]  ;;  %vm3677_vm4 = vcmask 1041409   ;;  %vm3679_vm5 = vcmask 1043459  }
  0x3a   :  { %1520 = vmatpush.bf16.msrb.mxu1 %v3805_v57  ;;  %v4454_v56 = vld [vmem:[%s7109_s1 + $0x550] sm:$0xf0]  ;;  %v4796_v5 = vld [vmem:[%s7109_s1 + $0x2cc] sm:$0xf0]  ;;  %vm3681_vm6 = vcmask 1045509   ;;  %vm3683_vm7 = vcmask 1047559  }
  0x3b   :  { %v4457_v58 = vor.u32 %v4868_v47, %v4454_v56  ;;  %v4788_v6 = vld [vmem:[%s7109_s1 + $0x294] sm:$0xf]  ;;  %v4133_v10 = vor.u32 %v4796_v5, %v4132_v2  ;;  %v4780_v47 = vld [vmem:[%s7109_s1 + $0x24c] sm:$0xf0]  ;;  %s3721_s23 = sshll.u32 %s7111_s3, 4  ;;  %s3722_s23 = int_to_ptr.hbm [resolvable:$true] %s3721_s23 }
  0x3c   :  { %v4134_v11 = vld [vmem:[%s7109_s1 + $0x2d0] sm:$0xf0] }
  0x3d   :  { %1617 = vmatpush.bf16.msrb.mxu0 %v3873_v45  ;;  %v4452_v45 = vld [vmem:[%s7109_s1 + $0x510] sm:$0xf]  ;;  %1861 = vmatpush.bf16.msra.mxu2 %v4457_v58  ;;  %v4137_v14 = vor.u32 %v4788_v6, %v4134_v11 }
  0x3e   :  { %1709 = vmatpush.bf16.msra.mxu1 %v4261_v16  ;;  %v4453_v55 = vor.u32 %v4876_v46, %v4452_v45  ;;  %v4068_v46 = vld [vmem:[%s7109_s1 + $0x210] sm:$0xf] }
  0x3f   :  { %v4069_v56 = vor.u32 %v4780_v47, %v4068_v46 }
  0x40   :  { %1763 = vmatpush.bf16.msra.mxu3 %v4453_v55 }
  0x41   :  { %1618 = vmatpush.bf16.msrb.mxu0 %v3809_v60 }
  0x42   :  { %1710 = vmatpush.bf16.msra.mxu1 %v4197_v35 }
  0x44   :  { %1335 = vmatmul.bf16.gmra.mxu0 %v5232_v0 }
  0x45   :  { %1433 = vmatmul.bf16.gmra.mxu2 %v5232_v0  ;;  %1807 = vmatpush.bf16.msra.mxu0 %v4265_v20 }
  0x46   :  { %4573 = vmatmul.msk.bf16.gmra.mxu3 %vm1292_vm0, %v5234_v1  ;;  %1711 = vmatpush.bf16.msra.mxu1 %v4133_v10 }
  0x48   :  { %4565 = vmatmul.msk.bf16.gmra.mxu1 %vm1292_vm0, %v5234_v1 }
  0x49   :  { %1808 = vmatpush.bf16.msra.mxu0 %v4201_v38 }
  0x4a   :  { %1712 = vmatpush.bf16.msra.mxu1 %v4069_v56 }
  0x4d   :  { %1809 = vmatpush.bf16.msra.mxu0 %v4137_v14 }
  0x54   :  { %1340 = vmatmul.bf16.gmra.mxu0 %v5278_v18 }
  0x55   :  { %1438 = vmatmul.bf16.gmra.mxu2 %v5278_v18 }
  0x56   :  { %4574 = vmatmul.msk.bf16.gmra.mxu3 %vm1292_vm0, %v5280_v19 }
  0x58   :  { %4566 = vmatmul.msk.bf16.gmra.mxu1 %vm1292_vm0, %v5280_v19 }
  0x64   :  { %1345 = vmatmul.bf16.gmra.mxu0 %v5312_v30 }
  0x65   :  { %1443 = vmatmul.bf16.gmra.mxu2 %v5312_v30 }
  0x66   :  { %4575 = vmatmul.msk.bf16.gmra.mxu3 %vm1292_vm0, %v5314_v31 }
  0x68   :  { %4567 = vmatmul.msk.bf16.gmra.mxu1 %vm1292_vm0, %v5314_v31 }
  0x74   :  { %1350 = vmatmul.bf16.gmra.mxu0 %v5358_v50 }
  0x75   :  { %1448 = vmatmul.bf16.gmra.mxu2 %v5358_v50 }
  0x76   :  { %4576 = vmatmul.msk.bf16.gmra.mxu3 %vm1292_vm0, %v5360_v53 }
  0x78   :  { %4568 = vmatmul.msk.bf16.gmra.mxu1 %vm1292_vm0, %v5360_v53 }
  0x84   :  { %1355 = vmatmul.bf16.gmra.mxu0 %v5392_v3 }
  0x85   :  { %1453 = vmatmul.bf16.gmra.mxu2 %v5392_v3 }
  0x86   :  { %4577 = vmatmul.msk.bf16.gmra.mxu3 %vm1292_vm0, %v5394_v4 }
  0x88   :  { %4569 = vmatmul.msk.bf16.gmra.mxu1 %vm1292_vm0, %v5394_v4 }
  0x94   :  { %1360 = vmatmul.bf16.gmra.mxu0 %v5432_v21 }
  0x95   :  { %v1375_v22 = vpop.f32.mrf.mxu1  ;;  %1458 = vmatmul.bf16.gmra.mxu2 %v5432_v21 }
  0x96   :  { %4578 = vmatmul.msk.bf16.vlgmr.msrb.gmra.mxu3 %vm1292_vm0, %v5062_v54 }
  0x98   :  { %1521 = vmatmul.bf16.vlgmr.msrb.gmra.mxu1 %v5152_v32 }
  0x99   :  { %v1473_v23 = vpop.f32.mrf.mxu3 }
  0x9d   :  { %v1377_v25 = vpop.f32.mrf.mxu1 }
  0xa1   :  { %v1475_v34 = vpop.f32.mrf.mxu3  ;;  %v1326_v37 = vpop.f32.mrf.mxu0 }
  0xa2   :  { %v1327_v39 = vadd.f32 %v1326_v37, %v5445_v26 }
  0xa4   :  { %v1376_v40 = vadd.f32 %v1375_v22, %v1327_v39  ;;  %1619 = vmatmul.bf16.vlgmr.msrb.gmra.mxu0 %v5152_v32 }
  0xa5   :  { %v1380_v41 = vpop.f32.mrf.mxu1  ;;  %4586 = vmatmul.msk.bf16.vlgmr.msrb.gmra.mxu2 %vm1292_vm0, %v5062_v54 }
  0xa6   :  { %4579 = vmatmul.msk.bf16.gmra.mxu3 %vm1292_vm0, %v5154_v33  ;;  %v2885_v62 = vmax.f32 %v1376_v40, 0.0 }
  0xa8   :  { %1526 = vmatmul.bf16.gmra.mxu1 %v5198_v51  ;;  %v1424_v43 = vpop.f32.mrf.mxu2 }
  0xa9   :  { %v1478_v44 = vpop.f32.mrf.mxu3  ;;  %v1425_v48 = vadd.f32 %v1424_v43, %v5466_v42  ;;  %v1328_v49 = vpop.f32.mrf.mxu0 }
  0xaa   :  { %v1329_v57 = vadd.f32 %v1328_v49, %v5445_v26 }
  0xab   :  { %v1474_v59 = vadd.f32 %v1473_v23, %v1425_v48  ;;  %v4772_v48 = vld [vmem:[%s7109_s1 + $0x214] sm:$0xf] }
  0xac   :  { %v1378_v60 = vadd.f32 %v1377_v25, %v1329_v57  ;;  %v4070_v57 = vld [vmem:[%s7109_s1 + $0x250] sm:$0xf0] }
  0xad   :  { %v1382_v61 = vpop.f32.mrf.mxu1  ;;  %v2886_v22 = vmax.f32 %v1474_v59, 0.0 }
  0xae   :  { %v2901_v63 = vmax.f32 %v1378_v60, 0.0  ;;  %v4073_v60 = vor.u32 %v4772_v48, %v4070_v57  ;;  %v4388_v48 = vld [vmem:[%s7109_s1 + $0x490] sm:$0xf]  ;;  %v4390_v57 = vld [vmem:[%s7109_s1 + $0x4d0] sm:$0xf0] }
  0xb0   :  { %v3141_v7 = vadd.f32 %v2901_v63, %v2885_v62  ;;  %v1426_v8 = vpop.f32.mrf.mxu2  ;;  %1810 = vmatpush.bf16.msra.mxu0 %v4073_v60 }
  0xb1   :  { %v1480_v9 = vpop.f32.mrf.mxu3  ;;  %v1427_v12 = vadd.f32 %v1426_v8, %v5466_v42  ;;  %v1331_v13 = vpop.f32.mrf.mxu0 }
  0xb2   :  { %v1332_v15 = vadd.f32 %v1331_v13, %v5445_v26 }
  0xb3   :  { %v1476_v16 = vadd.f32 %v1475_v34, %v1427_v12 }
  0xb4   :  { %v1381_v17 = vadd.f32 %v1380_v41, %v1332_v15  ;;  %1624 = vmatmul.bf16.gmra.mxu0 %v5198_v51 }
  0xb5   :  { %v1385_v20 = vpop.f32.mrf.mxu1  ;;  %v2902_v23 = vmax.f32 %v1476_v16, 0.0  ;;  %4587 = vmatmul.msk.bf16.gmra.mxu2 %vm1292_vm0, %v5154_v33 }
  0xb6   :  { %4580 = vmatmul.msk.bf16.gmra.mxu3 %vm1292_vm0, %v5200_v52  ;;  %v2917_v25 = vmax.f32 %v1381_v17, 0.0 }
  0xb7   :  { %v3154_v27 = vadd.f32 %v2902_v23, %v2886_v22 }
  0xb8   :  { %1531 = vmatmul.bf16.gmra.mxu1 %v5232_v0  ;;  %v3142_v28 = vadd.f32 %v3141_v7, %v2917_v25  ;;  %v1429_v29 = vpop.f32.mrf.mxu2 }
  0xb9   :  { %v1483_v34 = vpop.f32.mrf.mxu3  ;;  %v1430_v35 = vadd.f32 %v1429_v29, %v5466_v42  ;;  %v1333_v36 = vpop.f32.mrf.mxu0 }
  0xba   :  { %v1334_v37 = vadd.f32 %v1333_v36, %v5445_v26 }
  0xbb   :  { %v1479_v38 = vadd.f32 %v1478_v44, %v1430_v35 }
  0xbc   :  { %v1383_v39 = vadd.f32 %v1382_v61, %v1334_v37 }
  0xbd   :  { %v1387_v40 = vpop.f32.mrf.mxu1  ;;  %v2918_v41 = vmax.f32 %v1479_v38, 0.0 }
  0xbe   :  { %v2933_v43 = vmax.f32 %v1383_v39, 0.0 }
  0xbf   :  { %v3155_v45 = vadd.f32 %v3154_v27, %v2918_v41 }
  0xc0   :  { %v3143_v49 = vadd.f32 %v3142_v28, %v2933_v43  ;;  %v1431_v55 = vpop.f32.mrf.mxu2 }
  0xc1   :  { %v1485_v44 = vpop.f32.mrf.mxu3  ;;  %v1432_v58 = vadd.f32 %v1431_v55, %v5466_v42  ;;  %v1336_v59 = vpop.f32.mrf.mxu0  ;;  %v4852_v55 = vld [vmem:[%s7109_s1 + $0x494] sm:$0xf] }
  0xc2   :  { %v1337_v61 = vadd.f32 %v1336_v59, %v5445_v26  ;;  %v4764_v59 = vld [vmem:[%s7109_s1 + $0x1cc] sm:$0xf0] }
  0xc3   :  { %v1481_v62 = vadd.f32 %v1480_v9, %v1432_v58  ;;  %v4004_v58 = vld [vmem:[%s7109_s1 + $0x190] sm:$0xf] }
  0xc4   :  { %v1386_v63 = vadd.f32 %v1385_v20, %v1337_v61  ;;  %1629 = vmatmul.bf16.gmra.mxu0 %v5232_v0  ;;  %v4393_v61 = vor.u32 %v4852_v55, %v4390_v57 }
  0xc5   :  { %v1390_v2 = vpop.f32.mrf.mxu1  ;;  %v2934_v5 = vmax.f32 %v1481_v62, 0.0  ;;  %4588 = vmatmul.msk.bf16.gmra.mxu2 %vm1292_vm0, %v5200_v52  ;;  %v4005_v62 = vor.u32 %v4764_v59, %v4004_v58 }
  0xc6   :  { %4581 = vmatmul.msk.bf16.gmra.mxu3 %vm1292_vm0, %v5234_v1  ;;  %v2949_v6 = vmax.f32 %v1386_v63, 0.0  ;;  %v4756_v63 = vld [vmem:[%s7109_s1 + $0x194] sm:$0xf]  ;;  %1862 = vmatpush.bf16.msra.mxu2 %v4393_v61 }
  0xc7   :  { %v3156_v7 = vadd.f32 %v3155_v45, %v2934_v5  ;;  %1713 = vmatpush.bf16.msra.mxu1 %v4005_v62 }
  0xc8   :  { %1536 = vmatmul.bf16.gmra.mxu1 %v5278_v18  ;;  %v3144_v8 = vadd.f32 %v3143_v49, %v2949_v6  ;;  %v1434_v10 = vpop.f32.mrf.mxu2  ;;  %v4860_v49 = vld [vmem:[%s7109_s1 + $0x4cc] sm:$0xf0] }
  0xc9   :  { %v1488_v11 = vpop.f32.mrf.mxu3  ;;  %v1435_v9 = vadd.f32 %v1434_v10, %v5466_v42  ;;  %v1338_v12 = vpop.f32.mrf.mxu0  ;;  %v4389_v56 = vor.u32 %v4860_v49, %v4388_v48 }
  0xca   :  { %v1339_v13 = vadd.f32 %v1338_v12, %v5445_v26  ;;  %v4748_v12 = vld [vmem:[%s7109_s1 + $0x14c] sm:$0xf0] }
  0xcb   :  { %v1484_v14 = vadd.f32 %v1483_v34, %v1435_v9  ;;  %1764 = vmatpush.bf16.msra.mxu3 %v4389_v56  ;;  %v3940_v9 = vld [vmem:[%s7109_s1 + $0x110] sm:$0xf]  ;;  %v4326_v56 = vld [vmem:[%s7109_s1 + $0x450] sm:$0xf0] }
  0xcc   :  { %v1388_v15 = vadd.f32 %v1387_v40, %v1339_v13  ;;  %v4740_v13 = vld [vmem:[%s7109_s1 + $0x114] sm:$0xf] }
  0xcd   :  { %v1392_v16 = vpop.f32.mrf.mxu1  ;;  %v2950_v17 = vmax.f32 %v1484_v14, 0.0 }
  0xce   :  { %v2965_v20 = vmax.f32 %v1388_v15, 0.0 }
  0xcf   :  { %v3157_v22 = vadd.f32 %v3156_v7, %v2950_v17  ;;  %v3941_v17 = vor.u32 %v4748_v12, %v3940_v9  ;;  %v4732_v9 = vld [vmem:[%s7109_s1 + $0xcc] sm:$0xf0] }
  0xd0   :  { %v3145_v23 = vadd.f32 %v3144_v8, %v2965_v20  ;;  %v1436_v25 = vpop.f32.mrf.mxu2  ;;  %v3942_v20 = vld [vmem:[%s7109_s1 + $0x150] sm:$0xf0] }
  0xd1   :  { %v1490_v27 = vpop.f32.mrf.mxu3  ;;  %v1437_v28 = vadd.f32 %v1436_v25, %v5466_v42  ;;  %v1341_v29 = vpop.f32.mrf.mxu0  ;;  %v3945_v25 = vor.u32 %v4740_v13, %v3942_v20  ;;  %1714 = vmatpush.bf16.msra.mxu1 %v3941_v17 }
  0xd2   :  { %v1342_v35 = vadd.f32 %v1341_v29, %v5445_v26 }
  0xd3   :  { %v1486_v36 = vadd.f32 %v1485_v44, %v1437_v28 }
  0xd4   :  { %v1391_v37 = vadd.f32 %v1390_v2, %v1342_v35  ;;  %1634 = vmatmul.bf16.gmra.mxu0 %v5278_v18  ;;  %v4006_v2 = vld [vmem:[%s7109_s1 + $0x1d0] sm:$0xf0] }
  0xd5   :  { %v1395_v38 = vpop.f32.mrf.mxu1  ;;  %v2966_v39 = vmax.f32 %v1486_v36, 0.0  ;;  %4589 = vmatmul.msk.bf16.gmra.mxu2 %vm1292_vm0, %v5234_v1  ;;  %v4009_v7 = vor.u32 %v4756_v63, %v4006_v2 }
  0xd6   :  { %4582 = vmatmul.msk.bf16.gmra.mxu3 %vm1292_vm0, %v5280_v19  ;;  %v2981_v34 = vmax.f32 %v1391_v37, 0.0 }
  0xd7   :  { %v3158_v40 = vadd.f32 %v3157_v22, %v2966_v39  ;;  %1811 = vmatpush.bf16.msra.mxu0 %v4009_v7 }
  0xd8   :  { %1541 = vmatmul.bf16.gmra.mxu1 %v5312_v30  ;;  %v3146_v41 = vadd.f32 %v3145_v23, %v2981_v34  ;;  %v1439_v43 = vpop.f32.mrf.mxu2 }
  0xd9   :  { %v5535_v45 = vpop.f32.mrf.mxu3  ;;  %v1440_v46 = vadd.f32 %v1439_v43, %v5466_v42  ;;  %v1343_v47 = vpop.f32.mrf.mxu0 }
  0xda   :  { %v1344_v44 = vadd.f32 %v1343_v47, %v5445_v26  ;;  %v4836_v47 = vld [vmem:[%s7109_s1 + $0x414] sm:$0xf] }
  0xdb   :  { %v1489_v60 = vadd.f32 %v1488_v11, %v1440_v46  ;;  %1812 = vmatpush.bf16.msra.mxu0 %v3945_v25  ;;  %v4329_v59 = vor.u32 %v4836_v47, %v4326_v56 }
  0xdc   :  { %v1393_v5 = vadd.f32 %v1392_v16, %v1344_v44 }
  0xdd   :  { %v1397_v6 = vpop.f32.mrf.mxu1  ;;  %v2982_v8 = vmax.f32 %v1489_v60, 0.0  ;;  %1863 = vmatpush.bf16.msra.mxu2 %v4329_v59 }
  0xde   :  { %v2997_v10 = vmax.f32 %v1393_v5, 0.0 }
  0xdf   :  { %v3159_v11 = vadd.f32 %v3158_v40, %v2982_v8 }
  0xe0   :  { %v3147_v14 = vadd.f32 %v3146_v41, %v2997_v10  ;;  %v1441_v15 = vpop.f32.mrf.mxu2 }
  0xe1   :  { %v1495_v16 = vpop.f32.mrf.mxu3  ;;  %v1442_v22 = vadd.f32 %v1441_v15, %v5466_v42  ;;  %v1346_v23 = vpop.f32.mrf.mxu0  ;;  %v3878_v15 = vld [vmem:[%s7109_s1 + $0xd0] sm:$0xf0] }
  0xe2   :  { %v3148_v28 = vrot.slane %v3147_v14, 4  ;;  %v1347_v29 = vadd.f32 %v1346_v23, %v5445_v26 }
  0xe3   :  { %v1491_v35 = vadd.f32 %v1490_v27, %v1442_v22  ;;  %v4324_v27 = vld [vmem:[%s7109_s1 + $0x410] sm:$0xf] }
  0xe4   :  { %v3149_v36 = vadd.f32 %v3148_v28, %v3147_v14  ;;  %v1396_v37 = vadd.f32 %v1395_v38, %v1347_v29  ;;  %1639 = vmatmul.bf16.gmra.mxu0 %v5312_v30  ;;  %v4844_v38 = vld [vmem:[%s7109_s1 + $0x44c] sm:$0xf0] }
  0xe5   :  { %v1400_v39 = vpop.f32.mrf.mxu1  ;;  %v2998_v34 = vmax.f32 %v1491_v35, 0.0  ;;  %4590 = vmatmul.msk.bf16.gmra.mxu2 %vm1292_vm0, %v5280_v19  ;;  %v4325_v44 = vor.u32 %v4844_v38, %v4324_v27 }
  0xe6   :  { %4583 = vmatmul.msk.bf16.gmra.mxu3 %vm1292_vm0, %v5314_v31  ;;  %v3150_v40 = vrot.slane %v3149_v36, 2  ;;  %v3013_v7 = vmax.f32 %v1396_v37, 0.0  ;;  %v4716_v37 = vld [vmem:[%s7109_s1 + $0x4c] sm:$0xf0] }
  0xe7   :  { %v3160_v41 = vadd.f32 %v3159_v11, %v2998_v34  ;;  %1765 = vmatpush.bf16.msra.mxu3 %v4325_v44  ;;  %v3876_v11 = vld [vmem:[%s7109_s1 + $0x90] sm:$0xf] }
  0xe8   :  { %1546 = vmatmul.bf16.gmra.mxu1 %v5358_v50  ;;  %v1444_v43 = vpop.f32.mrf.mxu2  ;;  %v3151_v57 = vadd.f32 %v3150_v40, %v3149_v36  ;;  %v3877_v14 = vor.u32 %v4732_v9, %v3876_v11  ;;  %v3812_v36 = vld [vmem:[%s7109_s1 + $0x10] sm:$0xf] }
  0xe9   :  { %v5583_v46 = vpop.f32.mrf.mxu3  ;;  %v3161_v48 = vrot.slane %v3160_v41, 4  ;;  %v1445_v49 = vadd.f32 %v1444_v43, %v5466_v42  ;;  %v1348_v55 = vpop.f32.mrf.mxu0 }
  0xea   :  { %v1349_v58 = vadd.f32 %v1348_v55, %v5445_v26  ;;  %v3152_v5 = vrot.slane %v3151_v57, 1  ;;  %1715 = vmatpush.bf16.msra.mxu1 %v3877_v14 }
  0xeb   :  { %v3162_v60 = vadd.f32 %v3161_v48, %v3160_v41  ;;  %v1494_v61 = vadd.f32 %v5535_v45, %v1445_v49  ;;  %v4724_v45 = vld [vmem:[%s7109_s1 + $0x94] sm:$0xf]  ;;  %v3813_v41 = vor.u32 %v4716_v37, %v3812_v36 }
  0xec   :  { %v1398_v62 = vadd.f32 %v1397_v6, %v1349_v58  ;;  %v3881_v23 = vor.u32 %v4724_v45, %v3878_v15  ;;  %v3153_v28 = vadd.f32 %v3152_v5, %v3151_v57 }
  0xed   :  { %v1402_v63 = vpop.f32.mrf.mxu1  ;;  %v3163_v2 = vrot.slane %v3162_v60, 2  ;;  %v3014_v27 = vmax.f32 %v1494_v61, 0.0 }
  0xee   :  { %v3029_v8 = vmax.f32 %v1398_v62, 0.0  ;;  %1813 = vmatpush.bf16.msra.mxu0 %v3881_v23  ;;  %1716 = vmatpush.bf16.msra.mxu1 %v3813_v41  ;;  %v3557_v47 = vmul.f32 0.015625, %v3153_v28 }
  0xef   :  { %v3164_v10 = vadd.f32 %v3163_v2, %v3162_v60 }
  0xf0   :  { %v3349_v6 = vadd.f32 %v3029_v8, %v3013_v7  ;;  %v1446_v12 = vpop.f32.mrf.mxu2  ;;  %v4708_v8 = vld [vmem:[%s7109_s1 + $0x14] sm:$0xf] }
  0xf1   :  { %v1500_v13 = vpop.f32.mrf.mxu3  ;;  %v3165_v17 = vrot.slane %v3164_v10, 1  ;;  %v1447_v20 = vadd.f32 %v1446_v12, %v5466_v42  ;;  %v1351_v22 = vpop.f32.mrf.mxu0 }
  0xf2   :  { %v1352_v25 = vadd.f32 %v1351_v22, %v5445_v26 }
  0xf3   :  { %v3166_v29 = vadd.f32 %v3165_v17, %v3164_v10  ;;  %v1496_v35 = vadd.f32 %v1495_v16, %v1447_v20  ;;  %v3814_v10 = vld [vmem:[%s7109_s1 + $0x50] sm:$0xf0] }
  0xf4   :  { %v1401_v34 = vadd.f32 %v1400_v39, %v1352_v25  ;;  %1644 = vmatmul.bf16.gmra.mxu0 %v5358_v50 }
  0xf5   :  { %v1405_v40 = vpop.f32.mrf.mxu1  ;;  %v3558_v43 = vmul.f32 0.015625, %v3166_v29  ;;  %v3030_v38 = vmax.f32 %v1496_v35, 0.0  ;;  %4591 = vmatmul.msk.bf16.gmra.mxu2 %vm1292_vm0, %v5314_v31 }
  0xf6   :  { %4584 = vmatmul.msk.bf16.gmra.mxu3 %vm1292_vm0, %v5360_v53  ;;  %v3045_v16 = vmax.f32 %v1401_v34, 0.0 }
  0xf7   :  { %v3621_v48 = vrot.slane %v3558_v43, 6  ;;  %v3362_v49 = vadd.f32 %v3030_v38, %v3014_v27 }
  0xf8   :  { %1551 = vmatmul.bf16.gmra.mxu1 %v5392_v3  ;;  %v3350_v39 = vadd.f32 %v3349_v6, %v3045_v16  ;;  %v1449_v55 = vpop.f32.mrf.mxu2  ;;  %v3817_v6 = vor.u32 %v4708_v8, %v3814_v10 }
  0xf9   :  { %v1503_v44 = vpop.f32.mrf.mxu3  ;;  %v5627_v56 = vsel %vm3645_vm1, %v3557_v47, %v3621_v48  ;;  %v1450_v57 = vadd.f32 %v1449_v55, %v5466_v42  ;;  %v1353_v58 = vpop.f32.mrf.mxu0 }
  0xfa   :  { %v1354_v59 = vadd.f32 %v1353_v58, %v5445_v26  ;;  %1814 = vmatpush.bf16.msra.mxu0 %v3817_v6  ;;  %v4885_v6 = vld [vmem:[%s7109_s1 + $0x59c] sm:$0xf] }
  0xfb   :  { %v1499_v60 = vadd.f32 %v5583_v46, %v1450_v57 }
  0xfc   :  { %v1403_v61 = vadd.f32 %v1402_v63, %v1354_v59 }
  0xfd   :  { %v1407_v62 = vpop.f32.mrf.mxu1  ;;  %v3046_v2 = vmax.f32 %v1499_v60, 0.0 }
  0xfe   :  { %v3061_v5 = vmax.f32 %v1403_v61, 0.0 }
  0xff   :  { %v3363_v7 = vadd.f32 %v3362_v49, %v3046_v2 }
 0x100   :  { %v3351_v11 = vadd.f32 %v3350_v39, %v3061_v5  ;;  %v1451_v9 = vpop.f32.mrf.mxu2  ;;  %v5652_v39 = vperm.slane %v5442_v24, 2 }
 0x101   :  { %v1505_v45 = vpop.f32.mrf.mxu3  ;;  %v1452_v12 = vadd.f32 %v1451_v9, %v5466_v42  ;;  %v1356_v46 = vpop.f32.mrf.mxu0  ;;  %v4524_v9 = vld [vmem:[%s7109_s1 + $0x598] sm:$0xf] }
 0x102   :  { %v1357_v63 = vadd.f32 %v1356_v46, %v5445_v26 }
 0x103   :  { %v1501_v14 = vadd.f32 %v1500_v13, %v1452_v12 }
 0x104   :  { %v1406_v15 = vadd.f32 %v1405_v40, %v1357_v63  ;;  %1649 = vmatmul.bf16.gmra.mxu0 %v5392_v3  ;;  %v4526_v63 = vld [vmem:[%s7109_s1 + $0x5d8] sm:$0xf0] }
 0x105   :  { %v1410_v17 = vpop.f32.mrf.mxu1  ;;  %v3062_v20 = vmax.f32 %v1501_v14, 0.0  ;;  %4592 = vmatmul.msk.bf16.gmra.mxu2 %vm1292_vm0, %v5360_v53  ;;  %v4268_v14 = vld [vmem:[%s7109_s1 + $0x398] sm:$0xf] }
 0x106   :  { %4585 = vmatmul.msk.bf16.gmra.mxu3 %vm1292_vm0, %v5394_v4  ;;  %v3077_v22 = vmax.f32 %v1406_v15, 0.0  ;;  %v4829_v15 = vld [vmem:[%s7109_s1 + $0x3d4] sm:$0xf0] }
 0x107   :  { %v3364_v23 = vadd.f32 %v3363_v7, %v3062_v20  ;;  %v4529_v20 = vor.u32 %v4885_v6, %v4526_v63 }
 0x108   :  { %1556 = vmatmul.bf16.gmra.mxu1 %v5432_v21  ;;  %v3352_v25 = vadd.f32 %v3351_v11, %v3077_v22  ;;  %v1454_v28 = vpop.f32.mrf.mxu2  ;;  %v4269_v22 = vor.u32 %v4829_v15, %v4268_v14 }
 0x109   :  { %v1508_v29 = vpop.f32.mrf.mxu3  ;;  %v1455_v13 = vadd.f32 %v1454_v28, %v5466_v42  ;;  %v1358_v35 = vpop.f32.mrf.mxu0  ;;  %2056 = vmatpush.bf16.msrb.mxu2 %v4529_v20 }
 0x10a   :  { %v1359_v36 = vadd.f32 %v1358_v35, %v5445_v26  ;;  %1905 = vmatpush.bf16.msrb.mxu1 %v4269_v22 }
 0x10b   :  { %v1504_v37 = vadd.f32 %v1503_v44, %v1455_v13 }
 0x10c   :  { %v1408_v34 = vadd.f32 %v1407_v62, %v1359_v36 }
 0x10d   :  { %v1412_v40 = vpop.f32.mrf.mxu1  ;;  %v3078_v41 = vmax.f32 %v1504_v37, 0.0  ;;  %v4813_v37 = vld [vmem:[%s7109_s1 + $0x354] sm:$0xf0] }
 0x10e   :  { %v3093_v43 = vmax.f32 %v1408_v34, 0.0 }
 0x10f   :  { %v3365_v27 = vadd.f32 %v3364_v23, %v3078_v41  ;;  %v4270_v23 = vld [vmem:[%s7109_s1 + $0x3d8] sm:$0xf0] }
 0x110   :  { %v3353_v38 = vadd.f32 %v3352_v25, %v3093_v43  ;;  %v1456_v16 = vpop.f32.mrf.mxu2  ;;  %v4206_v43 = vld [vmem:[%s7109_s1 + $0x358] sm:$0xf0] }
 0x111   :  { %v5648_v47 = vpop.f32.mrf.mxu3  ;;  %v1457_v48 = vadd.f32 %v1456_v16, %v5466_v42  ;;  %v1361_v49 = vpop.f32.mrf.mxu0 }
 0x112   :  { %v1362_v55 = vadd.f32 %v1361_v49, %v5445_v26 }
 0x113   :  { %v1506_v57 = vadd.f32 %v1505_v45, %v1457_v48  ;;  %v4893_v45 = vld [vmem:[%s7109_s1 + $0x5d4] sm:$0xf0] }
 0x114   :  { %v1411_v58 = vadd.f32 %v1410_v17, %v1362_v55  ;;  %1654 = vmatmul.bf16.gmra.mxu0 %v5432_v21  ;;  %v4525_v46 = vor.u32 %v4893_v45, %v4524_v9  ;;  %v4869_v9 = vld [vmem:[%s7109_s1 + $0x51c] sm:$0xf] }
 0x115   :  { %v1522_v44 = vpop.f32.mrf.mxu1  ;;  %v3094_v59 = vmax.f32 %v1506_v57, 0.0  ;;  %4593 = vmatmul.msk.bf16.gmra.mxu2 %vm1292_vm0, %v5394_v4  ;;  %v4462_v45 = vld [vmem:[%s7109_s1 + $0x558] sm:$0xf0] }
 0x116   :  { %4594 = vmatmul.msk.bf16.vlgmr.msra.gmra.mxu3 %vm1292_vm0, %v5062_v54  ;;  %v1523_v60 = vadd.f32 %v1522_v44, %v5652_v39  ;;  %v3109_v61 = vmax.f32 %v1411_v58, 0.0  ;;  %v5703_v44 = vperm.slane %v5442_v24, 3 }
 0x117   :  { %v3366_v62 = vadd.f32 %v3365_v27, %v3094_v59  ;;  %1958 = vmatpush.bf16.msrb.mxu3 %v4525_v46  ;;  %v4465_v46 = vor.u32 %v4869_v9, %v4462_v45 }
 0x118   :  { %1717 = vmatmul.bf16.vlgmr.msra.gmra.mxu1 %v5152_v32  ;;  %v3354_v2 = vadd.f32 %v3353_v38, %v3109_v61  ;;  %v1459_v5 = vpop.f32.mrf.mxu2 }
 0x119   :  { %v1571_v7 = vpop.f32.mrf.mxu3  ;;  %v1460_v8 = vadd.f32 %v1459_v5, %v5466_v42  ;;  %v1363_v11 = vpop.f32.mrf.mxu0  ;;  %2057 = vmatpush.bf16.msrb.mxu2 %v4465_v46 }
 0x11a   :  { %v1572_v10 = vadd.f32 %v1571_v7, %v1523_v60  ;;  %v1364_v12 = vadd.f32 %v1363_v11, %v5445_v26  ;;  %v4821_v26 = vld [vmem:[%s7109_s1 + $0x39c] sm:$0xf] }
 0x11b   :  { %v1509_v17 = vadd.f32 %v1508_v29, %v1460_v8  ;;  %v4273_v13 = vor.u32 %v4821_v26, %v4270_v23  ;;  %v4204_v29 = vld [vmem:[%s7109_s1 + $0x318] sm:$0xf] }
 0x11c   :  { %v1413_v25 = vadd.f32 %v1412_v40, %v1364_v12  ;;  %v4205_v41 = vor.u32 %v4813_v37, %v4204_v29  ;;  %v4805_v40 = vld [vmem:[%s7109_s1 + $0x31c] sm:$0xf]  ;;  %v2887_v55 = vmax.f32 %v1572_v10, 0.0  ;;  %v4140_v29 = vld [vmem:[%s7109_s1 + $0x298] sm:$0xf] }
 0x11d   :  { %v1524_v28 = vpop.f32.mrf.mxu1  ;;  %v3110_v35 = vmax.f32 %v1509_v17, 0.0  ;;  %2003 = vmatpush.bf16.msrb.mxu0 %v4273_v13  ;;  %v4209_v38 = vor.u32 %v4805_v40, %v4206_v43  ;;  %v4797_v37 = vld [vmem:[%s7109_s1 + $0x2d4] sm:$0xf0]  ;;  %v4142_v40 = vld [vmem:[%s7109_s1 + $0x2d8] sm:$0xf0] }
 0x11e   :  { %v1525_v36 = vadd.f32 %v1524_v28, %v5652_v39  ;;  %v3125_v34 = vmax.f32 %v1413_v25, 0.0  ;;  %1906 = vmatpush.bf16.msrb.mxu1 %v4205_v41  ;;  %v4789_v41 = vld [vmem:[%s7109_s1 + $0x29c] sm:$0xf] }
 0x11f   :  { %v3367_v27 = vadd.f32 %v3366_v62, %v3110_v35 }
 0x120   :  { %v3355_v16 = vadd.f32 %v3354_v2, %v3125_v34  ;;  %v1461_v48 = vpop.f32.mrf.mxu2  ;;  %v4141_v34 = vor.u32 %v4797_v37, %v4140_v29 }
 0x121   :  { %v1573_v49 = vpop.f32.mrf.mxu3  ;;  %v1462_v57 = vadd.f32 %v1461_v48, %v5466_v42  ;;  %v1620_v59 = vpop.f32.mrf.mxu0  ;;  %2004 = vmatpush.bf16.msrb.mxu0 %v4209_v38  ;;  %v4460_v42 = vld [vmem:[%s7109_s1 + $0x518] sm:$0xf] }
 0x122   :  { %v1574_v58 = vadd.f32 %v1573_v49, %v1525_v36  ;;  %v3356_v60 = vrot.slane %v3355_v16, 4  ;;  %v1621_v10 = vadd.f32 %v1620_v59, %v5703_v44  ;;  %1907 = vmatpush.bf16.msrb.mxu1 %v4141_v34 }
 0x123   :  { %v1511_v61 = vadd.f32 %v5648_v47, %v1462_v57  ;;  %v4877_v47 = vld [vmem:[%s7109_s1 + $0x554] sm:$0xf0] }
 0x124   :  { %v2903_v5 = vmax.f32 %v1574_v58, 0.0  ;;  %v3357_v7 = vadd.f32 %v3356_v60, %v3355_v16  ;;  %1815 = vmatmul.bf16.vlgmr.msra.gmra.mxu0 %v5152_v32  ;;  %v4461_v11 = vor.u32 %v4877_v47, %v4460_v42  ;;  %v4145_v16 = vor.u32 %v4789_v41, %v4142_v40 }
 0x125   :  { %v1527_v62 = vpop.f32.mrf.mxu1  ;;  %v3126_v2 = vmax.f32 %v1511_v61, 0.0  ;;  %4602 = vmatmul.msk.bf16.vlgmr.msra.gmra.mxu2 %vm1292_vm0, %v5062_v54 }
 0x126   :  { %v3167_v8 = vadd.f32 %v2903_v5, %v2887_v55  ;;  %4595 = vmatmul.msk.bf16.gmra.mxu3 %vm1292_vm0, %v5154_v33  ;;  %v1528_v24 = vadd.f32 %v1527_v62, %v5652_v39  ;;  %v3358_v6 = vrot.slane %v3357_v7, 2  ;;  %2005 = vmatpush.bf16.msrb.mxu0 %v4145_v16  ;;  %v4076_v16 = vld [vmem:[%s7109_s1 + $0x218] sm:$0xf] }
 0x127   :  { %v3368_v12 = vadd.f32 %v3367_v27, %v3126_v2  ;;  %1959 = vmatpush.bf16.msrb.mxu3 %v4461_v11 }
 0x128   :  { %1722 = vmatmul.bf16.gmra.mxu1 %v5198_v51  ;;  %v1669_v14 = vpop.f32.mrf.mxu2  ;;  %v3359_v26 = vadd.f32 %v3358_v6, %v3357_v7 }
 0x129   :  { %v1576_v63 = vpop.f32.mrf.mxu3  ;;  %v3369_v15 = vrot.slane %v3368_v12, 4  ;;  %v1670_v20 = vadd.f32 %v1669_v14, %v1621_v10  ;;  %v1622_v22 = vpop.f32.mrf.mxu0 }
 0x12a   :  { %v1577_v17 = vadd.f32 %v1576_v63, %v1528_v24  ;;  %v3360_v43 = vrot.slane %v3359_v26, 1  ;;  %v1623_v38 = vadd.f32 %v1622_v22, %v5703_v44 }
 0x12b   :  { %v3370_v23 = vadd.f32 %v3369_v15, %v3368_v12  ;;  %v2888_v60 = vmax.f32 %v1670_v20, 0.0 }
 0x12c   :  { %v2919_v25 = vmax.f32 %v1577_v17, 0.0  ;;  %v3361_v61 = vadd.f32 %v3360_v43, %v3359_v26 }
 0x12d   :  { %v1529_v28 = vpop.f32.mrf.mxu1  ;;  %v3371_v13 = vrot.slane %v3370_v23, 2 }
 0x12e   :  { %v3168_v35 = vadd.f32 %v3167_v8, %v2919_v25  ;;  %v1530_v36 = vadd.f32 %v1529_v28, %v5652_v39  ;;  %v3573_v11 = vmul.f32 0.015625, %v3361_v61 }
 0x12f   :  { %v3372_v27 = vadd.f32 %v3371_v13, %v3370_v23 }
 0x130   :  { %v1671_v49 = vpop.f32.mrf.mxu2 }
 0x131   :  { %v1578_v48 = vpop.f32.mrf.mxu3  ;;  %v3373_v55 = vrot.slane %v3372_v27, 1  ;;  %v1672_v58 = vadd.f32 %v1671_v49, %v1623_v38  ;;  %v1625_v59 = vpop.f32.mrf.mxu0  ;;  %v4773_v49 = vld [vmem:[%s7109_s1 + $0x21c] sm:$0xf] }
 0x132   :  { %v1579_v57 = vadd.f32 %v1578_v48, %v1530_v36  ;;  %v1626_v2 = vadd.f32 %v1625_v59, %v5703_v44  ;;  %v4781_v48 = vld [vmem:[%s7109_s1 + $0x254] sm:$0xf0] }
 0x133   :  { %v3374_v5 = vadd.f32 %v3373_v55, %v3372_v27  ;;  %v2904_v62 = vmax.f32 %v1672_v58, 0.0  ;;  %v4077_v55 = vor.u32 %v4781_v48, %v4076_v16  ;;  %v4014_v16 = vld [vmem:[%s7109_s1 + $0x1d8] sm:$0xf0] }
 0x134   :  { %v2935_v7 = vmax.f32 %v1579_v57, 0.0  ;;  %1820 = vmatmul.bf16.gmra.mxu0 %v5198_v51  ;;  %v4078_v57 = vld [vmem:[%s7109_s1 + $0x258] sm:$0xf0] }
 0x135   :  { %v1532_v8 = vpop.f32.mrf.mxu1  ;;  %v3574_v10 = vmul.f32 0.015625, %v3374_v5  ;;  %v3180_v42 = vadd.f32 %v2904_v62, %v2888_v60  ;;  %4603 = vmatmul.msk.bf16.gmra.mxu2 %vm1292_vm0, %v5154_v33  ;;  %v4081_v58 = vor.u32 %v4773_v49, %v4078_v57  ;;  %1908 = vmatpush.bf16.msrb.mxu1 %v4077_v55 }
 0x136   :  { %v3169_v24 = vadd.f32 %v3168_v35, %v2935_v7  ;;  %4596 = vmatmul.msk.bf16.gmra.mxu3 %vm1292_vm0, %v5200_v52  ;;  %v1533_v47 = vadd.f32 %v1532_v8, %v5652_v39 }
 0x137   :  { %v3633_v9 = vrot.slane %v3574_v10, 6  ;;  %2006 = vmatpush.bf16.msrb.mxu0 %v4081_v58 }
 0x138   :  { %1727 = vmatmul.bf16.gmra.mxu1 %v5232_v0  ;;  %v1674_v6 = vpop.f32.mrf.mxu2 }
 0x139   :  { %v1581_v45 = vpop.f32.mrf.mxu3  ;;  %v5749_v12 = vsel %vm3645_vm1, %v3573_v11, %v3633_v9  ;;  %v1675_v63 = vadd.f32 %v1674_v6, %v1626_v2  ;;  %v1627_v14 = vpop.f32.mrf.mxu0 }
 0x13a   :  { %v1582_v46 = vadd.f32 %v1581_v45, %v1533_v47  ;;  %v1628_v25 = vadd.f32 %v1627_v14, %v5703_v44 }
 0x13b   :  { %v2920_v17 = vmax.f32 %v1675_v63, 0.0 }
 0x13c   :  { %v2951_v15 = vmax.f32 %v1582_v46, 0.0 }
 0x13d   :  { %v1534_v20 = vpop.f32.mrf.mxu1  ;;  %v3181_v26 = vadd.f32 %v3180_v42, %v2920_v17 }
 0x13e   :  { %v3170_v22 = vadd.f32 %v3169_v24, %v2951_v15  ;;  %v1535_v23 = vadd.f32 %v1534_v20, %v5652_v39 }
 0x140   :  { %v1676_v13 = vpop.f32.mrf.mxu2 }
 0x141   :  { %v1583_v28 = vpop.f32.mrf.mxu3  ;;  %v1677_v36 = vadd.f32 %v1676_v13, %v1628_v25  ;;  %v1630_v29 = vpop.f32.mrf.mxu0  ;;  %v4861_v13 = vld [vmem:[%s7109_s1 + $0x4d4] sm:$0xf0] }
 0x142   :  { %v1584_v35 = vadd.f32 %v1583_v28, %v1535_v23  ;;  %v1631_v41 = vadd.f32 %v1630_v29, %v5703_v44  ;;  %v4396_v28 = vld [vmem:[%s7109_s1 + $0x498] sm:$0xf] }
 0x143   :  { %v2936_v34 = vmax.f32 %v1677_v36, 0.0 }
 0x144   :  { %v2967_v37 = vmax.f32 %v1584_v35, 0.0  ;;  %1825 = vmatmul.bf16.gmra.mxu0 %v5232_v0  ;;  %v4853_v35 = vld [vmem:[%s7109_s1 + $0x49c] sm:$0xf] }
 0x145   :  { %v1537_v40 = vpop.f32.mrf.mxu1  ;;  %v3182_v27 = vadd.f32 %v3181_v26, %v2936_v34  ;;  %4604 = vmatmul.msk.bf16.gmra.mxu2 %vm1292_vm0, %v5200_v52  ;;  %v4398_v34 = vld [vmem:[%s7109_s1 + $0x4d8] sm:$0xf0] }
 0x146   :  { %v3171_v43 = vadd.f32 %v3170_v22, %v2967_v37  ;;  %4597 = vmatmul.msk.bf16.gmra.mxu3 %vm1292_vm0, %v5234_v1  ;;  %v1538_v38 = vadd.f32 %v1537_v40, %v5652_v39  ;;  %v4397_v37 = vor.u32 %v4861_v13, %v4396_v28  ;;  %v4765_v40 = vld [vmem:[%s7109_s1 + $0x1d4] sm:$0xf0] }
 0x148   :  { %1732 = vmatmul.bf16.gmra.mxu1 %v5278_v18  ;;  %v1679_v60 = vpop.f32.mrf.mxu2  ;;  %1960 = vmatpush.bf16.msrb.mxu3 %v4397_v37 }
 0x149   :  { %v1586_v59 = vpop.f32.mrf.mxu3  ;;  %v1680_v5 = vadd.f32 %v1679_v60, %v1631_v41  ;;  %v1632_v7 = vpop.f32.mrf.mxu0  ;;  %v4012_v41 = vld [vmem:[%s7109_s1 + $0x198] sm:$0xf] }
 0x14a   :  { %v1587_v61 = vadd.f32 %v1586_v59, %v1538_v38  ;;  %v1633_v47 = vadd.f32 %v1632_v7, %v5703_v44  ;;  %v4757_v38 = vld [vmem:[%s7109_s1 + $0x19c] sm:$0xf]  ;;  %v3948_v59 = vld [vmem:[%s7109_s1 + $0x118] sm:$0xf] }
 0x14b   :  { %v2952_v2 = vmax.f32 %v1680_v5, 0.0  ;;  %v4017_v49 = vor.u32 %v4757_v38, %v4014_v16  ;;  %v4749_v60 = vld [vmem:[%s7109_s1 + $0x154] sm:$0xf0]  ;;  %v3950_v7 = vld [vmem:[%s7109_s1 + $0x158] sm:$0xf0] }
 0x14c   :  { %v2983_v62 = vmax.f32 %v1587_v61, 0.0  ;;  %v4741_v61 = vld [vmem:[%s7109_s1 + $0x11c] sm:$0xf]  ;;  %v3949_v5 = vor.u32 %v4749_v60, %v3948_v59 }
 0x14d   :  { %v1539_v8 = vpop.f32.mrf.mxu1  ;;  %v3183_v24 = vadd.f32 %v3182_v27, %v2952_v2  ;;  %v4013_v27 = vor.u32 %v4765_v40, %v4012_v41  ;;  %2007 = vmatpush.bf16.msrb.mxu0 %v4017_v49  ;;  %v3953_v2 = vor.u32 %v4741_v61, %v3950_v7  ;;  %v3884_v40 = vld [vmem:[%s7109_s1 + $0x98] sm:$0xf]  ;;  %v3886_v16 = vld [vmem:[%s7109_s1 + $0xd8] sm:$0xf0] }
 0x14e   :  { %v3172_v10 = vadd.f32 %v3171_v43, %v2983_v62  ;;  %v1540_v42 = vadd.f32 %v1539_v8, %v5652_v39  ;;  %v4401_v43 = vor.u32 %v4853_v35, %v4398_v34  ;;  %v3820_v7 = vld [vmem:[%s7109_s1 + $0x18] sm:$0xf] }
 0x14f   :  { %1909 = vmatpush.bf16.msrb.mxu1 %v4013_v27  ;;  %v4725_v27 = vld [vmem:[%s7109_s1 + $0x9c] sm:$0xf] }
 0x150   :  { %v1681_v9 = vpop.f32.mrf.mxu2  ;;  %2058 = vmatpush.bf16.msrb.mxu2 %v4401_v43  ;;  %v4733_v43 = vld [vmem:[%s7109_s1 + $0xd4] sm:$0xf0]  ;;  %v3889_v49 = vor.u32 %v4725_v27, %v3886_v16 }
 0x151   :  { %v1588_v11 = vpop.f32.mrf.mxu3  ;;  %v1682_v6 = vadd.f32 %v1681_v9, %v1633_v47  ;;  %v1635_v46 = vpop.f32.mrf.mxu0  ;;  %2008 = vmatpush.bf16.msrb.mxu0 %v3953_v2  ;;  %v3885_v38 = vor.u32 %v4733_v43, %v3884_v40  ;;  %v4717_v2 = vld [vmem:[%s7109_s1 + $0x54] sm:$0xf0] }
 0x152   :  { %v1589_v45 = vadd.f32 %v1588_v11, %v1540_v42  ;;  %v1636_v22 = vadd.f32 %v1635_v46, %v5703_v44  ;;  %v4332_v46 = vld [vmem:[%s7109_s1 + $0x418] sm:$0xf] }
 0x153   :  { %v2968_v14 = vmax.f32 %v1682_v6, 0.0  ;;  %1910 = vmatpush.bf16.msrb.mxu1 %v3949_v5 }
 0x154   :  { %v2999_v63 = vmax.f32 %v1589_v45, 0.0  ;;  %1830 = vmatmul.bf16.gmra.mxu0 %v5278_v18 }
 0x155   :  { %v5776_v15 = vpop.f32.mrf.mxu1  ;;  %v3184_v20 = vadd.f32 %v3183_v24, %v2968_v14  ;;  %4605 = vmatmul.msk.bf16.gmra.mxu2 %vm1292_vm0, %v5234_v1  ;;  %2009 = vmatpush.bf16.msrb.mxu0 %v3889_v49 }
 0x156   :  { %v3173_v17 = vadd.f32 %v3172_v10, %v2999_v63  ;;  %4598 = vmatmul.msk.bf16.gmra.mxu3 %vm1292_vm0, %v5280_v19  ;;  %v4845_v63 = vld [vmem:[%s7109_s1 + $0x454] sm:$0xf0] }
 0x157   :  { %v4333_v14 = vor.u32 %v4845_v63, %v4332_v46  ;;  %1911 = vmatpush.bf16.msrb.mxu1 %v3885_v38 }
 0x158   :  { %v3174_v26 = vrot.slane %v3173_v17, 4  ;;  %1737 = vmatmul.bf16.gmra.mxu1 %v5312_v30  ;;  %v1684_v25 = vpop.f32.mrf.mxu2 }
 0x159   :  { %v5784_v23 = vpop.f32.mrf.mxu3  ;;  %v1685_v36 = vadd.f32 %v1684_v25, %v1636_v22  ;;  %v1637_v29 = vpop.f32.mrf.mxu0  ;;  %1961 = vmatpush.bf16.msrb.mxu3 %v4333_v14  ;;  %v1543_v14 = vadd.f32 %v5776_v15, %v5652_v39 }
 0x15a   :  { %v3175_v57 = vadd.f32 %v3174_v26, %v3173_v17  ;;  %v1638_v62 = vadd.f32 %v1637_v29, %v5703_v44  ;;  %v4837_v17 = vld [vmem:[%s7109_s1 + $0x41c] sm:$0xf] }
 0x15b   :  { %v2984_v48 = vmax.f32 %v1685_v36, 0.0 }
 0x15c   :  { %v3176_v24 = vrot.slane %v3175_v57, 2 }
 0x15d   :  { %v5810_v55 = vpop.f32.mrf.mxu1  ;;  %v3185_v58 = vadd.f32 %v3184_v20, %v2984_v48  ;;  %v4334_v20 = vld [vmem:[%s7109_s1 + $0x458] sm:$0xf0] }
 0x15e   :  { %v3177_v45 = vadd.f32 %v3176_v24, %v3175_v57  ;;  %v4337_v26 = vor.u32 %v4837_v17, %v4334_v20  ;;  %v1545_v17 = vadd.f32 %v5810_v55, %v5652_v39 }
 0x160   :  { %v1686_v10 = vpop.f32.mrf.mxu2  ;;  %v3178_v13 = vrot.slane %v3177_v45, 1  ;;  %2059 = vmatpush.bf16.msrb.mxu2 %v4337_v26 }
 0x161   :  { %v5825_v8 = vpop.f32.mrf.mxu3  ;;  %v1687_v42 = vadd.f32 %v1686_v10, %v1638_v62  ;;  %v5827_v47 = vpop.f32.mrf.mxu0 }
 0x162   :  { %v3179_v34 = vadd.f32 %v3178_v13, %v3177_v45  ;;  %v1594_v26 = vadd.f32 %v5825_v8, %v1545_v17 }
 0x163   :  { %v3000_v11 = vmax.f32 %v1687_v42, 0.0  ;;  %v3821_v42 = vor.u32 %v4717_v2, %v3820_v7 }
 0x164   :  { %1835 = vmatmul.bf16.gmra.mxu0 %v5312_v30  ;;  %v3559_v59 = vmul.f32 0.015625, %v3179_v34  ;;  %v3031_v40 = vmax.f32 %v1594_v26, 0.0 }
 0x165   :  { %v1547_v9 = vpop.f32.mrf.mxu1  ;;  %v3186_v6 = vadd.f32 %v3185_v58, %v3000_v11  ;;  %4606 = vmatmul.msk.bf16.gmra.mxu2 %vm1292_vm0, %v5280_v19  ;;  %1912 = vmatpush.bf16.msrb.mxu1 %v3821_v42 }
 0x166   :  { %4599 = vmatmul.msk.bf16.gmra.mxu3 %vm1292_vm0, %v5314_v31  ;;  %v3622_v10 = vrot.slane %v3559_v59, 4  ;;  %v1548_v13 = vadd.f32 %v1547_v9, %v5652_v39 }
 0x167   :  { %v3187_v22 = vrot.slane %v3186_v6, 4 }
 0x168   :  { %1742 = vmatmul.bf16.gmra.mxu1 %v5358_v50  ;;  %v5847_v28 = vpop.f32.mrf.mxu2 }
 0x169   :  { %v1596_v25 = vpop.f32.mrf.mxu3  ;;  %v3188_v35 = vadd.f32 %v3187_v22, %v3186_v6  ;;  %v5849_v36 = vpop.f32.mrf.mxu0  ;;  %v1592_v22 = vadd.f32 %v5784_v23, %v1543_v14 }
 0x16a   :  { %v1597_v8 = vadd.f32 %v1596_v25, %v1548_v13  ;;  %v1643_v14 = vadd.f32 %v5849_v36, %v5703_v44 }
 0x16b   :  { %v3189_v29 = vrot.slane %v3188_v35, 2  ;;  %v3015_v23 = vmax.f32 %v1592_v22, 0.0 }
 0x16c   :  { %v3047_v16 = vmax.f32 %v1597_v8, 0.0 }
 0x16d   :  { %v1549_v37 = vpop.f32.mrf.mxu1  ;;  %v3190_v41 = vadd.f32 %v3189_v29, %v3188_v35  ;;  %v3822_v35 = vld [vmem:[%s7109_s1 + $0x58] sm:$0xf0] }
 0x16e   :  { %v1550_v55 = vadd.f32 %v1549_v37, %v5652_v39  ;;  %v3375_v37 = vadd.f32 %v3031_v40, %v3015_v23 }
 0x16f   :  { %v3191_v48 = vrot.slane %v3190_v41, 1 }
 0x170   :  { %v5863_v58 = vpop.f32.mrf.mxu2  ;;  %v3376_v7 = vadd.f32 %v3375_v37, %v3047_v16 }
 0x171   :  { %v1598_v57 = vpop.f32.mrf.mxu3  ;;  %v3192_v60 = vadd.f32 %v3191_v48, %v3190_v41  ;;  %v5865_v61 = vpop.f32.mrf.mxu0 }
 0x172   :  { %v1599_v27 = vadd.f32 %v1598_v57, %v1550_v55  ;;  %v1646_v17 = vadd.f32 %v5865_v61, %v5703_v44 }
 0x173   :  { %v3560_v5 = vmul.f32 0.015625, %v3192_v60 }
 0x174   :  { %1840 = vmatmul.bf16.gmra.mxu0 %v5358_v50  ;;  %v3063_v60 = vmax.f32 %v1599_v27, 0.0 }
 0x175   :  { %v1552_v62 = vpop.f32.mrf.mxu1  ;;  %v3623_v24 = vrot.slane %v3560_v5, 2  ;;  %4607 = vmatmul.msk.bf16.gmra.mxu2 %vm1292_vm0, %v5314_v31 }
 0x176   :  { %4600 = vmatmul.msk.bf16.gmra.mxu3 %vm1292_vm0, %v5360_v53  ;;  %v1553_v9 = vadd.f32 %v1552_v62, %v5652_v39 }
 0x177   :  { %v3648_v11 = vsel %vm3647_vm2, %v3622_v10, %v3623_v24  ;;  %v3377_v24 = vadd.f32 %v3376_v7, %v3063_v60 }
 0x178   :  { %1747 = vmatmul.bf16.gmra.mxu1 %v5392_v3  ;;  %v5882_v45 = vsel %vm3649_vm3, %v5627_v56, %v3648_v11  ;;  %v1694_v46 = vpop.f32.mrf.mxu2  ;;  %v4709_v56 = vld [vmem:[%s7109_s1 + $0x1c] sm:$0xf] }
 0x179   :  { %v1601_v6 = vpop.f32.mrf.mxu3  ;;  %v1647_v63 = vpop.f32.mrf.mxu0  ;;  %v3825_v34 = vor.u32 %v4709_v56, %v3822_v35  ;;  %v1692_v56 = vadd.f32 %v5863_v58, %v1643_v14  ;;  %v1695_v55 = vadd.f32 %v1694_v46, %v1646_v17 }
 0x17a   :  { %v1602_v48 = vadd.f32 %v1601_v6, %v1553_v9  ;;  %v1641_v6 = vadd.f32 %v5827_v47, %v5703_v44  ;;  %v1648_v61 = vadd.f32 %v1647_v63, %v5703_v44 }
 0x17b   :  { %2010 = vmatpush.bf16.msrb.mxu0 %v3825_v34 }
 0x17c   :  { %v3079_v62 = vmax.f32 %v1602_v48, 0.0  ;;  %v1690_v36 = vadd.f32 %v5847_v28, %v1641_v6 }
 0x17d   :  { %v1554_v20 = vpop.f32.mrf.mxu1 }
 0x17e   :  { %v1555_v38 = vadd.f32 %v1554_v20, %v5652_v39  ;;  %v3378_v20 = vadd.f32 %v3377_v24, %v3079_v62  ;;  %v3016_v63 = vmax.f32 %v1690_v36, 0.0  ;;  %v4532_v62 = vld [vmem:[%s7109_s1 + $0x5a0] sm:$0xf] }
 0x17f   :  { %v4276_v24 = vld [vmem:[%s7109_s1 + $0x3a0] sm:$0xf] }
 0x180   :  { %v1696_v15 = vpop.f32.mrf.mxu2 }
 0x181   :  { %v1603_v29 = vpop.f32.mrf.mxu3  ;;  %v1650_v41 = vpop.f32.mrf.mxu0  ;;  %v1697_v8 = vadd.f32 %v1696_v15, %v1648_v61  ;;  %v4212_v61 = vld [vmem:[%s7109_s1 + $0x320] sm:$0xf] }
 0x182   :  { %v1604_v5 = vadd.f32 %v1603_v29, %v1555_v38  ;;  %v1651_v23 = vadd.f32 %v1650_v41, %v5703_v44  ;;  %v3048_v41 = vmax.f32 %v1695_v55, 0.0  ;;  %v4814_v55 = vld [vmem:[%s7109_s1 + $0x35c] sm:$0xf0] }
 0x183   :  { %v3064_v37 = vmax.f32 %v1697_v8, 0.0 }
 0x184   :  { %1845 = vmatmul.bf16.gmra.mxu0 %v5392_v3  ;;  %v3095_v42 = vmax.f32 %v1604_v5, 0.0 }
 0x185   :  { %v1557_v43 = vpop.f32.mrf.mxu1  ;;  %4608 = vmatmul.msk.bf16.gmra.mxu2 %vm1292_vm0, %v5360_v53 }
 0x186   :  { %4601 = vmatmul.msk.bf16.gmra.mxu3 %vm1292_vm0, %v5394_v4  ;;  %v1558_v49 = vadd.f32 %v1557_v43, %v5652_v39  ;;  %v3379_v35 = vadd.f32 %v3378_v20, %v3095_v42  ;;  %v3032_v43 = vmax.f32 %v1692_v56, 0.0  ;;  %v4830_v42 = vld [vmem:[%s7109_s1 + $0x3dc] sm:$0xf0]  ;;  %v4822_v20 = vld [vmem:[%s7109_s1 + $0x3a4] sm:$0xf] }
 0x187   :  { %v4277_v56 = vor.u32 %v4830_v42, %v4276_v24  ;;  %v4870_v42 = vld [vmem:[%s7109_s1 + $0x524] sm:$0xf] }
 0x188   :  { %1752 = vmatmul.bf16.gmra.mxu1 %v5432_v21  ;;  %v1699_v59 = vpop.f32.mrf.mxu2  ;;  %v3388_v60 = vadd.f32 %v3032_v43, %v3016_v63 }
 0x189   :  { %v1606_v25 = vpop.f32.mrf.mxu3  ;;  %v1652_v57 = vpop.f32.mrf.mxu0  ;;  %v1700_v38 = vadd.f32 %v1699_v59, %v1651_v23  ;;  %v4894_v59 = vld [vmem:[%s7109_s1 + $0x5dc] sm:$0xf0]  ;;  %v4806_v23 = vld [vmem:[%s7109_s1 + $0x324] sm:$0xf]  ;;  %2101 = vmatpush.bf16.msra.mxu1 %v4277_v56 }
 0x18a   :  { %v1607_v2 = vadd.f32 %v1606_v25, %v1558_v49  ;;  %v1653_v46 = vadd.f32 %v1652_v57, %v5703_v44  ;;  %v4886_v57 = vld [vmem:[%s7109_s1 + $0x5a4] sm:$0xf] }
 0x18b   :  { %v3080_v6 = vmax.f32 %v1700_v38, 0.0 }
 0x18c   :  { %v3111_v22 = vmax.f32 %v1607_v2, 0.0  ;;  %v4533_v2 = vor.u32 %v4894_v59, %v4532_v62 }
 0x18d   :  { %v1559_v10 = vpop.f32.mrf.mxu1 }
 0x18e   :  { %v1560_v11 = vadd.f32 %v1559_v10, %v5652_v39  ;;  %v5918_v39 = vld [vmem:[%s7110_s2] sm:$0xff]  ;;  %v3380_v40 = vadd.f32 %v3379_v35, %v3111_v22  ;;  %2154 = vmatpush.bf16.msra.mxu3 %v4533_v2 }
 0x18f   :  { %v5921_v47 = vperm.slane %v5918_v39, 4  ;;  %v4534_v10 = vld [vmem:[%s7109_s1 + $0x5e0] sm:$0xf0]  ;;  %v4468_v2 = vld [vmem:[%s7109_s1 + $0x520] sm:$0xf] }
 0x190   :  { %v1701_v13 = vpop.f32.mrf.mxu2  ;;  %v4537_v17 = vor.u32 %v4886_v57, %v4534_v10  ;;  %v4278_v35 = vld [vmem:[%s7109_s1 + $0x3e0] sm:$0xf0]  ;;  %v4878_v10 = vld [vmem:[%s7109_s1 + $0x55c] sm:$0xf0] }
 0x191   :  { %v1608_v26 = vpop.f32.mrf.mxu3  ;;  %v1655_v34 = vpop.f32.mrf.mxu0  ;;  %v1702_v48 = vadd.f32 %v1701_v13, %v1653_v46  ;;  %v4281_v36 = vor.u32 %v4822_v20, %v4278_v35  ;;  %v4469_v24 = vor.u32 %v4878_v10, %v4468_v2 }
 0x192   :  { %v1609_v29 = vadd.f32 %v1608_v26, %v1560_v11  ;;  %v1656_v15 = vadd.f32 %v1655_v34, %v5703_v44  ;;  %v3389_v11 = vadd.f32 %v3388_v60, %v3048_v41  ;;  %2252 = vmatpush.bf16.msra.mxu2 %v4537_v17  ;;  %v5974_v41 = vperm.slane %v5918_v39, 5 }
 0x193   :  { %v3096_v26 = vmax.f32 %v1702_v48, 0.0  ;;  %2199 = vmatpush.bf16.msra.mxu0 %v4281_v36  ;;  %2155 = vmatpush.bf16.msra.mxu3 %v4469_v24 }
 0x194   :  { %v3127_v58 = vmax.f32 %v1609_v29, 0.0  ;;  %1850 = vmatmul.bf16.gmra.mxu0 %v5432_v21  ;;  %v3390_v29 = vadd.f32 %v3389_v11, %v3064_v37  ;;  %v4470_v11 = vld [vmem:[%s7109_s1 + $0x560] sm:$0xf0] }
 0x195   :  { %v1718_v9 = vpop.f32.mrf.mxu1  ;;  %4609 = vmatmul.msk.bf16.gmra.mxu2 %vm1292_vm0, %v5394_v4 }
 0x196   :  { %v3381_v27 = vadd.f32 %v3380_v40, %v3127_v58  ;;  %4610 = vmatmul.msk.bf16.vlgmr.msrb.gmra.mxu3 %vm1292_vm0, %v5062_v54  ;;  %v1719_v28 = vadd.f32 %v1718_v9, %v5921_v47  ;;  %v4213_v40 = vor.u32 %v4814_v55, %v4212_v61  ;;  %v4214_v58 = vld [vmem:[%s7109_s1 + $0x360] sm:$0xf0]  ;;  %v3391_v8 = vadd.f32 %v3390_v29, %v3080_v6 }
 0x198   :  { %1913 = vmatmul.bf16.vlgmr.msrb.gmra.mxu1 %v5152_v32  ;;  %v3382_v16 = vrot.slane %v3381_v27, 4  ;;  %v1704_v49 = vpop.f32.mrf.mxu2  ;;  %v3392_v38 = vadd.f32 %v3391_v8, %v3096_v26  ;;  %v4798_v8 = vld [vmem:[%s7109_s1 + $0x2dc] sm:$0xf0] }
 0x199   :  { %v1767_v25 = vpop.f32.mrf.mxu3  ;;  %v1657_v7 = vpop.f32.mrf.mxu0  ;;  %v1705_v14 = vadd.f32 %v1704_v49, %v1656_v15  ;;  %2102 = vmatpush.bf16.msra.mxu1 %v4213_v40 }
 0x19a   :  { %v1768_v5 = vadd.f32 %v1767_v25, %v1719_v28  ;;  %v3383_v22 = vadd.f32 %v3382_v16, %v3381_v27  ;;  %v1658_v43 = vadd.f32 %v1657_v7, %v5703_v44  ;;  %v4217_v27 = vor.u32 %v4806_v23, %v4214_v58  ;;  %v4148_v58 = vld [vmem:[%s7109_s1 + $0x2a0] sm:$0xf] }
 0x19b   :  { %v3112_v9 = vmax.f32 %v1705_v14, 0.0  ;;  %v4473_v14 = vor.u32 %v4870_v42, %v4470_v11 }
 0x19c   :  { %v3384_v28 = vrot.slane %v3383_v22, 2  ;;  %v2889_v15 = vmax.f32 %v1768_v5, 0.0  ;;  %2200 = vmatpush.bf16.msra.mxu0 %v4217_v27  ;;  %v4150_v27 = vld [vmem:[%s7109_s1 + $0x2e0] sm:$0xf0] }
 0x19d   :  { %v1720_v13 = vpop.f32.mrf.mxu1  ;;  %v3393_v49 = vadd.f32 %v3392_v38, %v3112_v9  ;;  %2253 = vmatpush.bf16.msra.mxu2 %v4473_v14  ;;  %v4790_v9 = vld [vmem:[%s7109_s1 + $0x2a4] sm:$0xf] }
 0x19e   :  { %v1721_v34 = vadd.f32 %v1720_v13, %v5921_v47  ;;  %v3385_v62 = vadd.f32 %v3384_v28, %v3383_v22 }
 0x1a0   :  { %v1706_v46 = vpop.f32.mrf.mxu2  ;;  %v3386_v17 = vrot.slane %v3385_v62, 1 }
 0x1a1   :  { %v1769_v63 = vpop.f32.mrf.mxu3  ;;  %v1707_v37 = vadd.f32 %v1706_v46, %v1658_v43  ;;  %v1816_v48 = vpop.f32.mrf.mxu0  ;;  %v4149_v43 = vor.u32 %v4798_v8, %v4148_v58 }
 0x1a2   :  { %v1770_v16 = vadd.f32 %v1769_v63, %v1721_v34  ;;  %v1817_v44 = vadd.f32 %v1816_v48, %v5974_v41  ;;  %v3387_v36 = vadd.f32 %v3386_v17, %v3385_v62  ;;  %v4153_v63 = vor.u32 %v4790_v9, %v4150_v27 }
 0x1a3   :  { %v3128_v25 = vmax.f32 %v1707_v37, 0.0  ;;  %2103 = vmatpush.bf16.msra.mxu1 %v4149_v43 }
 0x1a4   :  { %v2905_v60 = vmax.f32 %v1770_v16, 0.0  ;;  %2011 = vmatmul.bf16.vlgmr.msrb.gmra.mxu0 %v5152_v32  ;;  %v3575_v38 = vmul.f32 0.015625, %v3387_v36 }
 0x1a5   :  { %v1723_v7 = vpop.f32.mrf.mxu1  ;;  %v3394_v59 = vadd.f32 %v3393_v49, %v3128_v25  ;;  %4618 = vmatmul.msk.bf16.vlgmr.msrb.gmra.mxu2 %vm1292_vm0, %v5062_v54  ;;  %2201 = vmatpush.bf16.msra.mxu0 %v4153_v63  ;;  %v4084_v63 = vld [vmem:[%s7109_s1 + $0x220] sm:$0xf] }
 0x1a6   :  { %v3193_v57 = vadd.f32 %v2905_v60, %v2889_v15  ;;  %4611 = vmatmul.msk.bf16.gmra.mxu3 %vm1292_vm0, %v5154_v33  ;;  %v1724_v5 = vadd.f32 %v1723_v7, %v5921_v47 }
 0x1a7   :  { %v3395_v6 = vrot.slane %v3394_v59, 4 }
 0x1a8   :  { %1918 = vmatmul.bf16.gmra.mxu1 %v5198_v51  ;;  %v1865_v22 = vpop.f32.mrf.mxu2 }
 0x1a9   :  { %v1772_v20 = vpop.f32.mrf.mxu3  ;;  %v3396_v26 = vadd.f32 %v3395_v6, %v3394_v59  ;;  %v1866_v56 = vadd.f32 %v1865_v22, %v1817_v44  ;;  %v1818_v35 = vpop.f32.mrf.mxu0  ;;  %v3634_v59 = vrot.slane %v3575_v38, 4  ;;  %v4782_v38 = vld [vmem:[%s7109_s1 + $0x25c] sm:$0xf0] }
 0x1aa   :  { %v1773_v13 = vadd.f32 %v1772_v20, %v1724_v5  ;;  %v1819_v46 = vadd.f32 %v1818_v35, %v5974_v41 }
 0x1ab   :  { %v3397_v29 = vrot.slane %v3396_v26, 2  ;;  %v2890_v62 = vmax.f32 %v1866_v56, 0.0 }
 0x1ac   :  { %v2921_v34 = vmax.f32 %v1773_v13, 0.0 }
 0x1ad   :  { %v1725_v61 = vpop.f32.mrf.mxu1  ;;  %v3398_v55 = vadd.f32 %v3397_v29, %v3396_v26 }
 0x1ae   :  { %v3194_v23 = vadd.f32 %v3193_v57, %v2921_v34  ;;  %v1726_v40 = vadd.f32 %v1725_v61, %v5921_v47 }
 0x1af   :  { %v3399_v28 = vrot.slane %v3398_v55, 1 }
 0x1b0   :  { %v1867_v37 = vpop.f32.mrf.mxu2 }
 0x1b1   :  { %v1774_v15 = vpop.f32.mrf.mxu3  ;;  %v3400_v16 = vadd.f32 %v3399_v28, %v3398_v55  ;;  %v1868_v49 = vadd.f32 %v1867_v37, %v1819_v46  ;;  %v1821_v25 = vpop.f32.mrf.mxu0 }
 0x1b2   :  { %v1775_v48 = vadd.f32 %v1774_v15, %v1726_v40  ;;  %v1822_v57 = vadd.f32 %v1821_v25, %v5974_v41 }
 0x1b3   :  { %v3576_v60 = vmul.f32 0.015625, %v3400_v16  ;;  %v2906_v7 = vmax.f32 %v1868_v49, 0.0  ;;  %v4085_v16 = vor.u32 %v4782_v38, %v4084_v63  ;;  %v4086_v49 = vld [vmem:[%s7109_s1 + $0x260] sm:$0xf0] }
 0x1b4   :  { %v2937_v44 = vmax.f32 %v1775_v48, 0.0  ;;  %2016 = vmatmul.bf16.gmra.mxu0 %v5198_v51  ;;  %v4774_v48 = vld [vmem:[%s7109_s1 + $0x224] sm:$0xf] }
 0x1b5   :  { %v1728_v5 = vpop.f32.mrf.mxu1  ;;  %v3635_v2 = vrot.slane %v3576_v60, 2  ;;  %v3206_v24 = vadd.f32 %v2906_v7, %v2890_v62  ;;  %4619 = vmatmul.msk.bf16.gmra.mxu2 %vm1292_vm0, %v5154_v33  ;;  %2104 = vmatpush.bf16.msra.mxu1 %v4085_v16  ;;  %v4022_v16 = vld [vmem:[%s7109_s1 + $0x1e0] sm:$0xf0] }
 0x1b6   :  { %v3195_v10 = vadd.f32 %v3194_v23, %v2937_v44  ;;  %4612 = vmatmul.msk.bf16.gmra.mxu3 %vm1292_vm0, %v5200_v52  ;;  %v1729_v42 = vadd.f32 %v1728_v5, %v5921_v47  ;;  %v4089_v44 = vor.u32 %v4774_v48, %v4086_v49 }
 0x1b7   :  { %v3661_v11 = vsel %vm3647_vm2, %v3634_v59, %v3635_v2 }
 0x1b8   :  { %1923 = vmatmul.bf16.gmra.mxu1 %v5232_v0  ;;  %v3662_v6 = vsel %vm3649_vm3, %v5749_v12, %v3661_v11  ;;  %v1870_v17 = vpop.f32.mrf.mxu2  ;;  %2202 = vmatpush.bf16.msra.mxu0 %v4089_v44 }
 0x1b9   :  { %v1777_v14 = vpop.f32.mrf.mxu3  ;;  %v3676_v20 = vrot.slane %v3662_v6, 7  ;;  %v1871_v26 = vadd.f32 %v1870_v17, %v1822_v57  ;;  %v1823_v13 = vpop.f32.mrf.mxu0 }
 0x1ba   :  { %v1778_v22 = vadd.f32 %v1777_v14, %v1729_v42  ;;  %v1824_v58 = vadd.f32 %v1823_v13, %v5974_v41 }
 0x1bb   :  { %v2922_v35 = vmax.f32 %v1871_v26, 0.0  ;;  %v3678_v29 = vsel %vm3677_vm4, %v3676_v20, %v5882_v45 }
 0x1bc   :  { %v2953_v56 = vmax.f32 %v1778_v22, 0.0  ;;  %v3680_v36 = vsel %vm3679_vm5, %v3676_v20, %v3678_v29 }
 0x1bd   :  { %v1730_v34 = vpop.f32.mrf.mxu1  ;;  %v3207_v12 = vadd.f32 %v3206_v24, %v2922_v35  ;;  %v3682_v23 = vsel %vm3681_vm6, %v3676_v20, %v3680_v36 }
 0x1be   :  { %v3196_v61 = vadd.f32 %v3195_v10, %v2953_v56  ;;  %v1731_v55 = vadd.f32 %v1730_v34, %v5921_v47  ;;  %v3684_v40 = vsel %vm3683_vm7, %v3676_v20, %v3682_v23  ;;  %v4404_v23 = vld [vmem:[%s7109_s1 + $0x4a0] sm:$0xf] }
 0x1bf   :  { %3710 = vst [vmem:[#allocation2] sm:$0xff] %v3684_v40  ;;  %v4862_v40 = vld [vmem:[%s7109_s1 + $0x4dc] sm:$0xf0] }
 0x1c0   :  { %v1872_v9 = vpop.f32.mrf.mxu2 }
 0x1c1   :  { %v1779_v8 = vpop.f32.mrf.mxu3  ;;  %v1873_v27 = vadd.f32 %v1872_v9, %v1824_v58  ;;  %v1826_v45 = vpop.f32.mrf.mxu0  ;;  %v4405_v9 = vor.u32 %v4862_v40, %v4404_v23  ;;  %v4846_v23 = vld [vmem:[%s7109_s1 + $0x45c] sm:$0xf0]  ;;  %v4838_v40 = vld [vmem:[%s7109_s1 + $0x424] sm:$0xf] }
 0x1c2   :  { %v1780_v43 = vadd.f32 %v1779_v8, %v1731_v55  ;;  %v1827_v15 = vadd.f32 %v1826_v45, %v5974_v41  ;;  %v4020_v45 = vld [vmem:[%s7109_s1 + $0x1a0] sm:$0xf] }
 0x1c3   :  { %v2938_v46 = vmax.f32 %v1873_v27, 0.0  ;;  %v4406_v27 = vld [vmem:[%s7109_s1 + $0x4e0] sm:$0xf0]  ;;  %2156 = vmatpush.bf16.msra.mxu3 %v4405_v9 }
 0x1c4   :  { %v2969_v28 = vmax.f32 %v1780_v43, 0.0  ;;  %2021 = vmatmul.bf16.gmra.mxu0 %v5232_v0  ;;  %v4854_v43 = vld [vmem:[%s7109_s1 + $0x4a4] sm:$0xf] }
 0x1c5   :  { %v1733_v37 = vpop.f32.mrf.mxu1  ;;  %v3208_v60 = vadd.f32 %v3207_v12, %v2938_v46  ;;  %4620 = vmatmul.msk.bf16.gmra.mxu2 %vm1292_vm0, %v5200_v52  ;;  %v4409_v38 = vor.u32 %v4854_v43, %v4406_v27 }
 0x1c6   :  { %v3197_v25 = vadd.f32 %v3196_v61, %v2969_v28  ;;  %4613 = vmatmul.msk.bf16.gmra.mxu3 %vm1292_vm0, %v5234_v1  ;;  %v1734_v62 = vadd.f32 %v1733_v37, %v5921_v47  ;;  %v4758_v37 = vld [vmem:[%s7109_s1 + $0x1a4] sm:$0xf] }
 0x1c7   :  { %v4025_v49 = vor.u32 %v4758_v37, %v4022_v16  ;;  %2254 = vmatpush.bf16.msra.mxu2 %v4409_v38 }
 0x1c8   :  { %1928 = vmatmul.bf16.gmra.mxu1 %v5278_v18  ;;  %v1875_v59 = vpop.f32.mrf.mxu2 }
 0x1c9   :  { %v1782_v7 = vpop.f32.mrf.mxu3  ;;  %v1876_v5 = vadd.f32 %v1875_v59, %v1827_v15  ;;  %v1828_v2 = vpop.f32.mrf.mxu0  ;;  %v4766_v15 = vld [vmem:[%s7109_s1 + $0x1dc] sm:$0xf0]  ;;  %2203 = vmatpush.bf16.msra.mxu0 %v4025_v49 }
 0x1ca   :  { %v1783_v57 = vadd.f32 %v1782_v7, %v1734_v62  ;;  %v1829_v17 = vadd.f32 %v1828_v2, %v5974_v41  ;;  %v4021_v48 = vor.u32 %v4766_v15, %v4020_v45  ;;  %v3956_v59 = vld [vmem:[%s7109_s1 + $0x120] sm:$0xf] }
 0x1cb   :  { %v2954_v24 = vmax.f32 %v1876_v5, 0.0  ;;  %v4742_v5 = vld [vmem:[%s7109_s1 + $0x124] sm:$0xf] }
 0x1cc   :  { %v2985_v10 = vmax.f32 %v1783_v57, 0.0  ;;  %2105 = vmatpush.bf16.msra.mxu1 %v4021_v48  ;;  %v4750_v57 = vld [vmem:[%s7109_s1 + $0x15c] sm:$0xf0] }
 0x1cd   :  { %v1735_v42 = vpop.f32.mrf.mxu1  ;;  %v3209_v6 = vadd.f32 %v3208_v60, %v2954_v24  ;;  %v3957_v2 = vor.u32 %v4750_v57, %v3956_v59  ;;  %v4726_v59 = vld [vmem:[%s7109_s1 + $0xa4] sm:$0xf] }
 0x1ce   :  { %v3198_v11 = vadd.f32 %v3197_v25, %v2985_v10  ;;  %v1736_v14 = vadd.f32 %v1735_v42, %v5921_v47  ;;  %v3958_v10 = vld [vmem:[%s7109_s1 + $0x160] sm:$0xf0] }
 0x1cf   :  { %v3961_v42 = vor.u32 %v4742_v5, %v3958_v10  ;;  %v3894_v5 = vld [vmem:[%s7109_s1 + $0xe0] sm:$0xf0] }
 0x1d0   :  { %v1877_v22 = vpop.f32.mrf.mxu2  ;;  %2106 = vmatpush.bf16.msra.mxu1 %v3957_v2 }
 0x1d1   :  { %v1784_v20 = vpop.f32.mrf.mxu3  ;;  %v1878_v13 = vadd.f32 %v1877_v22, %v1829_v17  ;;  %v1831_v56 = vpop.f32.mrf.mxu0  ;;  %2204 = vmatpush.bf16.msra.mxu0 %v3961_v42 }
 0x1d2   :  { %v1785_v26 = vadd.f32 %v1784_v20, %v1736_v14  ;;  %v1832_v34 = vadd.f32 %v1831_v56, %v5974_v41 }
 0x1d3   :  { %v2970_v29 = vmax.f32 %v1878_v13, 0.0 }
 0x1d4   :  { %v3001_v35 = vmax.f32 %v1785_v26, 0.0  ;;  %2026 = vmatmul.bf16.gmra.mxu0 %v5278_v18 }
 0x1d5   :  { %v1738_v36 = vpop.f32.mrf.mxu1  ;;  %v3210_v12 = vadd.f32 %v3209_v6, %v2970_v29  ;;  %4621 = vmatmul.msk.bf16.gmra.mxu2 %vm1292_vm0, %v5234_v1 }
 0x1d6   :  { %v3199_v61 = vadd.f32 %v3198_v11, %v3001_v35  ;;  %4614 = vmatmul.msk.bf16.gmra.mxu3 %vm1292_vm0, %v5280_v19  ;;  %v1739_v55 = vadd.f32 %v1738_v36, %v5921_v47 }
 0x1d8   :  { %1933 = vmatmul.bf16.gmra.mxu1 %v5312_v30  ;;  %v1880_v8 = vpop.f32.mrf.mxu2  ;;  %v3200_v60 = vrot.slane %v3199_v61, 4 }
 0x1d9   :  { %v1787_v58 = vpop.f32.mrf.mxu3  ;;  %v1881_v46 = vadd.f32 %v1880_v8, %v1832_v34  ;;  %v1833_v63 = vpop.f32.mrf.mxu0  ;;  %v4342_v8 = vld [vmem:[%s7109_s1 + $0x460] sm:$0xf0] }
 0x1da   :  { %v1788_v28 = vadd.f32 %v1787_v58, %v1739_v55  ;;  %v1834_v24 = vadd.f32 %v1833_v63, %v5974_v41  ;;  %v3201_v11 = vadd.f32 %v3200_v60, %v3199_v61  ;;  %v4340_v55 = vld [vmem:[%s7109_s1 + $0x420] sm:$0xf]  ;;  %v4345_v43 = vor.u32 %v4838_v40, %v4342_v8 }
 0x1db   :  { %v2986_v25 = vmax.f32 %v1881_v46, 0.0  ;;  %v4341_v58 = vor.u32 %v4846_v23, %v4340_v55 }
 0x1dc   :  { %v3017_v17 = vmax.f32 %v1788_v28, 0.0  ;;  %v3202_v35 = vrot.slane %v3201_v11, 2  ;;  %2255 = vmatpush.bf16.msra.mxu2 %v4345_v43 }
 0x1dd   :  { %v1740_v62 = vpop.f32.mrf.mxu1  ;;  %v3211_v44 = vadd.f32 %v3210_v12, %v2986_v25  ;;  %2157 = vmatpush.bf16.msra.mxu3 %v4341_v58 }
 0x1de   :  { %v1741_v7 = vadd.f32 %v1740_v62, %v5921_v47  ;;  %v3203_v27 = vadd.f32 %v3202_v35, %v3201_v11 }
 0x1e0   :  { %v1882_v14 = vpop.f32.mrf.mxu2  ;;  %v3204_v48 = vrot.slane %v3203_v27, 1 }
 0x1e1   :  { %v1789_v6 = vpop.f32.mrf.mxu3  ;;  %v1883_v22 = vadd.f32 %v1882_v14, %v1834_v24  ;;  %v1836_v26 = vpop.f32.mrf.mxu0  ;;  %v3897_v24 = vor.u32 %v4726_v59, %v3894_v5 }
 0x1e2   :  { %v1790_v20 = vadd.f32 %v1789_v6, %v1741_v7  ;;  %v1837_v29 = vadd.f32 %v1836_v26, %v5974_v41  ;;  %v4734_v7 = vld [vmem:[%s7109_s1 + $0xdc] sm:$0xf0]  ;;  %v3205_v42 = vadd.f32 %v3204_v48, %v3203_v27 }
 0x1e3   :  { %v3002_v56 = vmax.f32 %v1883_v22, 0.0  ;;  %2205 = vmatpush.bf16.msra.mxu0 %v3897_v24 }
 0x1e4   :  { %v3033_v13 = vmax.f32 %v1790_v20, 0.0  ;;  %2031 = vmatmul.bf16.gmra.mxu0 %v5312_v30 }
 0x1e5   :  { %v1743_v34 = vpop.f32.mrf.mxu1  ;;  %v3212_v12 = vadd.f32 %v3211_v44, %v3002_v56  ;;  %4622 = vmatmul.msk.bf16.gmra.mxu2 %vm1292_vm0, %v5280_v19  ;;  %v3892_v44 = vld [vmem:[%s7109_s1 + $0xa0] sm:$0xf] }
 0x1e6   :  { %v3401_v36 = vadd.f32 %v3033_v13, %v3017_v17  ;;  %4615 = vmatmul.msk.bf16.gmra.mxu3 %vm1292_vm0, %v5314_v31  ;;  %v1744_v61 = vadd.f32 %v1743_v34, %v5921_v47  ;;  %v3893_v57 = vor.u32 %v4734_v7, %v3892_v44  ;;  %v3561_v34 = vmul.f32 0.015625, %v3205_v42 }
 0x1e7   :  { %v3213_v9 = vrot.slane %v3212_v12, 4 }
 0x1e8   :  { %1938 = vmatmul.bf16.gmra.mxu1 %v5358_v50  ;;  %v1885_v28 = vpop.f32.mrf.mxu2 }
 0x1e9   :  { %v1792_v45 = vpop.f32.mrf.mxu3  ;;  %v3214_v46 = vadd.f32 %v3213_v9, %v3212_v12  ;;  %v1886_v38 = vadd.f32 %v1885_v28, %v1837_v29  ;;  %v1838_v15 = vpop.f32.mrf.mxu0  ;;  %2107 = vmatpush.bf16.msra.mxu1 %v3893_v57  ;;  %v3828_v29 = vld [vmem:[%s7109_s1 + $0x20] sm:$0xf] }
 0x1ea   :  { %v1793_v63 = vadd.f32 %v1792_v45, %v1744_v61  ;;  %v1839_v10 = vadd.f32 %v1838_v15, %v5974_v41  ;;  %v4718_v61 = vld [vmem:[%s7109_s1 + $0x5c] sm:$0xf0] }
 0x1eb   :  { %v3215_v37 = vrot.slane %v3214_v46, 2  ;;  %v3018_v13 = vmax.f32 %v1886_v38, 0.0  ;;  %v3829_v8 = vor.u32 %v4718_v61, %v3828_v29 }
 0x1ec   :  { %v3049_v16 = vmax.f32 %v1793_v63, 0.0 }
 0x1ed   :  { %v1745_v49 = vpop.f32.mrf.mxu1  ;;  %v3216_v25 = vadd.f32 %v3215_v37, %v3214_v46  ;;  %2108 = vmatpush.bf16.msra.mxu1 %v3829_v8 }
 0x1ee   :  { %v3402_v60 = vadd.f32 %v3401_v36, %v3049_v16  ;;  %v1746_v62 = vadd.f32 %v1745_v49, %v5921_v47 }
 0x1ef   :  { %v3217_v2 = vrot.slane %v3216_v25, 1 }
 0x1f0   :  { %v1887_v6 = vpop.f32.mrf.mxu2 }
 0x1f1   :  { %v1794_v11 = vpop.f32.mrf.mxu3  ;;  %v3218_v14 = vadd.f32 %v3217_v2, %v3216_v25  ;;  %v1888_v20 = vadd.f32 %v1887_v6, %v1839_v10  ;;  %v1841_v22 = vpop.f32.mrf.mxu0  ;;  %v4710_v25 = vld [vmem:[%s7109_s1 + $0x24] sm:$0xf] }
 0x1f2   :  { %v1795_v17 = vadd.f32 %v1794_v11, %v1746_v62  ;;  %v1842_v36 = vadd.f32 %v1841_v22, %v5974_v41 }
 0x1f3   :  { %v3562_v26 = vmul.f32 0.015625, %v3218_v14  ;;  %v3034_v35 = vmax.f32 %v1888_v20, 0.0 }
 0x1f4   :  { %v3065_v56 = vmax.f32 %v1795_v17, 0.0  ;;  %2036 = vmatmul.bf16.gmra.mxu0 %v5358_v50 }
 0x1f5   :  { %v1748_v12 = vpop.f32.mrf.mxu1  ;;  %v3624_v55 = vrot.slane %v3562_v26, 6  ;;  %v3414_v40 = vadd.f32 %v3034_v35, %v3018_v13  ;;  %4623 = vmatmul.msk.bf16.gmra.mxu2 %vm1292_vm0, %v5314_v31 }
 0x1f6   :  { %v3403_v23 = vadd.f32 %v3402_v60, %v3065_v56  ;;  %4616 = vmatmul.msk.bf16.gmra.mxu3 %vm1292_vm0, %v5360_v53  ;;  %v1749_v58 = vadd.f32 %v1748_v12, %v5921_v47  ;;  %v3830_v60 = vld [vmem:[%s7109_s1 + $0x60] sm:$0xf0] }
 0x1f7   :  { %v6144_v9 = vsel %vm3645_vm1, %v3561_v34, %v3624_v55  ;;  %v3833_v7 = vor.u32 %v4710_v25, %v3830_v60  ;;  %v4887_v25 = vld [vmem:[%s7109_s1 + $0x5ac] sm:$0xf] }
 0x1f8   :  { %1943 = vmatmul.bf16.gmra.mxu1 %v5392_v3  ;;  %v1890_v27 = vpop.f32.mrf.mxu2  ;;  %v4542_v60 = vld [vmem:[%s7109_s1 + $0x5e8] sm:$0xf0] }
 0x1f9   :  { %v1797_v43 = vpop.f32.mrf.mxu3  ;;  %v1891_v28 = vadd.f32 %v1890_v27, %v1842_v36  ;;  %v1843_v46 = vpop.f32.mrf.mxu0  ;;  %2206 = vmatpush.bf16.msra.mxu0 %v3833_v7 }
 0x1fa   :  { %v1798_v45 = vadd.f32 %v1797_v43, %v1749_v58  ;;  %v1844_v49 = vadd.f32 %v1843_v46, %v5974_v41  ;;  %v6166_v43 = vperm.slane %v5918_v39, 6 }
 0x1fb   :  { %v3050_v38 = vmax.f32 %v1891_v28, 0.0 }
 0x1fc   :  { %v3081_v63 = vmax.f32 %v1798_v45, 0.0 }
 0x1fd   :  { %v1750_v15 = vpop.f32.mrf.mxu1  ;;  %v3415_v16 = vadd.f32 %v3414_v40, %v3050_v38 }
 0x1fe   :  { %v3404_v37 = vadd.f32 %v3403_v23, %v3081_v63  ;;  %v1751_v48 = vadd.f32 %v1750_v15, %v5921_v47  ;;  %v4540_v15 = vld [vmem:[%s7109_s1 + $0x5a8] sm:$0xf] }
 0x200   :  { %v1892_v44 = vpop.f32.mrf.mxu2 }
 0x201   :  { %v1799_v62 = vpop.f32.mrf.mxu3  ;;  %v1893_v57 = vadd.f32 %v1892_v44, %v1844_v49  ;;  %v1846_v5 = vpop.f32.mrf.mxu0 }
 0x202   :  { %v1800_v59 = vadd.f32 %v1799_v62, %v1751_v48  ;;  %v1847_v24 = vadd.f32 %v1846_v5, %v5974_v41  ;;  %v4284_v62 = vld [vmem:[%s7109_s1 + $0x3a8] sm:$0xf] }
 0x203   :  { %v3066_v10 = vmax.f32 %v1893_v57, 0.0  ;;  %v4545_v57 = vor.u32 %v4887_v25, %v4542_v60  ;;  %v4831_v5 = vld [vmem:[%s7109_s1 + $0x3e4] sm:$0xf0] }
 0x204   :  { %v3097_v2 = vmax.f32 %v1800_v59, 0.0  ;;  %2041 = vmatmul.bf16.gmra.mxu0 %v5392_v3 }
 0x205   :  { %v1753_v42 = vpop.f32.mrf.mxu1  ;;  %v3416_v6 = vadd.f32 %v3415_v16, %v3066_v10  ;;  %4624 = vmatmul.msk.bf16.gmra.mxu2 %vm1292_vm0, %v5360_v53  ;;  %v4286_v10 = vld [vmem:[%s7109_s1 + $0x3e8] sm:$0xf0] }
 0x206   :  { %v3405_v11 = vadd.f32 %v3404_v37, %v3097_v2  ;;  %4617 = vmatmul.msk.bf16.gmra.mxu3 %vm1292_vm0, %v5394_v4  ;;  %v1754_v14 = vadd.f32 %v1753_v42, %v5921_v47  ;;  %v4895_v37 = vld [vmem:[%s7109_s1 + $0x5e4] sm:$0xf0]  ;;  %v4823_v2 = vld [vmem:[%s7109_s1 + $0x3ac] sm:$0xf]  ;;  %2448 = vmatpush.bf16.msrb.mxu2 %v4545_v57 }
 0x207   :  { %v4541_v49 = vor.u32 %v4895_v37, %v4540_v15  ;;  %v4289_v42 = vor.u32 %v4823_v2, %v4286_v10  ;;  %v4879_v15 = vld [vmem:[%s7109_s1 + $0x564] sm:$0xf0]  ;;  %v4871_v37 = vld [vmem:[%s7109_s1 + $0x52c] sm:$0xf] }
 0x208   :  { %1948 = vmatmul.bf16.gmra.mxu1 %v5432_v21  ;;  %v1895_v20 = vpop.f32.mrf.mxu2 }
 0x209   :  { %v1802_v17 = vpop.f32.mrf.mxu3  ;;  %v1896_v26 = vadd.f32 %v1895_v20, %v1847_v24  ;;  %v1848_v13 = vpop.f32.mrf.mxu0  ;;  %2350 = vmatpush.bf16.msrb.mxu3 %v4541_v49  ;;  %v4285_v24 = vor.u32 %v4831_v5, %v4284_v62  ;;  %2395 = vmatpush.bf16.msrb.mxu0 %v4289_v42 }
 0x20a   :  { %v1803_v22 = vadd.f32 %v1802_v17, %v1754_v14  ;;  %v1849_v61 = vadd.f32 %v1848_v13, %v5974_v41  ;;  %v4807_v13 = vld [vmem:[%s7109_s1 + $0x32c] sm:$0xf] }
 0x20b   :  { %v3082_v35 = vmax.f32 %v1896_v26, 0.0  ;;  %2297 = vmatpush.bf16.msrb.mxu1 %v4285_v24  ;;  %v4815_v26 = vld [vmem:[%s7109_s1 + $0x364] sm:$0xf0] }
 0x20c   :  { %v3113_v56 = vmax.f32 %v1803_v22, 0.0  ;;  %v4220_v22 = vld [vmem:[%s7109_s1 + $0x328] sm:$0xf] }
 0x20d   :  { %v1755_v29 = vpop.f32.mrf.mxu1  ;;  %v3417_v36 = vadd.f32 %v3416_v6, %v3082_v35  ;;  %v4222_v35 = vld [vmem:[%s7109_s1 + $0x368] sm:$0xf0] }
 0x20e   :  { %v3406_v34 = vadd.f32 %v3405_v11, %v3113_v56  ;;  %v1756_v12 = vadd.f32 %v1755_v29, %v5921_v47  ;;  %v4221_v56 = vor.u32 %v4815_v26, %v4220_v22  ;;  %v4791_v22 = vld [vmem:[%s7109_s1 + $0x2ac] sm:$0xf] }
 0x210   :  { %v1897_v23 = vpop.f32.mrf.mxu2  ;;  %2298 = vmatpush.bf16.msrb.mxu1 %v4221_v56 }
 0x211   :  { %v1804_v55 = vpop.f32.mrf.mxu3  ;;  %v1898_v58 = vadd.f32 %v1897_v23, %v1849_v61  ;;  %v1851_v8 = vpop.f32.mrf.mxu0 }
 0x212   :  { %v1805_v40 = vadd.f32 %v1804_v55, %v1756_v12  ;;  %v1852_v28 = vadd.f32 %v1851_v8, %v5974_v41  ;;  %v6215_v55 = vperm.slane %v5918_v39, 7 }
 0x213   :  { %v3098_v45 = vmax.f32 %v1898_v58, 0.0 }
 0x214   :  { %v3129_v27 = vmax.f32 %v1805_v40, 0.0  ;;  %2046 = vmatmul.bf16.gmra.mxu0 %v5432_v21 }
 0x215   :  { %v1914_v46 = vpop.f32.mrf.mxu1  ;;  %v3418_v38 = vadd.f32 %v3417_v36, %v3098_v45  ;;  %4625 = vmatmul.msk.bf16.gmra.mxu2 %vm1292_vm0, %v5394_v4 }
 0x216   :  { %v3407_v63 = vadd.f32 %v3406_v34, %v3129_v27  ;;  %4626 = vmatmul.msk.bf16.vlgmr.msra.gmra.mxu3 %vm1292_vm0, %v5062_v54  ;;  %v1915_v47 = vadd.f32 %v1914_v46, %v6166_v43  ;;  %v4225_v34 = vor.u32 %v4807_v13, %v4222_v35  ;;  %v4158_v13 = vld [vmem:[%s7109_s1 + $0x2e8] sm:$0xf0] }
 0x218   :  { %2109 = vmatmul.bf16.vlgmr.msra.gmra.mxu1 %v5152_v32  ;;  %v1900_v16 = vpop.f32.mrf.mxu2  ;;  %v3408_v6 = vrot.slane %v3407_v63, 4  ;;  %2396 = vmatpush.bf16.msrb.mxu0 %v4225_v34 }
 0x219   :  { %v1963_v48 = vpop.f32.mrf.mxu3  ;;  %v1901_v44 = vadd.f32 %v1900_v16, %v1852_v28  ;;  %v1853_v59 = vpop.f32.mrf.mxu0 }
 0x21a   :  { %v1964_v7 = vadd.f32 %v1963_v48, %v1915_v47  ;;  %v1854_v29 = vadd.f32 %v1853_v59, %v5974_v41  ;;  %v3409_v36 = vadd.f32 %v3408_v6, %v3407_v63  ;;  %v4476_v47 = vld [vmem:[%s7109_s1 + $0x528] sm:$0xf]  ;;  %v4478_v48 = vld [vmem:[%s7109_s1 + $0x568] sm:$0xf0] }
 0x21b   :  { %v3114_v11 = vmax.f32 %v1901_v44, 0.0  ;;  %v4477_v16 = vor.u32 %v4879_v15, %v4476_v47  ;;  %v4481_v25 = vor.u32 %v4871_v37, %v4478_v48 }
 0x21c   :  { %v2891_v23 = vmax.f32 %v1964_v7, 0.0  ;;  %v3410_v28 = vrot.slane %v3409_v36, 2 }
 0x21d   :  { %v1916_v14 = vpop.f32.mrf.mxu1  ;;  %v3419_v17 = vadd.f32 %v3418_v38, %v3114_v11  ;;  %2351 = vmatpush.bf16.msrb.mxu3 %v4477_v16  ;;  %2449 = vmatpush.bf16.msrb.mxu2 %v4481_v25 }
 0x21e   :  { %v1917_v20 = vadd.f32 %v1916_v14, %v6166_v43  ;;  %v3411_v60 = vadd.f32 %v3410_v28, %v3409_v36 }
 0x220   :  { %v1902_v12 = vpop.f32.mrf.mxu2  ;;  %v3412_v24 = vrot.slane %v3411_v60, 1 }
 0x221   :  { %v1965_v61 = vpop.f32.mrf.mxu3  ;;  %v1903_v40 = vadd.f32 %v1902_v12, %v1854_v29  ;;  %v2012_v8 = vpop.f32.mrf.mxu0  ;;  %v4161_v29 = vor.u32 %v4791_v22, %v4158_v13 }
 0x222   :  { %v1966_v58 = vadd.f32 %v1965_v61, %v1917_v20  ;;  %v2013_v46 = vadd.f32 %v2012_v8, %v6215_v55  ;;  %v4799_v20 = vld [vmem:[%s7109_s1 + $0x2e4] sm:$0xf0]  ;;  %v3413_v34 = vadd.f32 %v3412_v24, %v3411_v60 }
 0x223   :  { %v3130_v27 = vmax.f32 %v1903_v40, 0.0  ;;  %2397 = vmatpush.bf16.msrb.mxu0 %v4161_v29  ;;  %v4783_v29 = vld [vmem:[%s7109_s1 + $0x264] sm:$0xf0] }
 0x224   :  { %v2907_v45 = vmax.f32 %v1966_v58, 0.0  ;;  %2207 = vmatmul.bf16.vlgmr.msra.gmra.mxu0 %v5152_v32 }
 0x225   :  { %v1919_v41 = vpop.f32.mrf.mxu1  ;;  %v3420_v63 = vadd.f32 %v3419_v17, %v3130_v27  ;;  %4634 = vmatmul.msk.bf16.vlgmr.msra.gmra.mxu2 %vm1292_vm0, %v5062_v54  ;;  %v4156_v17 = vld [vmem:[%s7109_s1 + $0x2a8] sm:$0xf] }
 0x226   :  { %v3219_v38 = vadd.f32 %v2907_v45, %v2891_v23  ;;  %4627 = vmatmul.msk.bf16.gmra.mxu3 %vm1292_vm0, %v5154_v33  ;;  %v1920_v39 = vadd.f32 %v1919_v41, %v6166_v43  ;;  %v4157_v26 = vor.u32 %v4799_v20, %v4156_v17 }
 0x227   :  { %v3421_v49 = vrot.slane %v3420_v63, 4 }
 0x228   :  { %2114 = vmatmul.bf16.gmra.mxu1 %v5198_v51  ;;  %v2061_v44 = vpop.f32.mrf.mxu2 }
 0x229   :  { %v1968_v62 = vpop.f32.mrf.mxu3  ;;  %v3422_v7 = vadd.f32 %v3421_v49, %v3420_v63  ;;  %v2062_v57 = vadd.f32 %v2061_v44, %v2013_v46  ;;  %v2014_v5 = vpop.f32.mrf.mxu0  ;;  %2299 = vmatpush.bf16.msrb.mxu1 %v4157_v26  ;;  %v3577_v46 = vmul.f32 0.015625, %v3413_v34  ;;  %v4775_v34 = vld [vmem:[%s7109_s1 + $0x22c] sm:$0xf] }
 0x22a   :  { %v1969_v59 = vadd.f32 %v1968_v62, %v1920_v39  ;;  %v2015_v35 = vadd.f32 %v2014_v5, %v6215_v55 }
 0x22b   :  { %v3423_v2 = vrot.slane %v3422_v7, 2  ;;  %v2892_v27 = vmax.f32 %v2062_v57, 0.0 }
 0x22c   :  { %v2923_v10 = vmax.f32 %v1969_v59, 0.0 }
 0x22d   :  { %v1921_v42 = vpop.f32.mrf.mxu1  ;;  %v3424_v11 = vadd.f32 %v3423_v2, %v3422_v7 }
 0x22e   :  { %v3220_v6 = vadd.f32 %v3219_v38, %v2923_v10  ;;  %v1922_v14 = vadd.f32 %v1921_v42, %v6166_v43 }
 0x22f   :  { %v3425_v56 = vrot.slane %v3424_v11, 1 }
 0x230   :  { %v2063_v12 = vpop.f32.mrf.mxu2 }
 0x231   :  { %v1970_v36 = vpop.f32.mrf.mxu3  ;;  %v3426_v61 = vadd.f32 %v3425_v56, %v3424_v11  ;;  %v2064_v40 = vadd.f32 %v2063_v12, %v2015_v35  ;;  %v2017_v58 = vpop.f32.mrf.mxu0  ;;  %v4092_v35 = vld [vmem:[%s7109_s1 + $0x228] sm:$0xf]  ;;  %v4094_v12 = vld [vmem:[%s7109_s1 + $0x268] sm:$0xf0] }
 0x232   :  { %v1971_v23 = vadd.f32 %v1970_v36, %v1922_v14  ;;  %v2018_v41 = vadd.f32 %v2017_v58, %v6215_v55  ;;  %v4093_v36 = vor.u32 %v4783_v29, %v4092_v35  ;;  %v4030_v35 = vld [vmem:[%s7109_s1 + $0x1e8] sm:$0xf0] }
 0x233   :  { %v3578_v8 = vmul.f32 0.015625, %v3426_v61  ;;  %v2908_v28 = vmax.f32 %v2064_v40, 0.0  ;;  %v4097_v61 = vor.u32 %v4775_v34, %v4094_v12 }
 0x234   :  { %v2939_v45 = vmax.f32 %v1971_v23, 0.0  ;;  %2212 = vmatmul.bf16.gmra.mxu0 %v5198_v51  ;;  %2300 = vmatpush.bf16.msrb.mxu1 %v4093_v36 }
 0x235   :  { %v1924_v63 = vpop.f32.mrf.mxu1  ;;  %v3636_v38 = vrot.slane %v3578_v8, 6  ;;  %v3232_v47 = vadd.f32 %v2908_v28, %v2892_v27  ;;  %4635 = vmatmul.msk.bf16.gmra.mxu2 %vm1292_vm0, %v5154_v33  ;;  %2398 = vmatpush.bf16.msrb.mxu0 %v4097_v61 }
 0x236   :  { %v3221_v39 = vadd.f32 %v3220_v6, %v2939_v45  ;;  %4628 = vmatmul.msk.bf16.gmra.mxu3 %vm1292_vm0, %v5200_v52  ;;  %v1925_v15 = vadd.f32 %v1924_v63, %v6166_v43 }
 0x237   :  { %v6259_v37 = vsel %vm3645_vm1, %v3577_v46, %v3636_v38 }
 0x238   :  { %2119 = vmatmul.bf16.gmra.mxu1 %v5232_v0  ;;  %v2066_v48 = vpop.f32.mrf.mxu2 }
 0x239   :  { %v1973_v16 = vpop.f32.mrf.mxu3  ;;  %v2067_v25 = vadd.f32 %v2066_v48, %v2018_v41  ;;  %v2019_v60 = vpop.f32.mrf.mxu0 }
 0x23a   :  { %v1974_v49 = vadd.f32 %v1973_v16, %v1925_v15  ;;  %v2020_v2 = vadd.f32 %v2019_v60, %v6215_v55 }
 0x23b   :  { %v2924_v44 = vmax.f32 %v2067_v25, 0.0 }
 0x23c   :  { %v2955_v62 = vmax.f32 %v1974_v49, 0.0 }
 0x23d   :  { %v1926_v7 = vpop.f32.mrf.mxu1  ;;  %v3233_v57 = vadd.f32 %v3232_v47, %v2924_v44 }
 0x23e   :  { %v3222_v59 = vadd.f32 %v3221_v39, %v2955_v62  ;;  %v1927_v5 = vadd.f32 %v1926_v7, %v6166_v43 }
 0x240   :  { %v2068_v24 = vpop.f32.mrf.mxu2 }
 0x241   :  { %v1975_v10 = vpop.f32.mrf.mxu3  ;;  %v2069_v11 = vadd.f32 %v2068_v24, %v2020_v2  ;;  %v2022_v6 = vpop.f32.mrf.mxu0  ;;  %v4863_v24 = vld [vmem:[%s7109_s1 + $0x4e4] sm:$0xf0] }
 0x242   :  { %v1976_v42 = vadd.f32 %v1975_v10, %v1927_v5  ;;  %v2023_v20 = vadd.f32 %v2022_v6, %v6215_v55  ;;  %v4412_v10 = vld [vmem:[%s7109_s1 + $0x4a8] sm:$0xf] }
 0x243   :  { %v2940_v17 = vmax.f32 %v2069_v11, 0.0 }
 0x244   :  { %v2971_v14 = vmax.f32 %v1976_v42, 0.0  ;;  %2217 = vmatmul.bf16.gmra.mxu0 %v5232_v0  ;;  %v4855_v42 = vld [vmem:[%s7109_s1 + $0x4ac] sm:$0xf] }
 0x245   :  { %v1929_v22 = vpop.f32.mrf.mxu1  ;;  %v3234_v13 = vadd.f32 %v3233_v57, %v2940_v17  ;;  %4636 = vmatmul.msk.bf16.gmra.mxu2 %vm1292_vm0, %v5200_v52  ;;  %v4414_v17 = vld [vmem:[%s7109_s1 + $0x4e8] sm:$0xf0] }
 0x246   :  { %v3223_v26 = vadd.f32 %v3222_v59, %v2971_v14  ;;  %4629 = vmatmul.msk.bf16.gmra.mxu3 %vm1292_vm0, %v5234_v1  ;;  %v1930_v56 = vadd.f32 %v1929_v22, %v6166_v43  ;;  %v4413_v14 = vor.u32 %v4863_v24, %v4412_v10  ;;  %v4767_v22 = vld [vmem:[%s7109_s1 + $0x1e4] sm:$0xf0] }
 0x248   :  { %2124 = vmatmul.bf16.gmra.mxu1 %v5278_v18  ;;  %v2071_v40 = vpop.f32.mrf.mxu2  ;;  %2352 = vmatpush.bf16.msrb.mxu3 %v4413_v14 }
 0x249   :  { %v1978_v23 = vpop.f32.mrf.mxu3  ;;  %v2072_v8 = vadd.f32 %v2071_v40, %v2023_v20  ;;  %v2024_v27 = vpop.f32.mrf.mxu0  ;;  %v4028_v20 = vld [vmem:[%s7109_s1 + $0x1a8] sm:$0xf] }
 0x24a   :  { %v1979_v58 = vadd.f32 %v1978_v23, %v1930_v56  ;;  %v2025_v39 = vadd.f32 %v2024_v27, %v6215_v55  ;;  %v4759_v56 = vld [vmem:[%s7109_s1 + $0x1ac] sm:$0xf]  ;;  %v3964_v23 = vld [vmem:[%s7109_s1 + $0x128] sm:$0xf] }
 0x24b   :  { %v2956_v28 = vmax.f32 %v2072_v8, 0.0  ;;  %v4033_v34 = vor.u32 %v4759_v56, %v4030_v35  ;;  %v4751_v40 = vld [vmem:[%s7109_s1 + $0x164] sm:$0xf0]  ;;  %v3966_v27 = vld [vmem:[%s7109_s1 + $0x168] sm:$0xf0] }
 0x24c   :  { %v2987_v45 = vmax.f32 %v1979_v58, 0.0  ;;  %v4743_v58 = vld [vmem:[%s7109_s1 + $0x12c] sm:$0xf]  ;;  %v3965_v8 = vor.u32 %v4751_v40, %v3964_v23 }
 0x24d   :  { %v1931_v46 = vpop.f32.mrf.mxu1  ;;  %v3235_v63 = vadd.f32 %v3234_v13, %v2956_v28  ;;  %v4029_v13 = vor.u32 %v4767_v22, %v4028_v20  ;;  %2399 = vmatpush.bf16.msrb.mxu0 %v4033_v34  ;;  %v3969_v28 = vor.u32 %v4743_v58, %v3966_v27  ;;  %v3900_v22 = vld [vmem:[%s7109_s1 + $0xa8] sm:$0xf]  ;;  %v3902_v35 = vld [vmem:[%s7109_s1 + $0xe8] sm:$0xf0] }
 0x24e   :  { %v3224_v41 = vadd.f32 %v3223_v26, %v2987_v45  ;;  %v1932_v38 = vadd.f32 %v1931_v46, %v6166_v43  ;;  %v4417_v26 = vor.u32 %v4855_v42, %v4414_v17  ;;  %v3836_v27 = vld [vmem:[%s7109_s1 + $0x28] sm:$0xf] }
 0x24f   :  { %2301 = vmatpush.bf16.msrb.mxu1 %v4029_v13  ;;  %v4727_v13 = vld [vmem:[%s7109_s1 + $0xac] sm:$0xf] }
 0x250   :  { %v2073_v15 = vpop.f32.mrf.mxu2  ;;  %2450 = vmatpush.bf16.msrb.mxu2 %v4417_v26  ;;  %v4735_v26 = vld [vmem:[%s7109_s1 + $0xe4] sm:$0xf0]  ;;  %v3905_v34 = vor.u32 %v4727_v13, %v3902_v35 }
 0x251   :  { %v1980_v47 = vpop.f32.mrf.mxu3  ;;  %v2074_v48 = vadd.f32 %v2073_v15, %v2025_v39  ;;  %v2027_v49 = vpop.f32.mrf.mxu0  ;;  %2400 = vmatpush.bf16.msrb.mxu0 %v3969_v28  ;;  %v3901_v56 = vor.u32 %v4735_v26, %v3900_v22  ;;  %v4719_v28 = vld [vmem:[%s7109_s1 + $0x64] sm:$0xf0] }
 0x252   :  { %v1981_v16 = vadd.f32 %v1980_v47, %v1932_v38  ;;  %v2028_v59 = vadd.f32 %v2027_v49, %v6215_v55  ;;  %v4348_v49 = vld [vmem:[%s7109_s1 + $0x428] sm:$0xf] }
 0x253   :  { %v2972_v60 = vmax.f32 %v2074_v48, 0.0  ;;  %2302 = vmatpush.bf16.msrb.mxu1 %v3965_v8 }
 0x254   :  { %v3003_v25 = vmax.f32 %v1981_v16, 0.0  ;;  %2222 = vmatmul.bf16.gmra.mxu0 %v5278_v18 }
 0x255   :  { %v6287_v62 = vpop.f32.mrf.mxu1  ;;  %v3236_v7 = vadd.f32 %v3235_v63, %v2972_v60  ;;  %4637 = vmatmul.msk.bf16.gmra.mxu2 %vm1292_vm0, %v5234_v1  ;;  %2401 = vmatpush.bf16.msrb.mxu0 %v3905_v34 }
 0x256   :  { %v3225_v44 = vadd.f32 %v3224_v41, %v3003_v25  ;;  %4630 = vmatmul.msk.bf16.gmra.mxu3 %vm1292_vm0, %v5280_v19  ;;  %v4847_v25 = vld [vmem:[%s7109_s1 + $0x464] sm:$0xf0] }
 0x257   :  { %v4349_v60 = vor.u32 %v4847_v25, %v4348_v49  ;;  %2303 = vmatpush.bf16.msrb.mxu1 %v3901_v56 }
 0x258   :  { %v3226_v57 = vrot.slane %v3225_v44, 4  ;;  %2129 = vmatmul.bf16.gmra.mxu1 %v5312_v30  ;;  %v2076_v2 = vpop.f32.mrf.mxu2 }
 0x259   :  { %v6295_v5 = vpop.f32.mrf.mxu3  ;;  %v2077_v11 = vadd.f32 %v2076_v2, %v2028_v59  ;;  %v2029_v6 = vpop.f32.mrf.mxu0  ;;  %2353 = vmatpush.bf16.msrb.mxu3 %v4349_v60  ;;  %v1935_v60 = vadd.f32 %v6287_v62, %v6166_v43 }
 0x25a   :  { %v3227_v12 = vadd.f32 %v3226_v57, %v3225_v44  ;;  %v2030_v45 = vadd.f32 %v2029_v6, %v6215_v55  ;;  %v4839_v44 = vld [vmem:[%s7109_s1 + $0x42c] sm:$0xf] }
 0x25b   :  { %v2988_v29 = vmax.f32 %v2077_v11, 0.0 }
 0x25c   :  { %v3228_v63 = vrot.slane %v3227_v12, 2 }
 0x25d   :  { %v6321_v36 = vpop.f32.mrf.mxu1  ;;  %v3237_v61 = vadd.f32 %v3236_v7, %v2988_v29  ;;  %v4350_v7 = vld [vmem:[%s7109_s1 + $0x468] sm:$0xf0] }
 0x25e   :  { %v3229_v16 = vadd.f32 %v3228_v63, %v3227_v12  ;;  %v4353_v57 = vor.u32 %v4839_v44, %v4350_v7  ;;  %v1937_v44 = vadd.f32 %v6321_v36, %v6166_v43 }
 0x260   :  { %v2078_v41 = vpop.f32.mrf.mxu2  ;;  %v3230_v24 = vrot.slane %v3229_v16, 1  ;;  %2451 = vmatpush.bf16.msrb.mxu2 %v4353_v57 }
 0x261   :  { %v6336_v46 = vpop.f32.mrf.mxu3  ;;  %v2079_v38 = vadd.f32 %v2078_v41, %v2030_v45  ;;  %v6338_v39 = vpop.f32.mrf.mxu0 }
 0x262   :  { %v3231_v17 = vadd.f32 %v3230_v24, %v3229_v16  ;;  %v1986_v57 = vadd.f32 %v6336_v46, %v1937_v44 }
 0x263   :  { %v3004_v47 = vmax.f32 %v2079_v38, 0.0  ;;  %v3837_v38 = vor.u32 %v4719_v28, %v3836_v27 }
 0x264   :  { %2227 = vmatmul.bf16.gmra.mxu0 %v5312_v30  ;;  %v3563_v23 = vmul.f32 0.015625, %v3231_v17  ;;  %v3035_v22 = vmax.f32 %v1986_v57, 0.0 }
 0x265   :  { %v1939_v15 = vpop.f32.mrf.mxu1  ;;  %v3238_v48 = vadd.f32 %v3237_v61, %v3004_v47  ;;  %4638 = vmatmul.msk.bf16.gmra.mxu2 %vm1292_vm0, %v5280_v19  ;;  %2304 = vmatpush.bf16.msrb.mxu1 %v3837_v38 }
 0x266   :  { %4631 = vmatmul.msk.bf16.gmra.mxu3 %vm1292_vm0, %v5314_v31  ;;  %v3625_v41 = vrot.slane %v3563_v23, 4  ;;  %v1940_v24 = vadd.f32 %v1939_v15, %v6166_v43 }
 0x267   :  { %v3239_v59 = vrot.slane %v3238_v48, 4 }
 0x268   :  { %2134 = vmatmul.bf16.gmra.mxu1 %v5358_v50  ;;  %v6358_v10 = vpop.f32.mrf.mxu2 }
 0x269   :  { %v1988_v2 = vpop.f32.mrf.mxu3  ;;  %v3240_v42 = vadd.f32 %v3239_v59, %v3238_v48  ;;  %v6360_v11 = vpop.f32.mrf.mxu0  ;;  %v1984_v59 = vadd.f32 %v6295_v5, %v1935_v60  ;;  %v6424_v60 = vld [vmem:[%s7110_s2 + $0x8] sm:$0xff] }
 0x26a   :  { %v1989_v46 = vadd.f32 %v1988_v2, %v1940_v24  ;;  %v2035_v44 = vadd.f32 %v6360_v11, %v6215_v55 }
 0x26b   :  { %v3241_v6 = vrot.slane %v3240_v42, 2  ;;  %v3019_v5 = vmax.f32 %v1984_v59, 0.0 }
 0x26c   :  { %v3051_v35 = vmax.f32 %v1989_v46, 0.0 }
 0x26d   :  { %v1941_v14 = vpop.f32.mrf.mxu1  ;;  %v3242_v20 = vadd.f32 %v3241_v6, %v3240_v42  ;;  %v3838_v42 = vld [vmem:[%s7109_s1 + $0x68] sm:$0xf0] }
 0x26e   :  { %v1942_v36 = vadd.f32 %v1941_v14, %v6166_v43  ;;  %v3427_v14 = vadd.f32 %v3035_v22, %v3019_v5 }
 0x26f   :  { %v3243_v29 = vrot.slane %v3242_v20, 1 }
 0x270   :  { %v6374_v61 = vpop.f32.mrf.mxu2  ;;  %v3428_v27 = vadd.f32 %v3427_v14, %v3051_v35 }
 0x271   :  { %v1990_v12 = vpop.f32.mrf.mxu3  ;;  %v3244_v40 = vadd.f32 %v3243_v29, %v3242_v20  ;;  %v6376_v58 = vpop.f32.mrf.mxu0 }
 0x272   :  { %v1991_v13 = vadd.f32 %v1990_v12, %v1942_v36 }
 0x273   :  { %v3564_v8 = vmul.f32 0.015625, %v3244_v40 }
 0x274   :  { %2232 = vmatmul.bf16.gmra.mxu0 %v5358_v50  ;;  %v3067_v40 = vmax.f32 %v1991_v13, 0.0 }
 0x275   :  { %v1944_v45 = vpop.f32.mrf.mxu1  ;;  %v3626_v63 = vrot.slane %v3564_v8, 2  ;;  %4639 = vmatmul.msk.bf16.gmra.mxu2 %vm1292_vm0, %v5314_v31 }
 0x276   :  { %4632 = vmatmul.msk.bf16.gmra.mxu3 %vm1292_vm0, %v5360_v53  ;;  %v1945_v15 = vadd.f32 %v1944_v45, %v6166_v43 }
 0x277   :  { %v3652_v47 = vsel %vm3647_vm2, %v3625_v41, %v3626_v63  ;;  %v3429_v63 = vadd.f32 %v3428_v27, %v3067_v40 }
 0x278   :  { %2139 = vmatmul.bf16.gmra.mxu1 %v5392_v3  ;;  %v6393_v16 = vsel %vm3649_vm3, %v6144_v9, %v3652_v47  ;;  %v2086_v49 = vpop.f32.mrf.mxu2  ;;  %v4711_v9 = vld [vmem:[%s7109_s1 + $0x2c] sm:$0xf] }
 0x279   :  { %v1993_v48 = vpop.f32.mrf.mxu3  ;;  %v2039_v25 = vpop.f32.mrf.mxu0  ;;  %v3841_v17 = vor.u32 %v4711_v9, %v3838_v42 }
 0x27a   :  { %v1994_v29 = vadd.f32 %v1993_v48, %v1945_v15  ;;  %v2033_v48 = vadd.f32 %v6338_v39, %v6215_v55  ;;  %v2040_v5 = vadd.f32 %v2039_v25, %v6215_v55 }
 0x27b   :  { %2402 = vmatpush.bf16.msrb.mxu0 %v3841_v17  ;;  %v6432_v17 = vperm.slane %v6424_v60, 0 }
 0x27c   :  { %v3083_v45 = vmax.f32 %v1994_v29, 0.0  ;;  %v2082_v36 = vadd.f32 %v6358_v10, %v2033_v48 }
 0x27d   :  { %v1946_v7 = vpop.f32.mrf.mxu1 }
 0x27e   :  { %v1947_v56 = vadd.f32 %v1946_v7, %v6166_v43  ;;  %v2038_v7 = vadd.f32 %v6376_v58, %v6215_v55  ;;  %v3430_v59 = vadd.f32 %v3429_v63, %v3083_v45  ;;  %v3020_v25 = vmax.f32 %v2082_v36, 0.0  ;;  %v4548_v45 = vld [vmem:[%s7109_s1 + $0x5b0] sm:$0xf] }
 0x27f   :  { %v4292_v63 = vld [vmem:[%s7109_s1 + $0x3b0] sm:$0xf] }
 0x280   :  { %v2088_v62 = vpop.f32.mrf.mxu2  ;;  %v2087_v11 = vadd.f32 %v2086_v49, %v2038_v7 }
 0x281   :  { %v1995_v6 = vpop.f32.mrf.mxu3  ;;  %v2042_v20 = vpop.f32.mrf.mxu0  ;;  %v2089_v15 = vadd.f32 %v2088_v62, %v2040_v5  ;;  %v4228_v5 = vld [vmem:[%s7109_s1 + $0x330] sm:$0xf] }
 0x282   :  { %v1996_v8 = vadd.f32 %v1995_v6, %v1947_v56  ;;  %v2043_v22 = vadd.f32 %v2042_v20, %v6215_v55  ;;  %v3052_v20 = vmax.f32 %v2087_v11, 0.0  ;;  %v4816_v11 = vld [vmem:[%s7109_s1 + $0x36c] sm:$0xf0] }
 0x283   :  { %v3068_v14 = vmax.f32 %v2089_v15, 0.0 }
 0x284   :  { %2237 = vmatmul.bf16.gmra.mxu0 %v5392_v3  ;;  %v3099_v38 = vmax.f32 %v1996_v8, 0.0 }
 0x285   :  { %v1949_v26 = vpop.f32.mrf.mxu1  ;;  %4640 = vmatmul.msk.bf16.gmra.mxu2 %vm1292_vm0, %v5360_v53 }
 0x286   :  { %4633 = vmatmul.msk.bf16.gmra.mxu3 %vm1292_vm0, %v5394_v4  ;;  %v1950_v34 = vadd.f32 %v1949_v26, %v6166_v43  ;;  %v3431_v42 = vadd.f32 %v3430_v59, %v3099_v38  ;;  %v4832_v38 = vld [vmem:[%s7109_s1 + $0x3ec] sm:$0xf0]  ;;  %v4824_v59 = vld [vmem:[%s7109_s1 + $0x3b4] sm:$0xf] }
 0x288   :  { %2144 = vmatmul.bf16.gmra.mxu1 %v5432_v21  ;;  %v2091_v23 = vpop.f32.mrf.mxu2 }
 0x289   :  { %v1998_v2 = vpop.f32.mrf.mxu3  ;;  %v2044_v12 = vpop.f32.mrf.mxu0  ;;  %v2092_v56 = vadd.f32 %v2091_v23, %v2043_v22  ;;  %v4896_v23 = vld [vmem:[%s7109_s1 + $0x5ec] sm:$0xf0]  ;;  %v4808_v22 = vld [vmem:[%s7109_s1 + $0x334] sm:$0xf] }
 0x28a   :  { %v1999_v28 = vadd.f32 %v1998_v2, %v1950_v34  ;;  %v2045_v49 = vadd.f32 %v2044_v12, %v6215_v55  ;;  %v4888_v12 = vld [vmem:[%s7109_s1 + $0x5b4] sm:$0xf] }
 0x28b   :  { %v3084_v48 = vmax.f32 %v2092_v56, 0.0 }
 0x28c   :  { %v3115_v57 = vmax.f32 %v1999_v28, 0.0  ;;  %v4549_v28 = vor.u32 %v4896_v23, %v4548_v45 }
 0x28d   :  { %v1951_v41 = vpop.f32.mrf.mxu1 }
 0x28e   :  { %v1952_v47 = vadd.f32 %v1951_v41, %v6166_v43  ;;  %v2084_v43 = vadd.f32 %v6374_v61, %v2035_v44  ;;  %v3432_v58 = vadd.f32 %v3431_v42, %v3115_v57  ;;  %v4550_v41 = vld [vmem:[%s7109_s1 + $0x5f0] sm:$0xf0]  ;;  %2546 = vmatpush.bf16.msra.mxu3 %v4549_v28  ;;  %v4484_v28 = vld [vmem:[%s7109_s1 + $0x530] sm:$0xf] }
 0x28f   :  { %v4553_v7 = vor.u32 %v4888_v12, %v4550_v41  ;;  %v4294_v42 = vld [vmem:[%s7109_s1 + $0x3f0] sm:$0xf0]  ;;  %v4880_v41 = vld [vmem:[%s7109_s1 + $0x56c] sm:$0xf0] }
 0x290   :  { %v2093_v9 = vpop.f32.mrf.mxu2  ;;  %v3036_v61 = vmax.f32 %v2084_v43, 0.0  ;;  %v4293_v43 = vor.u32 %v4832_v38, %v4292_v63  ;;  %v4297_v36 = vor.u32 %v4824_v59, %v4294_v42  ;;  %v4485_v63 = vor.u32 %v4880_v41, %v4484_v28  ;;  %v4872_v38 = vld [vmem:[%s7109_s1 + $0x534] sm:$0xf] }
 0x291   :  { %v2000_v24 = vpop.f32.mrf.mxu3  ;;  %v2047_v39 = vpop.f32.mrf.mxu0  ;;  %v2094_v29 = vadd.f32 %v2093_v9, %v2045_v49  ;;  %2644 = vmatpush.bf16.msra.mxu2 %v4553_v7 }
 0x292   :  { %v2001_v6 = vadd.f32 %v2000_v24, %v1952_v47  ;;  %v2048_v62 = vadd.f32 %v2047_v39, %v6215_v55  ;;  %v3440_v40 = vadd.f32 %v3036_v61, %v3020_v25  ;;  %2493 = vmatpush.bf16.msra.mxu1 %v4293_v43  ;;  %2591 = vmatpush.bf16.msra.mxu0 %v4297_v36 }
 0x293   :  { %v3100_v24 = vmax.f32 %v2094_v29, 0.0  ;;  %2547 = vmatpush.bf16.msra.mxu3 %v4485_v63 }
 0x294   :  { %v3131_v46 = vmax.f32 %v2001_v6, 0.0  ;;  %2242 = vmatmul.bf16.gmra.mxu0 %v5432_v21  ;;  %v3441_v47 = vadd.f32 %v3440_v40, %v3052_v20  ;;  %v6485_v20 = vperm.slane %v6424_v60, 1 }
 0x295   :  { %v2110_v26 = vpop.f32.mrf.mxu1  ;;  %4641 = vmatmul.msk.bf16.gmra.mxu2 %vm1292_vm0, %v5394_v4 }
 0x296   :  { %v3433_v13 = vadd.f32 %v3432_v58, %v3131_v46  ;;  %4642 = vmatmul.msk.bf16.vlgmr.msrb.gmra.mxu3 %vm1292_vm0, %v5062_v54  ;;  %v2111_v10 = vadd.f32 %v2110_v26, %v6432_v17  ;;  %v3442_v6 = vadd.f32 %v3441_v47, %v3068_v14  ;;  %v4229_v58 = vor.u32 %v4816_v11, %v4228_v5  ;;  %v4230_v46 = vld [vmem:[%s7109_s1 + $0x370] sm:$0xf0] }
 0x297   :  { %v4486_v47 = vld [vmem:[%s7109_s1 + $0x570] sm:$0xf0] }
 0x298   :  { %2305 = vmatmul.bf16.vlgmr.msrb.gmra.mxu1 %v5152_v32  ;;  %v3434_v35 = vrot.slane %v3433_v13, 4  ;;  %v2096_v34 = vpop.f32.mrf.mxu2  ;;  %v3443_v15 = vadd.f32 %v3442_v6, %v3084_v48 }
 0x299   :  { %v2159_v2 = vpop.f32.mrf.mxu3  ;;  %v2049_v27 = vpop.f32.mrf.mxu0  ;;  %v2097_v44 = vadd.f32 %v2096_v34, %v2048_v62  ;;  %2494 = vmatpush.bf16.msra.mxu1 %v4229_v58 }
 0x29a   :  { %v2160_v8 = vadd.f32 %v2159_v2, %v2111_v10  ;;  %v3435_v57 = vadd.f32 %v3434_v35, %v3433_v13  ;;  %v2050_v61 = vadd.f32 %v2049_v27, %v6215_v55  ;;  %v4233_v13 = vor.u32 %v4808_v22, %v4230_v46  ;;  %v4164_v46 = vld [vmem:[%s7109_s1 + $0x2b0] sm:$0xf] }
 0x29b   :  { %v3116_v26 = vmax.f32 %v2097_v44, 0.0  ;;  %v3444_v56 = vadd.f32 %v3443_v15, %v3100_v24  ;;  %v4489_v44 = vor.u32 %v4872_v38, %v4486_v47  ;;  %v4800_v15 = vld [vmem:[%s7109_s1 + $0x2ec] sm:$0xf0] }
 0x29c   :  { %v3436_v10 = vrot.slane %v3435_v57, 2  ;;  %v2893_v62 = vmax.f32 %v2160_v8, 0.0  ;;  %2592 = vmatpush.bf16.msra.mxu0 %v4233_v13  ;;  %v4166_v13 = vld [vmem:[%s7109_s1 + $0x2f0] sm:$0xf0] }
 0x29d   :  { %v2112_v9 = vpop.f32.mrf.mxu1  ;;  %v3445_v34 = vadd.f32 %v3444_v56, %v3116_v26  ;;  %2645 = vmatpush.bf16.msra.mxu2 %v4489_v44  ;;  %v4792_v26 = vld [vmem:[%s7109_s1 + $0x2b4] sm:$0xf] }
 0x29e   :  { %v2113_v39 = vadd.f32 %v2112_v9, %v6432_v17  ;;  %v3437_v45 = vadd.f32 %v3436_v10, %v3435_v57 }
 0x2a0   :  { %v2098_v49 = vpop.f32.mrf.mxu2  ;;  %v3438_v7 = vrot.slane %v3437_v45, 1 }
 0x2a1   :  { %v2161_v25 = vpop.f32.mrf.mxu3  ;;  %v2099_v14 = vadd.f32 %v2098_v49, %v2050_v61  ;;  %v2208_v29 = vpop.f32.mrf.mxu0  ;;  %v4165_v61 = vor.u32 %v4800_v15, %v4164_v46 }
 0x2a2   :  { %v2162_v35 = vadd.f32 %v2161_v25, %v2113_v39  ;;  %v2209_v55 = vadd.f32 %v2208_v29, %v6485_v20  ;;  %v3439_v36 = vadd.f32 %v3438_v7, %v3437_v45  ;;  %v4169_v25 = vor.u32 %v4792_v26, %v4166_v13 }
 0x2a3   :  { %v3132_v2 = vmax.f32 %v2099_v14, 0.0  ;;  %2495 = vmatpush.bf16.msra.mxu1 %v4165_v61 }
 0x2a4   :  { %v2909_v40 = vmax.f32 %v2162_v35, 0.0  ;;  %2403 = vmatmul.bf16.vlgmr.msrb.gmra.mxu0 %v5152_v32  ;;  %v3579_v56 = vmul.f32 0.015625, %v3439_v36 }
 0x2a5   :  { %v2115_v27 = vpop.f32.mrf.mxu1  ;;  %v3446_v23 = vadd.f32 %v3445_v34, %v3132_v2  ;;  %4650 = vmatmul.msk.bf16.vlgmr.msrb.gmra.mxu2 %vm1292_vm0, %v5062_v54  ;;  %2593 = vmatpush.bf16.msra.mxu0 %v4169_v25  ;;  %v4100_v25 = vld [vmem:[%s7109_s1 + $0x230] sm:$0xf] }
 0x2a6   :  { %v3245_v12 = vadd.f32 %v2909_v40, %v2893_v62  ;;  %4643 = vmatmul.msk.bf16.gmra.mxu3 %vm1292_vm0, %v5154_v33  ;;  %v2116_v8 = vadd.f32 %v2115_v27, %v6432_v17 }
 0x2a7   :  { %v3447_v48 = vrot.slane %v3446_v23, 4 }
 0x2a8   :  { %2310 = vmatmul.bf16.gmra.mxu1 %v5198_v51  ;;  %v2257_v57 = vpop.f32.mrf.mxu2 }
 0x2a9   :  { %v2164_v59 = vpop.f32.mrf.mxu3  ;;  %v3448_v24 = vadd.f32 %v3447_v48, %v3446_v23  ;;  %v2258_v43 = vadd.f32 %v2257_v57, %v2209_v55  ;;  %v2210_v42 = vpop.f32.mrf.mxu0  ;;  %v3637_v23 = vrot.slane %v3579_v56, 4  ;;  %v4784_v56 = vld [vmem:[%s7109_s1 + $0x26c] sm:$0xf0] }
 0x2aa   :  { %v2165_v9 = vadd.f32 %v2164_v59, %v2116_v8  ;;  %v2211_v49 = vadd.f32 %v2210_v42, %v6485_v20 }
 0x2ab   :  { %v3449_v6 = vrot.slane %v3448_v24, 2  ;;  %v2894_v45 = vmax.f32 %v2258_v43, 0.0 }
 0x2ac   :  { %v2925_v39 = vmax.f32 %v2165_v9, 0.0 }
 0x2ad   :  { %v2117_v5 = vpop.f32.mrf.mxu1  ;;  %v3450_v11 = vadd.f32 %v3449_v6, %v3448_v24 }
 0x2ae   :  { %v3246_v22 = vadd.f32 %v3245_v12, %v2925_v39  ;;  %v2118_v58 = vadd.f32 %v2117_v5, %v6432_v17 }
 0x2af   :  { %v3451_v10 = vrot.slane %v3450_v11, 1 }
 0x2b0   :  { %v2259_v14 = vpop.f32.mrf.mxu2 }
 0x2b1   :  { %v2166_v62 = vpop.f32.mrf.mxu3  ;;  %v3452_v35 = vadd.f32 %v3451_v10, %v3450_v11  ;;  %v2260_v34 = vadd.f32 %v2259_v14, %v2211_v49  ;;  %v2213_v2 = vpop.f32.mrf.mxu0 }
 0x2b2   :  { %v2167_v29 = vadd.f32 %v2166_v62, %v2118_v58  ;;  %v2214_v12 = vadd.f32 %v2213_v2, %v6485_v20 }
 0x2b3   :  { %v3580_v40 = vmul.f32 0.015625, %v3452_v35  ;;  %v2910_v27 = vmax.f32 %v2260_v34, 0.0  ;;  %v4101_v35 = vor.u32 %v4784_v56, %v4100_v25  ;;  %v4102_v34 = vld [vmem:[%s7109_s1 + $0x270] sm:$0xf0] }
 0x2b4   :  { %v2941_v55 = vmax.f32 %v2167_v29, 0.0  ;;  %2408 = vmatmul.bf16.gmra.mxu0 %v5198_v51  ;;  %v4776_v29 = vld [vmem:[%s7109_s1 + $0x234] sm:$0xf] }
 0x2b5   :  { %v2120_v8 = vpop.f32.mrf.mxu1  ;;  %v3638_v28 = vrot.slane %v3580_v40, 2  ;;  %v3258_v63 = vadd.f32 %v2910_v27, %v2894_v45  ;;  %4651 = vmatmul.msk.bf16.gmra.mxu2 %vm1292_vm0, %v5154_v33  ;;  %2496 = vmatpush.bf16.msra.mxu1 %v4101_v35  ;;  %v4038_v35 = vld [vmem:[%s7109_s1 + $0x1f0] sm:$0xf0] }
 0x2b6   :  { %v3247_v41 = vadd.f32 %v3246_v22, %v2941_v55  ;;  %4644 = vmatmul.msk.bf16.gmra.mxu3 %vm1292_vm0, %v5200_v52  ;;  %v2121_v38 = vadd.f32 %v2120_v8, %v6432_v17  ;;  %v4105_v55 = vor.u32 %v4776_v29, %v4102_v34 }
 0x2b7   :  { %v3664_v47 = vsel %vm3647_vm2, %v3637_v23, %v3638_v28 }
 0x2b8   :  { %2315 = vmatmul.bf16.gmra.mxu1 %v5232_v0  ;;  %v3665_v48 = vsel %vm3649_vm3, %v6259_v37, %v3664_v47  ;;  %v2262_v7 = vpop.f32.mrf.mxu2  ;;  %2594 = vmatpush.bf16.msra.mxu0 %v4105_v55 }
 0x2b9   :  { %v2169_v44 = vpop.f32.mrf.mxu3  ;;  %v3687_v59 = vrot.slane %v3665_v48, 7  ;;  %v2263_v24 = vadd.f32 %v2262_v7, %v2214_v12  ;;  %v2215_v9 = vpop.f32.mrf.mxu0 }
 0x2ba   :  { %v2170_v57 = vadd.f32 %v2169_v44, %v2121_v38  ;;  %v2216_v46 = vadd.f32 %v2215_v9, %v6485_v20 }
 0x2bb   :  { %v2926_v42 = vmax.f32 %v2263_v24, 0.0  ;;  %v3688_v6 = vsel %vm3677_vm4, %v3687_v59, %v6393_v16 }
 0x2bc   :  { %v2957_v43 = vmax.f32 %v2170_v57, 0.0  ;;  %v3689_v36 = vsel %vm3679_vm5, %v3687_v59, %v3688_v6 }
 0x2bd   :  { %v2122_v39 = vpop.f32.mrf.mxu1  ;;  %v3259_v11 = vadd.f32 %v3258_v63, %v2926_v42  ;;  %v3690_v37 = vsel %vm3681_vm6, %v3687_v59, %v3689_v36 }
 0x2be   :  { %v3248_v5 = vadd.f32 %v3247_v41, %v2957_v43  ;;  %v2123_v22 = vadd.f32 %v2122_v39, %v6432_v17  ;;  %v3691_v58 = vsel %vm3683_vm7, %v3687_v59, %v3690_v37  ;;  %v4420_v37 = vld [vmem:[%s7109_s1 + $0x4b0] sm:$0xf] }
 0x2bf   :  { %3711 = vst [vmem:[#allocation2 + $0x8] sm:$0xff] %v3691_v58  ;;  %v4864_v58 = vld [vmem:[%s7109_s1 + $0x4ec] sm:$0xf0] }
 0x2c0   :  { %v2264_v26 = vpop.f32.mrf.mxu2 }
 0x2c1   :  { %v2171_v15 = vpop.f32.mrf.mxu3  ;;  %v2265_v13 = vadd.f32 %v2264_v26, %v2216_v46  ;;  %v2218_v10 = vpop.f32.mrf.mxu0  ;;  %v4421_v26 = vor.u32 %v4864_v58, %v4420_v37  ;;  %v4848_v37 = vld [vmem:[%s7109_s1 + $0x46c] sm:$0xf0]  ;;  %v4840_v58 = vld [vmem:[%s7109_s1 + $0x434] sm:$0xf] }
 0x2c2   :  { %v2172_v61 = vadd.f32 %v2171_v15, %v2123_v22  ;;  %v2219_v62 = vadd.f32 %v2218_v10, %v6485_v20  ;;  %v4036_v10 = vld [vmem:[%s7109_s1 + $0x1b0] sm:$0xf] }
 0x2c3   :  { %v2942_v49 = vmax.f32 %v2265_v13, 0.0  ;;  %v4422_v13 = vld [vmem:[%s7109_s1 + $0x4f0] sm:$0xf0]  ;;  %2548 = vmatpush.bf16.msra.mxu3 %v4421_v26 }
 0x2c4   :  { %v2973_v16 = vmax.f32 %v2172_v61, 0.0  ;;  %2413 = vmatmul.bf16.gmra.mxu0 %v5232_v0  ;;  %v4856_v61 = vld [vmem:[%s7109_s1 + $0x4b4] sm:$0xf] }
 0x2c5   :  { %v2125_v14 = vpop.f32.mrf.mxu1  ;;  %v3260_v40 = vadd.f32 %v3259_v11, %v2942_v49  ;;  %4652 = vmatmul.msk.bf16.gmra.mxu2 %vm1292_vm0, %v5200_v52  ;;  %v4425_v56 = vor.u32 %v4856_v61, %v4422_v13 }
 0x2c6   :  { %v3249_v2 = vadd.f32 %v3248_v5, %v2973_v16  ;;  %4645 = vmatmul.msk.bf16.gmra.mxu3 %vm1292_vm0, %v5234_v1  ;;  %v2126_v45 = vadd.f32 %v2125_v14, %v6432_v17  ;;  %v4760_v14 = vld [vmem:[%s7109_s1 + $0x1b4] sm:$0xf] }
 0x2c7   :  { %v4041_v34 = vor.u32 %v4760_v14, %v4038_v35  ;;  %2646 = vmatpush.bf16.msra.mxu2 %v4425_v56 }
 0x2c8   :  { %2320 = vmatmul.bf16.gmra.mxu1 %v5278_v18  ;;  %v2267_v23 = vpop.f32.mrf.mxu2 }
 0x2c9   :  { %v2174_v27 = vpop.f32.mrf.mxu3  ;;  %v2268_v8 = vadd.f32 %v2267_v23, %v2219_v62  ;;  %v2220_v28 = vpop.f32.mrf.mxu0  ;;  %v4768_v62 = vld [vmem:[%s7109_s1 + $0x1ec] sm:$0xf0]  ;;  %2595 = vmatpush.bf16.msra.mxu0 %v4041_v34 }
 0x2ca   :  { %v2175_v12 = vadd.f32 %v2174_v27, %v2126_v45  ;;  %v2221_v7 = vadd.f32 %v2220_v28, %v6485_v20  ;;  %v4037_v29 = vor.u32 %v4768_v62, %v4036_v10  ;;  %v3972_v23 = vld [vmem:[%s7109_s1 + $0x130] sm:$0xf] }
 0x2cb   :  { %v2958_v63 = vmax.f32 %v2268_v8, 0.0  ;;  %v4744_v8 = vld [vmem:[%s7109_s1 + $0x134] sm:$0xf] }
 0x2cc   :  { %v2989_v41 = vmax.f32 %v2175_v12, 0.0  ;;  %2497 = vmatpush.bf16.msra.mxu1 %v4037_v29  ;;  %v4752_v12 = vld [vmem:[%s7109_s1 + $0x16c] sm:$0xf0] }
 0x2cd   :  { %v2127_v38 = vpop.f32.mrf.mxu1  ;;  %v3261_v48 = vadd.f32 %v3260_v40, %v2958_v63  ;;  %v3973_v28 = vor.u32 %v4752_v12, %v3972_v23  ;;  %v4728_v23 = vld [vmem:[%s7109_s1 + $0xb4] sm:$0xf] }
 0x2ce   :  { %v3250_v47 = vadd.f32 %v3249_v2, %v2989_v41  ;;  %v2128_v44 = vadd.f32 %v2127_v38, %v6432_v17  ;;  %v3974_v41 = vld [vmem:[%s7109_s1 + $0x170] sm:$0xf0] }
 0x2cf   :  { %v3977_v38 = vor.u32 %v4744_v8, %v3974_v41  ;;  %v3910_v8 = vld [vmem:[%s7109_s1 + $0xf0] sm:$0xf0] }
 0x2d0   :  { %v2269_v57 = vpop.f32.mrf.mxu2  ;;  %2498 = vmatpush.bf16.msra.mxu1 %v3973_v28 }
 0x2d1   :  { %v2176_v59 = vpop.f32.mrf.mxu3  ;;  %v2270_v9 = vadd.f32 %v2269_v57, %v2221_v7  ;;  %v2223_v43 = vpop.f32.mrf.mxu0  ;;  %2596 = vmatpush.bf16.msra.mxu0 %v3977_v38 }
 0x2d2   :  { %v2177_v24 = vadd.f32 %v2176_v59, %v2128_v44  ;;  %v2224_v39 = vadd.f32 %v2223_v43, %v6485_v20 }
 0x2d3   :  { %v2974_v6 = vmax.f32 %v2270_v9, 0.0 }
 0x2d4   :  { %v3005_v42 = vmax.f32 %v2177_v24, 0.0  ;;  %2418 = vmatmul.bf16.gmra.mxu0 %v5278_v18 }
 0x2d5   :  { %v2130_v36 = vpop.f32.mrf.mxu1  ;;  %v3262_v11 = vadd.f32 %v3261_v48, %v2974_v6  ;;  %4653 = vmatmul.msk.bf16.gmra.mxu2 %vm1292_vm0, %v5234_v1 }
 0x2d6   :  { %v3251_v5 = vadd.f32 %v3250_v47, %v3005_v42  ;;  %4646 = vmatmul.msk.bf16.gmra.mxu3 %vm1292_vm0, %v5280_v19  ;;  %v2131_v22 = vadd.f32 %v2130_v36, %v6432_v17 }
 0x2d8   :  { %2325 = vmatmul.bf16.gmra.mxu1 %v5312_v30  ;;  %v2272_v15 = vpop.f32.mrf.mxu2  ;;  %v3252_v40 = vrot.slane %v3251_v5, 4 }
 0x2d9   :  { %v2179_v46 = vpop.f32.mrf.mxu3  ;;  %v2273_v49 = vadd.f32 %v2272_v15, %v2224_v39  ;;  %v2225_v25 = vpop.f32.mrf.mxu0  ;;  %v4358_v15 = vld [vmem:[%s7109_s1 + $0x470] sm:$0xf0] }
 0x2da   :  { %v2180_v16 = vadd.f32 %v2179_v46, %v2131_v22  ;;  %v2226_v63 = vadd.f32 %v2225_v25, %v6485_v20  ;;  %v3253_v47 = vadd.f32 %v3252_v40, %v3251_v5  ;;  %v4356_v22 = vld [vmem:[%s7109_s1 + $0x430] sm:$0xf]  ;;  %v4361_v61 = vor.u32 %v4840_v58, %v4358_v15 }
 0x2db   :  { %v2990_v2 = vmax.f32 %v2273_v49, 0.0  ;;  %v4357_v46 = vor.u32 %v4848_v37, %v4356_v22 }
 0x2dc   :  { %v3021_v7 = vmax.f32 %v2180_v16, 0.0  ;;  %v3254_v42 = vrot.slane %v3253_v47, 2  ;;  %2647 = vmatpush.bf16.msra.mxu2 %v4361_v61 }
 0x2dd   :  { %v2132_v45 = vpop.f32.mrf.mxu1  ;;  %v3263_v55 = vadd.f32 %v3262_v11, %v2990_v2  ;;  %2549 = vmatpush.bf16.msra.mxu3 %v4357_v46 }
 0x2de   :  { %v2133_v27 = vadd.f32 %v2132_v45, %v6432_v17  ;;  %v3255_v13 = vadd.f32 %v3254_v42, %v3253_v47 }
 0x2e0   :  { %v2274_v44 = vpop.f32.mrf.mxu2  ;;  %v3256_v29 = vrot.slane %v3255_v13, 1 }
 0x2e1   :  { %v2181_v48 = vpop.f32.mrf.mxu3  ;;  %v2275_v57 = vadd.f32 %v2274_v44, %v2226_v63  ;;  %v2228_v24 = vpop.f32.mrf.mxu0  ;;  %v3913_v63 = vor.u32 %v4728_v23, %v3910_v8 }
 0x2e2   :  { %v2182_v59 = vadd.f32 %v2181_v48, %v2133_v27  ;;  %v2229_v6 = vadd.f32 %v2228_v24, %v6485_v20  ;;  %v4736_v27 = vld [vmem:[%s7109_s1 + $0xec] sm:$0xf0]  ;;  %v3257_v38 = vadd.f32 %v3256_v29, %v3255_v13 }
 0x2e3   :  { %v3006_v43 = vmax.f32 %v2275_v57, 0.0  ;;  %2597 = vmatpush.bf16.msra.mxu0 %v3913_v63 }
 0x2e4   :  { %v3037_v9 = vmax.f32 %v2182_v59, 0.0  ;;  %2423 = vmatmul.bf16.gmra.mxu0 %v5312_v30 }
 0x2e5   :  { %v2135_v39 = vpop.f32.mrf.mxu1  ;;  %v3264_v11 = vadd.f32 %v3263_v55, %v3006_v43  ;;  %4654 = vmatmul.msk.bf16.gmra.mxu2 %vm1292_vm0, %v5280_v19  ;;  %v3908_v55 = vld [vmem:[%s7109_s1 + $0xb0] sm:$0xf] }
 0x2e6   :  { %v3453_v36 = vadd.f32 %v3037_v9, %v3021_v7  ;;  %4647 = vmatmul.msk.bf16.gmra.mxu3 %vm1292_vm0, %v5314_v31  ;;  %v2136_v5 = vadd.f32 %v2135_v39, %v6432_v17  ;;  %v3909_v12 = vor.u32 %v4736_v27, %v3908_v55  ;;  %v3565_v39 = vmul.f32 0.015625, %v3257_v38 }
 0x2e7   :  { %v3265_v26 = vrot.slane %v3264_v11, 4 }
 0x2e8   :  { %2330 = vmatmul.bf16.gmra.mxu1 %v5358_v50  ;;  %v2277_v16 = vpop.f32.mrf.mxu2 }
 0x2e9   :  { %v2184_v10 = vpop.f32.mrf.mxu3  ;;  %v3266_v49 = vadd.f32 %v3265_v26, %v3264_v11  ;;  %v2278_v56 = vadd.f32 %v2277_v16, %v2229_v6  ;;  %v2230_v62 = vpop.f32.mrf.mxu0  ;;  %2499 = vmatpush.bf16.msra.mxu1 %v3909_v12  ;;  %v3844_v6 = vld [vmem:[%s7109_s1 + $0x30] sm:$0xf] }
 0x2ea   :  { %v2185_v25 = vadd.f32 %v2184_v10, %v2136_v5  ;;  %v2231_v41 = vadd.f32 %v2230_v62, %v6485_v20  ;;  %v4720_v5 = vld [vmem:[%s7109_s1 + $0x6c] sm:$0xf0] }
 0x2eb   :  { %v3267_v14 = vrot.slane %v3266_v49, 2  ;;  %v3022_v9 = vmax.f32 %v2278_v56, 0.0  ;;  %v3845_v15 = vor.u32 %v4720_v5, %v3844_v6 }
 0x2ec   :  { %v3053_v35 = vmax.f32 %v2185_v25, 0.0 }
 0x2ed   :  { %v2137_v34 = vpop.f32.mrf.mxu1  ;;  %v3268_v2 = vadd.f32 %v3267_v14, %v3266_v49  ;;  %2500 = vmatpush.bf16.msra.mxu1 %v3845_v15 }
 0x2ee   :  { %v3454_v40 = vadd.f32 %v3453_v36, %v3053_v35  ;;  %v2138_v45 = vadd.f32 %v2137_v34, %v6432_v17 }
 0x2ef   :  { %v3269_v28 = vrot.slane %v3268_v2, 1 }
 0x2f0   :  { %v2279_v48 = vpop.f32.mrf.mxu2 }
 0x2f1   :  { %v2186_v47 = vpop.f32.mrf.mxu3  ;;  %v3270_v44 = vadd.f32 %v3269_v28, %v3268_v2  ;;  %v2280_v59 = vadd.f32 %v2279_v48, %v2231_v41  ;;  %v2233_v57 = vpop.f32.mrf.mxu0  ;;  %v4712_v2 = vld [vmem:[%s7109_s1 + $0x34] sm:$0xf] }
 0x2f2   :  { %v2187_v7 = vadd.f32 %v2186_v47, %v2138_v45  ;;  %v2234_v36 = vadd.f32 %v2233_v57, %v6485_v20 }
 0x2f3   :  { %v3566_v24 = vmul.f32 0.015625, %v3270_v44  ;;  %v3038_v42 = vmax.f32 %v2280_v59, 0.0 }
 0x2f4   :  { %v3069_v43 = vmax.f32 %v2187_v7, 0.0  ;;  %2428 = vmatmul.bf16.gmra.mxu0 %v5358_v50 }
 0x2f5   :  { %v2140_v11 = vpop.f32.mrf.mxu1  ;;  %v3627_v22 = vrot.slane %v3566_v24, 6  ;;  %v3466_v58 = vadd.f32 %v3038_v42, %v3022_v9  ;;  %4655 = vmatmul.msk.bf16.gmra.mxu2 %vm1292_vm0, %v5314_v31 }
 0x2f6   :  { %v3455_v37 = vadd.f32 %v3454_v40, %v3069_v43  ;;  %4648 = vmatmul.msk.bf16.gmra.mxu3 %vm1292_vm0, %v5360_v53  ;;  %v2141_v46 = vadd.f32 %v2140_v11, %v6432_v17  ;;  %v3846_v40 = vld [vmem:[%s7109_s1 + $0x70] sm:$0xf0] }
 0x2f7   :  { %v6655_v26 = vsel %vm3645_vm1, %v3565_v39, %v3627_v22  ;;  %v3849_v27 = vor.u32 %v4712_v2, %v3846_v40  ;;  %v4889_v2 = vld [vmem:[%s7109_s1 + $0x5bc] sm:$0xf] }
 0x2f8   :  { %2335 = vmatmul.bf16.gmra.mxu1 %v5392_v3  ;;  %v2282_v13 = vpop.f32.mrf.mxu2  ;;  %v4558_v40 = vld [vmem:[%s7109_s1 + $0x5f8] sm:$0xf0] }
 0x2f9   :  { %v2189_v61 = vpop.f32.mrf.mxu3  ;;  %v2283_v16 = vadd.f32 %v2282_v13, %v2234_v36  ;;  %v2235_v49 = vpop.f32.mrf.mxu0  ;;  %2598 = vmatpush.bf16.msra.mxu0 %v3849_v27 }
 0x2fa   :  { %v2190_v10 = vadd.f32 %v2189_v61, %v2141_v46  ;;  %v2236_v34 = vadd.f32 %v2235_v49, %v6485_v20  ;;  %v6677_v61 = vperm.slane %v6424_v60, 2 }
 0x2fb   :  { %v3054_v56 = vmax.f32 %v2283_v16, 0.0 }
 0x2fc   :  { %v3085_v25 = vmax.f32 %v2190_v10, 0.0 }
 0x2fd   :  { %v2142_v62 = vpop.f32.mrf.mxu1  ;;  %v3467_v35 = vadd.f32 %v3466_v58, %v3054_v56 }
 0x2fe   :  { %v3456_v14 = vadd.f32 %v3455_v37, %v3085_v25  ;;  %v2143_v29 = vadd.f32 %v2142_v62, %v6432_v17  ;;  %v4556_v62 = vld [vmem:[%s7109_s1 + $0x5b8] sm:$0xf] }
 0x300   :  { %v2284_v55 = vpop.f32.mrf.mxu2 }
 0x301   :  { %v2191_v45 = vpop.f32.mrf.mxu3  ;;  %v2285_v12 = vadd.f32 %v2284_v55, %v2236_v34  ;;  %v2238_v8 = vpop.f32.mrf.mxu0 }
 0x302   :  { %v2192_v23 = vadd.f32 %v2191_v45, %v2143_v29  ;;  %v2239_v63 = vadd.f32 %v2238_v8, %v6485_v20  ;;  %v4300_v45 = vld [vmem:[%s7109_s1 + $0x3b8] sm:$0xf] }
 0x303   :  { %v3070_v41 = vmax.f32 %v2285_v12, 0.0  ;;  %v4561_v12 = vor.u32 %v4889_v2, %v4558_v40  ;;  %v4833_v8 = vld [vmem:[%s7109_s1 + $0x3f4] sm:$0xf0] }
 0x304   :  { %v3101_v28 = vmax.f32 %v2192_v23, 0.0  ;;  %2433 = vmatmul.bf16.gmra.mxu0 %v5392_v3 }
 0x305   :  { %v2145_v38 = vpop.f32.mrf.mxu1  ;;  %v3468_v48 = vadd.f32 %v3467_v35, %v3070_v41  ;;  %4656 = vmatmul.msk.bf16.gmra.mxu2 %vm1292_vm0, %v5360_v53  ;;  %v4302_v41 = vld [vmem:[%s7109_s1 + $0x3f8] sm:$0xf0] }
 0x306   :  { %v3457_v47 = vadd.f32 %v3456_v14, %v3101_v28  ;;  %4649 = vmatmul.msk.bf16.gmra.mxu3 %vm1292_vm0, %v5394_v4  ;;  %v2146_v44 = vadd.f32 %v2145_v38, %v6432_v17  ;;  %v4897_v14 = vld [vmem:[%s7109_s1 + $0x5f4] sm:$0xf0]  ;;  %v4825_v28 = vld [vmem:[%s7109_s1 + $0x3bc] sm:$0xf]  ;;  %2840 = vmatpush.bf16.msrb.mxu2 %v4561_v12 }
 0x307   :  { %v4557_v34 = vor.u32 %v4897_v14, %v4556_v62  ;;  %v4305_v38 = vor.u32 %v4825_v28, %v4302_v41  ;;  %v4881_v62 = vld [vmem:[%s7109_s1 + $0x574] sm:$0xf0]  ;;  %v4873_v14 = vld [vmem:[%s7109_s1 + $0x53c] sm:$0xf] }
 0x308   :  { %2340 = vmatmul.bf16.gmra.mxu1 %v5432_v21  ;;  %v2287_v59 = vpop.f32.mrf.mxu2 }
 0x309   :  { %v2194_v7 = vpop.f32.mrf.mxu3  ;;  %v2288_v24 = vadd.f32 %v2287_v59, %v2239_v63  ;;  %v2240_v9 = vpop.f32.mrf.mxu0  ;;  %2742 = vmatpush.bf16.msrb.mxu3 %v4557_v34  ;;  %v4301_v63 = vor.u32 %v4833_v8, %v4300_v45  ;;  %2787 = vmatpush.bf16.msrb.mxu0 %v4305_v38 }
 0x30a   :  { %v2195_v57 = vadd.f32 %v2194_v7, %v2146_v44  ;;  %v2241_v5 = vadd.f32 %v2240_v9, %v6485_v20  ;;  %v4809_v9 = vld [vmem:[%s7109_s1 + $0x33c] sm:$0xf] }
 0x30b   :  { %v3086_v42 = vmax.f32 %v2288_v24, 0.0  ;;  %2689 = vmatpush.bf16.msrb.mxu1 %v4301_v63  ;;  %v4817_v24 = vld [vmem:[%s7109_s1 + $0x374] sm:$0xf0] }
 0x30c   :  { %v3117_v43 = vmax.f32 %v2195_v57, 0.0  ;;  %v4236_v57 = vld [vmem:[%s7109_s1 + $0x338] sm:$0xf] }
 0x30d   :  { %v2147_v6 = vpop.f32.mrf.mxu1  ;;  %v3469_v36 = vadd.f32 %v3468_v48, %v3086_v42  ;;  %v4238_v42 = vld [vmem:[%s7109_s1 + $0x378] sm:$0xf0] }
 0x30e   :  { %v3458_v39 = vadd.f32 %v3457_v47, %v3117_v43  ;;  %v2148_v11 = vadd.f32 %v2147_v6, %v6432_v17  ;;  %v4237_v43 = vor.u32 %v4817_v24, %v4236_v57  ;;  %v4793_v57 = vld [vmem:[%s7109_s1 + $0x2bc] sm:$0xf] }
 0x310   :  { %v2289_v37 = vpop.f32.mrf.mxu2  ;;  %2690 = vmatpush.bf16.msrb.mxu1 %v4237_v43 }
 0x311   :  { %v2196_v22 = vpop.f32.mrf.mxu3  ;;  %v2290_v46 = vadd.f32 %v2289_v37, %v2241_v5  ;;  %v2243_v15 = vpop.f32.mrf.mxu0 }
 0x312   :  { %v2197_v58 = vadd.f32 %v2196_v22, %v2148_v11  ;;  %v2244_v16 = vadd.f32 %v2243_v15, %v6485_v20  ;;  %v6726_v22 = vperm.slane %v6424_v60, 3 }
 0x313   :  { %v3102_v10 = vmax.f32 %v2290_v46, 0.0 }
 0x314   :  { %v3133_v13 = vmax.f32 %v2197_v58, 0.0  ;;  %2438 = vmatmul.bf16.gmra.mxu0 %v5432_v21 }
 0x315   :  { %v2306_v49 = vpop.f32.mrf.mxu1  ;;  %v3470_v56 = vadd.f32 %v3469_v36, %v3102_v10  ;;  %4657 = vmatmul.msk.bf16.gmra.mxu2 %vm1292_vm0, %v5394_v4 }
 0x316   :  { %v3459_v25 = vadd.f32 %v3458_v39, %v3133_v13  ;;  %4658 = vmatmul.msk.bf16.vlgmr.msra.gmra.mxu3 %vm1292_vm0, %v5062_v54  ;;  %v2307_v17 = vadd.f32 %v2306_v49, %v6677_v61  ;;  %v4241_v39 = vor.u32 %v4809_v9, %v4238_v42  ;;  %v4174_v9 = vld [vmem:[%s7109_s1 + $0x2f8] sm:$0xf0] }
 0x318   :  { %2501 = vmatmul.bf16.vlgmr.msra.gmra.mxu1 %v5152_v32  ;;  %v2292_v35 = vpop.f32.mrf.mxu2  ;;  %v3460_v48 = vrot.slane %v3459_v25, 4  ;;  %2788 = vmatpush.bf16.msrb.mxu0 %v4241_v39 }
 0x319   :  { %v2355_v29 = vpop.f32.mrf.mxu3  ;;  %v2293_v55 = vadd.f32 %v2292_v35, %v2244_v16  ;;  %v2245_v23 = vpop.f32.mrf.mxu0 }
 0x31a   :  { %v2356_v27 = vadd.f32 %v2355_v29, %v2307_v17  ;;  %v2246_v6 = vadd.f32 %v2245_v23, %v6485_v20  ;;  %v3461_v36 = vadd.f32 %v3460_v48, %v3459_v25  ;;  %v4492_v17 = vld [vmem:[%s7109_s1 + $0x538] sm:$0xf]  ;;  %v4494_v29 = vld [vmem:[%s7109_s1 + $0x578] sm:$0xf0] }
 0x31b   :  { %v3118_v47 = vmax.f32 %v2293_v55, 0.0  ;;  %v4493_v35 = vor.u32 %v4881_v62, %v4492_v17  ;;  %v4497_v2 = vor.u32 %v4873_v14, %v4494_v29 }
 0x31c   :  { %v2895_v37 = vmax.f32 %v2356_v27, 0.0  ;;  %v3462_v16 = vrot.slane %v3461_v36, 2 }
 0x31d   :  { %v2308_v44 = vpop.f32.mrf.mxu1  ;;  %v3471_v7 = vadd.f32 %v3470_v56, %v3118_v47  ;;  %2743 = vmatpush.bf16.msrb.mxu3 %v4493_v35  ;;  %2841 = vmatpush.bf16.msrb.mxu2 %v4497_v2 }
 0x31e   :  { %v2309_v59 = vadd.f32 %v2308_v44, %v6677_v61  ;;  %v3463_v40 = vadd.f32 %v3462_v16, %v3461_v36 }
 0x320   :  { %v2294_v11 = vpop.f32.mrf.mxu2  ;;  %v3464_v63 = vrot.slane %v3463_v40, 1 }
 0x321   :  { %v2357_v5 = vpop.f32.mrf.mxu3  ;;  %v2295_v58 = vadd.f32 %v2294_v11, %v2246_v6  ;;  %v2404_v15 = vpop.f32.mrf.mxu0  ;;  %v4177_v6 = vor.u32 %v4793_v57, %v4174_v9 }
 0x322   :  { %v2358_v46 = vadd.f32 %v2357_v5, %v2309_v59  ;;  %v2405_v49 = vadd.f32 %v2404_v15, %v6726_v22  ;;  %v4801_v59 = vld [vmem:[%s7109_s1 + $0x2f4] sm:$0xf0]  ;;  %v3465_v39 = vadd.f32 %v3464_v63, %v3463_v40 }
 0x323   :  { %v3134_v13 = vmax.f32 %v2295_v58, 0.0  ;;  %2789 = vmatpush.bf16.msrb.mxu0 %v4177_v6  ;;  %v4785_v6 = vld [vmem:[%s7109_s1 + $0x274] sm:$0xf0] }
 0x324   :  { %v2911_v10 = vmax.f32 %v2358_v46, 0.0  ;;  %2599 = vmatmul.bf16.vlgmr.msra.gmra.mxu0 %v5152_v32 }
 0x325   :  { %v2311_v20 = vpop.f32.mrf.mxu1  ;;  %v3472_v25 = vadd.f32 %v3471_v7, %v3134_v13  ;;  %4666 = vmatmul.msk.bf16.vlgmr.msra.gmra.mxu2 %vm1292_vm0, %v5062_v54  ;;  %v4172_v7 = vld [vmem:[%s7109_s1 + $0x2b8] sm:$0xf] }
 0x326   :  { %v3271_v56 = vadd.f32 %v2911_v10, %v2895_v37  ;;  %4659 = vmatmul.msk.bf16.gmra.mxu3 %vm1292_vm0, %v5154_v33  ;;  %v2312_v60 = vadd.f32 %v2311_v20, %v6677_v61  ;;  %v4173_v24 = vor.u32 %v4801_v59, %v4172_v7 }
 0x327   :  { %v3473_v34 = vrot.slane %v3472_v25, 4 }
 0x328   :  { %2506 = vmatmul.bf16.gmra.mxu1 %v5198_v51  ;;  %v2453_v55 = vpop.f32.mrf.mxu2 }
 0x329   :  { %v2360_v45 = vpop.f32.mrf.mxu3  ;;  %v3474_v27 = vadd.f32 %v3473_v34, %v3472_v25  ;;  %v2454_v12 = vadd.f32 %v2453_v55, %v2405_v49  ;;  %v2406_v8 = vpop.f32.mrf.mxu0  ;;  %2691 = vmatpush.bf16.msrb.mxu1 %v4173_v24  ;;  %v3581_v49 = vmul.f32 0.015625, %v3465_v39  ;;  %v4777_v39 = vld [vmem:[%s7109_s1 + $0x23c] sm:$0xf] }
 0x32a   :  { %v2361_v23 = vadd.f32 %v2360_v45, %v2312_v60  ;;  %v2407_v42 = vadd.f32 %v2406_v8, %v6726_v22 }
 0x32b   :  { %v3475_v28 = vrot.slane %v3474_v27, 2  ;;  %v2896_v13 = vmax.f32 %v2454_v12, 0.0 }
 0x32c   :  { %v2927_v41 = vmax.f32 %v2361_v23, 0.0 }
 0x32d   :  { %v2313_v38 = vpop.f32.mrf.mxu1  ;;  %v3476_v47 = vadd.f32 %v3475_v28, %v3474_v27 }
 0x32e   :  { %v3272_v48 = vadd.f32 %v3271_v56, %v2927_v41  ;;  %v2314_v44 = vadd.f32 %v2313_v38, %v6677_v61 }
 0x32f   :  { %v3477_v43 = vrot.slane %v3476_v47, 1 }
 0x330   :  { %v2455_v11 = vpop.f32.mrf.mxu2 }
 0x331   :  { %v2362_v36 = vpop.f32.mrf.mxu3  ;;  %v3478_v5 = vadd.f32 %v3477_v43, %v3476_v47  ;;  %v2456_v58 = vadd.f32 %v2455_v11, %v2407_v42  ;;  %v2409_v46 = vpop.f32.mrf.mxu0  ;;  %v4108_v42 = vld [vmem:[%s7109_s1 + $0x238] sm:$0xf]  ;;  %v4110_v11 = vld [vmem:[%s7109_s1 + $0x278] sm:$0xf0] }
 0x332   :  { %v2363_v37 = vadd.f32 %v2362_v36, %v2314_v44  ;;  %v2410_v20 = vadd.f32 %v2409_v46, %v6726_v22  ;;  %v4109_v36 = vor.u32 %v4785_v6, %v4108_v42  ;;  %v4046_v42 = vld [vmem:[%s7109_s1 + $0x1f8] sm:$0xf0] }
 0x333   :  { %v3582_v15 = vmul.f32 0.015625, %v3478_v5  ;;  %v2912_v16 = vmax.f32 %v2456_v58, 0.0  ;;  %v4113_v5 = vor.u32 %v4777_v39, %v4110_v11 }
 0x334   :  { %v2943_v10 = vmax.f32 %v2363_v37, 0.0  ;;  %2604 = vmatmul.bf16.gmra.mxu0 %v5198_v51  ;;  %2692 = vmatpush.bf16.msrb.mxu1 %v4109_v36 }
 0x335   :  { %v2316_v25 = vpop.f32.mrf.mxu1  ;;  %v3639_v56 = vrot.slane %v3582_v15, 6  ;;  %v3284_v17 = vadd.f32 %v2912_v16, %v2896_v13  ;;  %4667 = vmatmul.msk.bf16.gmra.mxu2 %vm1292_vm0, %v5154_v33  ;;  %2790 = vmatpush.bf16.msrb.mxu0 %v4113_v5 }
 0x336   :  { %v3273_v60 = vadd.f32 %v3272_v48, %v2943_v10  ;;  %4660 = vmatmul.msk.bf16.gmra.mxu3 %vm1292_vm0, %v5200_v52  ;;  %v2317_v62 = vadd.f32 %v2316_v25, %v6677_v61 }
 0x337   :  { %v6770_v14 = vsel %vm3645_vm1, %v3581_v49, %v3639_v56 }
 0x338   :  { %2511 = vmatmul.bf16.gmra.mxu1 %v5232_v0  ;;  %v2458_v29 = vpop.f32.mrf.mxu2 }
 0x339   :  { %v2365_v35 = vpop.f32.mrf.mxu3  ;;  %v2459_v2 = vadd.f32 %v2458_v29, %v2410_v20  ;;  %v2411_v40 = vpop.f32.mrf.mxu0 }
 0x33a   :  { %v2366_v34 = vadd.f32 %v2365_v35, %v2317_v62  ;;  %v2412_v28 = vadd.f32 %v2411_v40, %v6726_v22 }
 0x33b   :  { %v2928_v55 = vmax.f32 %v2459_v2, 0.0 }
 0x33c   :  { %v2959_v45 = vmax.f32 %v2366_v34, 0.0 }
 0x33d   :  { %v2318_v27 = vpop.f32.mrf.mxu1  ;;  %v3285_v12 = vadd.f32 %v3284_v17, %v2928_v55 }
 0x33e   :  { %v3274_v23 = vadd.f32 %v3273_v60, %v2959_v45  ;;  %v2319_v8 = vadd.f32 %v2318_v27, %v6677_v61 }
 0x340   :  { %v2460_v63 = vpop.f32.mrf.mxu2 }
 0x341   :  { %v2367_v41 = vpop.f32.mrf.mxu3  ;;  %v2461_v47 = vadd.f32 %v2460_v63, %v2412_v28  ;;  %v2414_v48 = vpop.f32.mrf.mxu0  ;;  %v4865_v63 = vld [vmem:[%s7109_s1 + $0x4f4] sm:$0xf0] }
 0x342   :  { %v2368_v38 = vadd.f32 %v2367_v41, %v2319_v8  ;;  %v2415_v59 = vadd.f32 %v2414_v48, %v6726_v22  ;;  %v4428_v41 = vld [vmem:[%s7109_s1 + $0x4b8] sm:$0xf] }
 0x343   :  { %v2944_v7 = vmax.f32 %v2461_v47, 0.0 }
 0x344   :  { %v2975_v44 = vmax.f32 %v2368_v38, 0.0  ;;  %2609 = vmatmul.bf16.gmra.mxu0 %v5232_v0  ;;  %v4857_v38 = vld [vmem:[%s7109_s1 + $0x4bc] sm:$0xf] }
 0x345   :  { %v2321_v57 = vpop.f32.mrf.mxu1  ;;  %v3286_v9 = vadd.f32 %v3285_v12, %v2944_v7  ;;  %4668 = vmatmul.msk.bf16.gmra.mxu2 %vm1292_vm0, %v5200_v52  ;;  %v4430_v7 = vld [vmem:[%s7109_s1 + $0x4f8] sm:$0xf0] }
 0x346   :  { %v3275_v24 = vadd.f32 %v3274_v23, %v2975_v44  ;;  %4661 = vmatmul.msk.bf16.gmra.mxu3 %vm1292_vm0, %v5234_v1  ;;  %v2322_v43 = vadd.f32 %v2321_v57, %v6677_v61  ;;  %v4429_v44 = vor.u32 %v4865_v63, %v4428_v41  ;;  %v4769_v57 = vld [vmem:[%s7109_s1 + $0x1f4] sm:$0xf0] }
 0x348   :  { %2516 = vmatmul.bf16.gmra.mxu1 %v5278_v18  ;;  %v2463_v58 = vpop.f32.mrf.mxu2  ;;  %2744 = vmatpush.bf16.msrb.mxu3 %v4429_v44 }
 0x349   :  { %v2370_v37 = vpop.f32.mrf.mxu3  ;;  %v2464_v15 = vadd.f32 %v2463_v58, %v2415_v59  ;;  %v2416_v13 = vpop.f32.mrf.mxu0  ;;  %v4044_v59 = vld [vmem:[%s7109_s1 + $0x1b8] sm:$0xf] }
 0x34a   :  { %v2371_v46 = vadd.f32 %v2370_v37, %v2322_v43  ;;  %v2417_v60 = vadd.f32 %v2416_v13, %v6726_v22  ;;  %v4761_v43 = vld [vmem:[%s7109_s1 + $0x1bc] sm:$0xf]  ;;  %v3980_v37 = vld [vmem:[%s7109_s1 + $0x138] sm:$0xf] }
 0x34b   :  { %v2960_v16 = vmax.f32 %v2464_v15, 0.0  ;;  %v4049_v39 = vor.u32 %v4761_v43, %v4046_v42  ;;  %v4753_v58 = vld [vmem:[%s7109_s1 + $0x174] sm:$0xf0]  ;;  %v3982_v13 = vld [vmem:[%s7109_s1 + $0x178] sm:$0xf0] }
 0x34c   :  { %v2991_v10 = vmax.f32 %v2371_v46, 0.0  ;;  %v4745_v46 = vld [vmem:[%s7109_s1 + $0x13c] sm:$0xf]  ;;  %v3981_v15 = vor.u32 %v4753_v58, %v3980_v37 }
 0x34d   :  { %v2323_v49 = vpop.f32.mrf.mxu1  ;;  %v3287_v25 = vadd.f32 %v3286_v9, %v2960_v16  ;;  %v4045_v9 = vor.u32 %v4769_v57, %v4044_v59  ;;  %2791 = vmatpush.bf16.msrb.mxu0 %v4049_v39  ;;  %v3985_v16 = vor.u32 %v4745_v46, %v3982_v13  ;;  %v3916_v57 = vld [vmem:[%s7109_s1 + $0xb8] sm:$0xf]  ;;  %v3918_v42 = vld [vmem:[%s7109_s1 + $0xf8] sm:$0xf0] }
 0x34e   :  { %v3276_v20 = vadd.f32 %v3275_v24, %v2991_v10  ;;  %v2324_v56 = vadd.f32 %v2323_v49, %v6677_v61  ;;  %v4433_v24 = vor.u32 %v4857_v38, %v4430_v7  ;;  %v3852_v13 = vld [vmem:[%s7109_s1 + $0x38] sm:$0xf] }
 0x34f   :  { %2693 = vmatpush.bf16.msrb.mxu1 %v4045_v9  ;;  %v4729_v9 = vld [vmem:[%s7109_s1 + $0xbc] sm:$0xf] }
 0x350   :  { %v2465_v62 = vpop.f32.mrf.mxu2  ;;  %2842 = vmatpush.bf16.msrb.mxu2 %v4433_v24  ;;  %v4737_v24 = vld [vmem:[%s7109_s1 + $0xf4] sm:$0xf0]  ;;  %v3921_v39 = vor.u32 %v4729_v9, %v3918_v42 }
 0x351   :  { %v2372_v17 = vpop.f32.mrf.mxu3  ;;  %v2466_v29 = vadd.f32 %v2465_v62, %v2417_v60  ;;  %v2419_v34 = vpop.f32.mrf.mxu0  ;;  %2792 = vmatpush.bf16.msrb.mxu0 %v3985_v16  ;;  %v3917_v43 = vor.u32 %v4737_v24, %v3916_v57  ;;  %v4721_v16 = vld [vmem:[%s7109_s1 + $0x74] sm:$0xf0] }
 0x352   :  { %v2373_v35 = vadd.f32 %v2372_v17, %v2324_v56  ;;  %v2420_v23 = vadd.f32 %v2419_v34, %v6726_v22  ;;  %v4364_v34 = vld [vmem:[%s7109_s1 + $0x438] sm:$0xf] }
 0x353   :  { %v2976_v40 = vmax.f32 %v2466_v29, 0.0  ;;  %2694 = vmatpush.bf16.msrb.mxu1 %v3981_v15 }
 0x354   :  { %v3007_v2 = vmax.f32 %v2373_v35, 0.0  ;;  %2614 = vmatmul.bf16.gmra.mxu0 %v5278_v18 }
 0x355   :  { %v6798_v45 = vpop.f32.mrf.mxu1  ;;  %v3288_v27 = vadd.f32 %v3287_v25, %v2976_v40  ;;  %4669 = vmatmul.msk.bf16.gmra.mxu2 %vm1292_vm0, %v5234_v1  ;;  %2793 = vmatpush.bf16.msrb.mxu0 %v3921_v39 }
 0x356   :  { %v3277_v55 = vadd.f32 %v3276_v20, %v3007_v2  ;;  %4662 = vmatmul.msk.bf16.gmra.mxu3 %vm1292_vm0, %v5280_v19  ;;  %v4849_v2 = vld [vmem:[%s7109_s1 + $0x474] sm:$0xf0] }
 0x357   :  { %v4365_v40 = vor.u32 %v4849_v2, %v4364_v34  ;;  %2695 = vmatpush.bf16.msrb.mxu1 %v3917_v43 }
 0x358   :  { %v3278_v12 = vrot.slane %v3277_v55, 4  ;;  %2521 = vmatmul.bf16.gmra.mxu1 %v5312_v30  ;;  %v2468_v28 = vpop.f32.mrf.mxu2 }
 0x359   :  { %v6806_v8 = vpop.f32.mrf.mxu3  ;;  %v2469_v47 = vadd.f32 %v2468_v28, %v2420_v23  ;;  %v2421_v48 = vpop.f32.mrf.mxu0  ;;  %2745 = vmatpush.bf16.msrb.mxu3 %v4365_v40  ;;  %v2327_v40 = vadd.f32 %v6798_v45, %v6677_v61 }
 0x35a   :  { %v3279_v11 = vadd.f32 %v3278_v12, %v3277_v55  ;;  %v2422_v10 = vadd.f32 %v2421_v48, %v6726_v22  ;;  %v4841_v55 = vld [vmem:[%s7109_s1 + $0x43c] sm:$0xf] }
 0x35b   :  { %v2992_v6 = vmax.f32 %v2469_v47, 0.0 }
 0x35c   :  { %v3280_v25 = vrot.slane %v3279_v11, 2 }
 0x35d   :  { %v6832_v36 = vpop.f32.mrf.mxu1  ;;  %v3289_v5 = vadd.f32 %v3288_v27, %v2992_v6  ;;  %v4366_v27 = vld [vmem:[%s7109_s1 + $0x478] sm:$0xf0] }
 0x35e   :  { %v3281_v35 = vadd.f32 %v3280_v25, %v3279_v11  ;;  %v4369_v12 = vor.u32 %v4841_v55, %v4366_v27  ;;  %v2329_v55 = vadd.f32 %v6832_v36, %v6677_v61 }
 0x360   :  { %v2470_v20 = vpop.f32.mrf.mxu2  ;;  %v3282_v63 = vrot.slane %v3281_v35, 1  ;;  %2843 = vmatpush.bf16.msrb.mxu2 %v4369_v12 }
 0x361   :  { %v6847_v49 = vpop.f32.mrf.mxu3  ;;  %v2471_v56 = vadd.f32 %v2470_v20, %v2422_v10  ;;  %v6849_v60 = vpop.f32.mrf.mxu0 }
 0x362   :  { %v3283_v7 = vadd.f32 %v3282_v63, %v3281_v35  ;;  %v2378_v12 = vadd.f32 %v6847_v49, %v2329_v55 }
 0x363   :  { %v3008_v17 = vmax.f32 %v2471_v56, 0.0  ;;  %v3853_v56 = vor.u32 %v4721_v16, %v3852_v13 }
 0x364   :  { %2619 = vmatmul.bf16.gmra.mxu0 %v5312_v30  ;;  %v3567_v37 = vmul.f32 0.015625, %v3283_v7  ;;  %v3039_v57 = vmax.f32 %v2378_v12, 0.0 }
 0x365   :  { %v2331_v62 = vpop.f32.mrf.mxu1  ;;  %v3290_v29 = vadd.f32 %v3289_v5, %v3008_v17  ;;  %4670 = vmatmul.msk.bf16.gmra.mxu2 %vm1292_vm0, %v5280_v19  ;;  %2696 = vmatpush.bf16.msrb.mxu1 %v3853_v56 }
 0x366   :  { %4663 = vmatmul.msk.bf16.gmra.mxu3 %vm1292_vm0, %v5314_v31  ;;  %v3628_v20 = vrot.slane %v3567_v37, 4  ;;  %v2332_v63 = vadd.f32 %v2331_v62, %v6677_v61 }
 0x367   :  { %v3291_v23 = vrot.slane %v3290_v29, 4 }
 0x368   :  { %2526 = vmatmul.bf16.gmra.mxu1 %v5358_v50  ;;  %v6869_v41 = vpop.f32.mrf.mxu2 }
 0x369   :  { %v2380_v28 = vpop.f32.mrf.mxu3  ;;  %v3292_v38 = vadd.f32 %v3291_v23, %v3290_v29  ;;  %v6871_v47 = vpop.f32.mrf.mxu0  ;;  %v2376_v23 = vadd.f32 %v6806_v8, %v2327_v40 }
 0x36a   :  { %v2381_v49 = vadd.f32 %v2380_v28, %v2332_v63  ;;  %v2427_v55 = vadd.f32 %v6871_v47, %v6726_v22 }
 0x36b   :  { %v3293_v48 = vrot.slane %v3292_v38, 2  ;;  %v3023_v8 = vmax.f32 %v2376_v23, 0.0 }
 0x36c   :  { %v3055_v42 = vmax.f32 %v2381_v49, 0.0 }
 0x36d   :  { %v2333_v44 = vpop.f32.mrf.mxu1  ;;  %v3294_v59 = vadd.f32 %v3293_v48, %v3292_v38  ;;  %v3854_v38 = vld [vmem:[%s7109_s1 + $0x78] sm:$0xf0] }
 0x36e   :  { %v2334_v36 = vadd.f32 %v2333_v44, %v6677_v61  ;;  %v3479_v44 = vadd.f32 %v3039_v57, %v3023_v8 }
 0x36f   :  { %v3295_v6 = vrot.slane %v3294_v59, 1 }
 0x370   :  { %v6885_v5 = vpop.f32.mrf.mxu2  ;;  %v3480_v13 = vadd.f32 %v3479_v44, %v3055_v42 }
 0x371   :  { %v2382_v11 = vpop.f32.mrf.mxu3  ;;  %v3296_v58 = vadd.f32 %v3295_v6, %v3294_v59  ;;  %v2429_v46 = vpop.f32.mrf.mxu0 }
 0x372   :  { %v2383_v9 = vadd.f32 %v2382_v11, %v2334_v36  ;;  %v2430_v40 = vadd.f32 %v2429_v46, %v6726_v22 }
 0x373   :  { %v3568_v15 = vmul.f32 0.015625, %v3296_v58 }
 0x374   :  { %2624 = vmatmul.bf16.gmra.mxu0 %v5358_v50  ;;  %v3071_v58 = vmax.f32 %v2383_v9, 0.0 }
 0x375   :  { %v2336_v10 = vpop.f32.mrf.mxu1  ;;  %v3629_v25 = vrot.slane %v3568_v15, 2  ;;  %4671 = vmatmul.msk.bf16.gmra.mxu2 %vm1292_vm0, %v5314_v31 }
 0x376   :  { %4664 = vmatmul.msk.bf16.gmra.mxu3 %vm1292_vm0, %v5360_v53  ;;  %v2337_v62 = vadd.f32 %v2336_v10, %v6677_v61 }
 0x377   :  { %v3655_v17 = vsel %vm3647_vm2, %v3628_v20, %v3629_v25  ;;  %v3481_v25 = vadd.f32 %v3480_v13, %v3071_v58 }
 0x378   :  { %2531 = vmatmul.bf16.gmra.mxu1 %v5392_v3  ;;  %v6902_v35 = vsel %vm3649_vm3, %v6655_v26, %v3655_v17  ;;  %v2478_v34 = vpop.f32.mrf.mxu2  ;;  %v4713_v26 = vld [vmem:[%s7109_s1 + $0x3c] sm:$0xf] }
 0x379   :  { %v2385_v29 = vpop.f32.mrf.mxu3  ;;  %v2431_v2 = vpop.f32.mrf.mxu0  ;;  %v3857_v7 = vor.u32 %v4713_v26, %v3854_v38  ;;  %v2476_v26 = vadd.f32 %v6885_v5, %v2427_v55  ;;  %v2479_v47 = vadd.f32 %v2478_v34, %v2430_v40 }
 0x37a   :  { %v2386_v6 = vadd.f32 %v2385_v29, %v2337_v62  ;;  %v2425_v29 = vadd.f32 %v6849_v60, %v6726_v22  ;;  %v2432_v36 = vadd.f32 %v2431_v2, %v6726_v22 }
 0x37b   :  { %2794 = vmatpush.bf16.msrb.mxu0 %v3857_v7  ;;  %v3040_v62 = vmax.f32 %v2476_v26, 0.0  ;;  %v3056_v2 = vmax.f32 %v2479_v47, 0.0 }
 0x37c   :  { %v3087_v10 = vmax.f32 %v2386_v6, 0.0  ;;  %v2474_v46 = vadd.f32 %v6869_v41, %v2425_v29 }
 0x37d   :  { %v2338_v27 = vpop.f32.mrf.mxu1 }
 0x37e   :  { %v2339_v43 = vadd.f32 %v2338_v27, %v6677_v61  ;;  %v3482_v27 = vadd.f32 %v3481_v25, %v3087_v10  ;;  %v3024_v34 = vmax.f32 %v2474_v46, 0.0 }
 0x380   :  { %v2480_v45 = vpop.f32.mrf.mxu2 }
 0x381   :  { %v2387_v48 = vpop.f32.mrf.mxu3  ;;  %v2434_v59 = vpop.f32.mrf.mxu0 }
 0x382   :  { %v2388_v15 = vadd.f32 %v2387_v48, %v2339_v43  ;;  %v2435_v8 = vadd.f32 %v2434_v59, %v6726_v22 }
 0x384   :  { %2629 = vmatmul.bf16.gmra.mxu0 %v5392_v3  ;;  %v3103_v56 = vmax.f32 %v2388_v15, 0.0 }
 0x385   :  { %v2341_v24 = vpop.f32.mrf.mxu1  ;;  %4672 = vmatmul.msk.bf16.gmra.mxu2 %vm1292_vm0, %v5360_v53 }
 0x386   :  { %4665 = vmatmul.msk.bf16.gmra.mxu3 %vm1292_vm0, %v5394_v4  ;;  %v2342_v39 = vadd.f32 %v2341_v24, %v6677_v61  ;;  %v3483_v38 = vadd.f32 %v3482_v27, %v3103_v56  ;;  %v2481_v24 = vadd.f32 %v2480_v45, %v2432_v36 }
 0x388   :  { %2536 = vmatmul.bf16.gmra.mxu1 %v5432_v21  ;;  %v2483_v37 = vpop.f32.mrf.mxu2 }
 0x389   :  { %v2390_v28 = vpop.f32.mrf.mxu3  ;;  %v2436_v11 = vpop.f32.mrf.mxu0  ;;  %v2484_v43 = vadd.f32 %v2483_v37, %v2435_v8 }
 0x38a   :  { %v2391_v16 = vadd.f32 %v2390_v28, %v2342_v39  ;;  %v2437_v59 = vadd.f32 %v2436_v11, %v6726_v22  ;;  %v3492_v39 = vadd.f32 %v3040_v62, %v3024_v34  ;;  %v3072_v28 = vmax.f32 %v2481_v24, 0.0 }
 0x38c   :  { %v3119_v23 = vmax.f32 %v2391_v16, 0.0  ;;  %v3493_v10 = vadd.f32 %v3492_v39, %v3056_v2  ;;  %v3088_v16 = vmax.f32 %v2484_v43, 0.0 }
 0x38d   :  { %v2343_v20 = vpop.f32.mrf.mxu1 }
 0x38e   :  { %v2344_v17 = vadd.f32 %v2343_v20, %v6677_v61  ;;  %v6937_v61 = vld [vmem:[%s7110_s2 + $0x8] sm:$0xff]  ;;  %v3484_v57 = vadd.f32 %v3483_v38, %v3119_v23  ;;  %v3494_v37 = vadd.f32 %v3493_v10, %v3072_v28  ;;  %s4927_s2 = smov [#allocation2]  }
 0x38f   :  { %v6940_v60 = vperm.slane %v6937_v61, 4  ;;  %s3719_s20 = sshll.u32 %s4927_s2, 4  ;;  %s3720_s20 = int_to_ptr.vmem [resolvable:$true] %s3719_s20 }
 0x390   :  { %v2485_v63 = vpop.f32.mrf.mxu2  ;;  %v3495_v29 = vadd.f32 %v3494_v37, %v3088_v16 }
 0x391   :  { %v2392_v12 = vpop.f32.mrf.mxu3  ;;  %v2439_v7 = vpop.f32.mrf.mxu0  ;;  %v2486_v58 = vadd.f32 %v2485_v63, %v2437_v59  ;;  %v6957_v63 = vperm.slane %v6937_v61, 5 }
 0x392   :  { %v2393_v48 = vadd.f32 %v2392_v12, %v2344_v17  ;;  %v2440_v44 = vadd.f32 %v2439_v7, %v6726_v22 }
 0x393   :  { %v3104_v17 = vmax.f32 %v2486_v58, 0.0 }
 0x394   :  { %v3135_v5 = vmax.f32 %v2393_v48, 0.0  ;;  %2634 = vmatmul.bf16.gmra.mxu0 %v5432_v21 }
 0x395   :  { %v2502_v49 = vpop.f32.mrf.mxu1  ;;  %4673 = vmatmul.msk.bf16.gmra.mxu2 %vm1292_vm0, %v5394_v4  ;;  %v3496_v26 = vadd.f32 %v3495_v29, %v3104_v17 }
 0x396   :  { %v3485_v9 = vadd.f32 %v3484_v57, %v3135_v5  ;;  %4674 = vmatmul.msk.bf16.vlgmr.msrb.gmra.mxu3 %vm1292_vm0, %v5062_v54  ;;  %v2503_v41 = vadd.f32 %v2502_v49, %v6940_v60 }
 0x398   :  { %2697 = vmatmul.bf16.vlgmr.msrb.gmra.mxu1 %v5152_v32  ;;  %v3486_v42 = vrot.slane %v3485_v9, 4  ;;  %v2488_v45 = vpop.f32.mrf.mxu2 }
 0x399   :  { %v2551_v6 = vpop.f32.mrf.mxu3  ;;  %v2441_v13 = vpop.f32.mrf.mxu0  ;;  %v2489_v20 = vadd.f32 %v2488_v45, %v2440_v44 }
 0x39a   :  { %v2552_v15 = vadd.f32 %v2551_v6, %v2503_v41  ;;  %v3487_v25 = vadd.f32 %v3486_v42, %v3485_v9  ;;  %v2442_v55 = vadd.f32 %v2441_v13, %v6726_v22 }
 0x39b   :  { %v3120_v40 = vmax.f32 %v2489_v20, 0.0 }
 0x39c   :  { %v3488_v27 = vrot.slane %v3487_v25, 2  ;;  %v2897_v38 = vmax.f32 %v2552_v15, 0.0 }
 0x39d   :  { %v2504_v56 = vpop.f32.mrf.mxu1  ;;  %v3497_v47 = vadd.f32 %v3496_v26, %v3120_v40 }
 0x39e   :  { %v2505_v11 = vadd.f32 %v2504_v56, %v6940_v60  ;;  %v3489_v57 = vadd.f32 %v3488_v27, %v3487_v25 }
 0x3a0   :  { %v2490_v23 = vpop.f32.mrf.mxu2  ;;  %v3490_v41 = vrot.slane %v3489_v57, 1 }
 0x3a1   :  { %v2553_v12 = vpop.f32.mrf.mxu3  ;;  %v2491_v48 = vadd.f32 %v2490_v23, %v2442_v55  ;;  %v2600_v46 = vpop.f32.mrf.mxu0 }
 0x3a2   :  { %v2554_v7 = vadd.f32 %v2553_v12, %v2505_v11  ;;  %v2601_v5 = vadd.f32 %v2600_v46, %v6957_v63  ;;  %v3491_v6 = vadd.f32 %v3490_v41, %v3489_v57 }
 0x3a3   :  { %v3136_v36 = vmax.f32 %v2491_v48, 0.0 }
 0x3a4   :  { %v2913_v8 = vmax.f32 %v2554_v7, 0.0  ;;  %2795 = vmatmul.bf16.vlgmr.msrb.gmra.mxu0 %v5152_v32  ;;  %v3583_v10 = vmul.f32 0.015625, %v3491_v6 }
 0x3a5   :  { %v2507_v22 = vpop.f32.mrf.mxu1  ;;  %v3498_v49 = vadd.f32 %v3497_v47, %v3136_v36  ;;  %4682 = vmatmul.msk.bf16.vlgmr.msrb.gmra.mxu2 %vm1292_vm0, %v5062_v54 }
 0x3a6   :  { %v3297_v62 = vadd.f32 %v2913_v8, %v2897_v38  ;;  %4675 = vmatmul.msk.bf16.gmra.mxu3 %vm1292_vm0, %v5154_v33  ;;  %v2508_v24 = vadd.f32 %v2507_v22, %v6940_v60  ;;  %v3640_v27 = vrot.slane %v3583_v10, 4 }
 0x3a7   :  { %v3499_v9 = vrot.slane %v3498_v49, 4 }
 0x3a8   :  { %2702 = vmatmul.bf16.gmra.mxu1 %v5198_v51  ;;  %v2649_v2 = vpop.f32.mrf.mxu2 }
 0x3a9   :  { %v2556_v34 = vpop.f32.mrf.mxu3  ;;  %v3500_v43 = vadd.f32 %v3499_v9, %v3498_v49  ;;  %v2650_v32 = vadd.f32 %v2649_v2, %v2601_v5  ;;  %v2602_v44 = vpop.f32.mrf.mxu0 }
 0x3aa   :  { %v2557_v59 = vadd.f32 %v2556_v34, %v2508_v24  ;;  %v2603_v13 = vadd.f32 %v2602_v44, %v6957_v63 }
 0x3ab   :  { %v3501_v42 = vrot.slane %v3500_v43, 2  ;;  %v2898_v29 = vmax.f32 %v2650_v32, 0.0 }
 0x3ac   :  { %v2929_v45 = vmax.f32 %v2557_v59, 0.0 }
 0x3ad   :  { %v2509_v39 = vpop.f32.mrf.mxu1  ;;  %v3502_v28 = vadd.f32 %v3501_v42, %v3500_v43 }
 0x3ae   :  { %v3298_v58 = vadd.f32 %v3297_v62, %v2929_v45  ;;  %v2510_v54 = vadd.f32 %v2509_v39, %v6940_v60 }
 0x3af   :  { %v3503_v15 = vrot.slane %v3502_v28, 1 }
 0x3b0   :  { %v2651_v20 = vpop.f32.mrf.mxu2 }
 0x3b1   :  { %v2558_v16 = vpop.f32.mrf.mxu3  ;;  %v3504_v25 = vadd.f32 %v3503_v15, %v3502_v28  ;;  %v2652_v37 = vadd.f32 %v2651_v20, %v2603_v13  ;;  %v2605_v17 = vpop.f32.mrf.mxu0 }
 0x3b2   :  { %v2559_v56 = vadd.f32 %v2558_v16, %v2510_v54  ;;  %v2606_v23 = vadd.f32 %v2605_v17, %v6957_v63 }
 0x3b3   :  { %v3584_v11 = vmul.f32 0.015625, %v3504_v25  ;;  %v2914_v55 = vmax.f32 %v2652_v37, 0.0 }
 0x3b4   :  { %v2945_v40 = vmax.f32 %v2559_v56, 0.0  ;;  %2800 = vmatmul.bf16.gmra.mxu0 %v5198_v51 }
 0x3b5   :  { %v2512_v12 = vpop.f32.mrf.mxu1  ;;  %v3641_v26 = vrot.slane %v3584_v11, 2  ;;  %v3310_v48 = vadd.f32 %v2914_v55, %v2898_v29  ;;  %4683 = vmatmul.msk.bf16.gmra.mxu2 %vm1292_vm0, %v5154_v33 }
 0x3b6   :  { %v3299_v38 = vadd.f32 %v3298_v58, %v2945_v40  ;;  %4676 = vmatmul.msk.bf16.gmra.mxu3 %vm1292_vm0, %v5200_v52  ;;  %v2513_v7 = vadd.f32 %v2512_v12, %v6940_v60 }
 0x3b7   :  { %v3667_v46 = vsel %vm3647_vm2, %v3640_v27, %v3641_v26 }
 0x3b8   :  { %2707 = vmatmul.bf16.gmra.mxu1 %v5232_v0  ;;  %v3668_v47 = vsel %vm3649_vm3, %v6770_v14, %v3667_v46  ;;  %v2654_v36 = vpop.f32.mrf.mxu2 }
 0x3b9   :  { %v2561_v51 = vpop.f32.mrf.mxu3  ;;  %v3694_v8 = vrot.slane %v3668_v47, 7  ;;  %v2655_v5 = vadd.f32 %v2654_v36, %v2606_v23  ;;  %v2607_v22 = vpop.f32.mrf.mxu0 }
 0x3ba   :  { %v2562_v57 = vadd.f32 %v2561_v51, %v2513_v7  ;;  %v2608_v59 = vadd.f32 %v2607_v22, %v6957_v63 }
 0x3bb   :  { %v2930_v62 = vmax.f32 %v2655_v5, 0.0  ;;  %v3695_v33 = vsel %vm3677_vm4, %v3694_v8, %v6902_v35 }
 0x3bc   :  { %v2961_v49 = vmax.f32 %v2562_v57, 0.0  ;;  %v3696_v9 = vsel %vm3679_vm5, %v3694_v8, %v3695_v33 }
 0x3bd   :  { %v2514_v24 = vpop.f32.mrf.mxu1  ;;  %v3311_v34 = vadd.f32 %v3310_v48, %v2930_v62  ;;  %v3697_v14 = vsel %vm3681_vm6, %v3694_v8, %v3696_v9 }
 0x3be   :  { %v3300_v41 = vadd.f32 %v3299_v38, %v2961_v49  ;;  %v2515_v2 = vadd.f32 %v2514_v24, %v6940_v60  ;;  %v3698_v43 = vsel %vm3683_vm7, %v3694_v8, %v3697_v14 }
 0x3bf   :  { %3712 = vst [vmem:[#allocation2 + $0x10] sm:$0xff] %v3698_v43 }
 0x3c0   :  { %v2656_v44 = vpop.f32.mrf.mxu2 }
 0x3c1   :  { %v2563_v32 = vpop.f32.mrf.mxu3  ;;  %v2657_v45 = vadd.f32 %v2656_v44, %v2608_v59  ;;  %v2610_v6 = vpop.f32.mrf.mxu0 }
 0x3c2   :  { %v2564_v42 = vadd.f32 %v2563_v32, %v2515_v2  ;;  %v2611_v28 = vadd.f32 %v2610_v6, %v6957_v63 }
 0x3c3   :  { %v2946_v39 = vmax.f32 %v2657_v45, 0.0 }
 0x3c4   :  { %v2977_v35 = vmax.f32 %v2564_v42, 0.0  ;;  %2805 = vmatmul.bf16.gmra.mxu0 %v5232_v0 }
 0x3c5   :  { %v2517_v58 = vpop.f32.mrf.mxu1  ;;  %v3312_v15 = vadd.f32 %v3311_v34, %v2946_v39  ;;  %4684 = vmatmul.msk.bf16.gmra.mxu2 %vm1292_vm0, %v5200_v52 }
 0x3c6   :  { %v3301_v54 = vadd.f32 %v3300_v41, %v2977_v35  ;;  %4677 = vmatmul.msk.bf16.gmra.mxu3 %vm1292_vm0, %v5234_v1  ;;  %v2518_v13 = vadd.f32 %v2517_v58, %v6940_v60 }
 0x3c8   :  { %2712 = vmatmul.bf16.gmra.mxu1 %v5278_v18  ;;  %v2659_v16 = vpop.f32.mrf.mxu2 }
 0x3c9   :  { %v2566_v10 = vpop.f32.mrf.mxu3  ;;  %v2660_v25 = vadd.f32 %v2659_v16, %v2611_v28  ;;  %v2612_v56 = vpop.f32.mrf.mxu0 }
 0x3ca   :  { %v2567_v20 = vadd.f32 %v2566_v10, %v2518_v13  ;;  %v2613_v55 = vadd.f32 %v2612_v56, %v6957_v63 }
 0x3cb   :  { %v2962_v0 = vmax.f32 %v2660_v25, 0.0 }
 0x3cc   :  { %v2993_v37 = vmax.f32 %v2567_v20, 0.0 }
 0x3cd   :  { %v2519_v17 = vpop.f32.mrf.mxu1  ;;  %v3313_v29 = vadd.f32 %v3312_v15, %v2962_v0 }
 0x3ce   :  { %v3302_v11 = vadd.f32 %v3301_v54, %v2993_v37  ;;  %v2520_v40 = vadd.f32 %v2519_v17, %v6940_v60 }
 0x3d0   :  { %v2661_v52 = vpop.f32.mrf.mxu2 }
 0x3d1   :  { %v2568_v27 = vpop.f32.mrf.mxu3  ;;  %v2662_v12 = vadd.f32 %v2661_v52, %v2613_v55  ;;  %v2615_v26 = vpop.f32.mrf.mxu0 }
 0x3d2   :  { %v2569_v23 = vadd.f32 %v2568_v27, %v2520_v40  ;;  %v2616_v7 = vadd.f32 %v2615_v26, %v6957_v63 }
 0x3d3   :  { %v2978_v48 = vmax.f32 %v2662_v12, 0.0 }
 0x3d4   :  { %v3009_v38 = vmax.f32 %v2569_v23, 0.0  ;;  %2810 = vmatmul.bf16.gmra.mxu0 %v5278_v18 }
 0x3d5   :  { %v2522_v46 = vpop.f32.mrf.mxu1  ;;  %v3314_v51 = vadd.f32 %v3313_v29, %v2978_v48  ;;  %4685 = vmatmul.msk.bf16.gmra.mxu2 %vm1292_vm0, %v5234_v1 }
 0x3d6   :  { %v3303_v47 = vadd.f32 %v3302_v11, %v3009_v38  ;;  %4678 = vmatmul.msk.bf16.gmra.mxu3 %vm1292_vm0, %v5280_v19  ;;  %v2523_v36 = vadd.f32 %v2522_v46, %v6940_v60 }
 0x3d8   :  { %2717 = vmatmul.bf16.gmra.mxu1 %v5312_v30  ;;  %v2664_v57 = vpop.f32.mrf.mxu2  ;;  %v3304_v18 = vrot.slane %v3303_v47, 4 }
 0x3d9   :  { %v2571_v8 = vpop.f32.mrf.mxu3  ;;  %v2665_v22 = vadd.f32 %v2664_v57, %v2616_v7  ;;  %v2617_v49 = vpop.f32.mrf.mxu0 }
 0x3da   :  { %v2572_v5 = vadd.f32 %v2571_v8, %v2523_v36  ;;  %v2618_v41 = vadd.f32 %v2617_v49, %v6957_v63  ;;  %v3305_v34 = vadd.f32 %v3304_v18, %v3303_v47 }
 0x3db   :  { %v2994_v62 = vmax.f32 %v2665_v22, 0.0 }
 0x3dc   :  { %v3025_v14 = vmax.f32 %v2572_v5, 0.0  ;;  %v3306_v45 = vrot.slane %v3305_v34, 2 }
 0x3dd   :  { %v2524_v33 = vpop.f32.mrf.mxu1  ;;  %v3315_v24 = vadd.f32 %v3314_v51, %v2994_v62 }
 0x3de   :  { %v2525_v9 = vadd.f32 %v2524_v33, %v6940_v60  ;;  %v3307_v15 = vadd.f32 %v3306_v45, %v3305_v34 }
 0x3e0   :  { %v2666_v1 = vpop.f32.mrf.mxu2  ;;  %v3308_v0 = vrot.slane %v3307_v15, 1 }
 0x3e1   :  { %v2573_v2 = vpop.f32.mrf.mxu3  ;;  %v2667_v59 = vadd.f32 %v2666_v1, %v2618_v41  ;;  %v2620_v32 = vpop.f32.mrf.mxu0 }
 0x3e2   :  { %v2574_v43 = vadd.f32 %v2573_v2, %v2525_v9  ;;  %v2621_v6 = vadd.f32 %v2620_v32, %v6957_v63  ;;  %v3309_v27 = vadd.f32 %v3308_v0, %v3307_v15 }
 0x3e3   :  { %v3010_v42 = vmax.f32 %v2667_v59, 0.0 }
 0x3e4   :  { %v3041_v44 = vmax.f32 %v2574_v43, 0.0  ;;  %2815 = vmatmul.bf16.gmra.mxu0 %v5312_v30  ;;  %v3569_v36 = vmul.f32 0.015625, %v3309_v27 }
 0x3e5   :  { %v2527_v35 = vpop.f32.mrf.mxu1  ;;  %v3316_v28 = vadd.f32 %v3315_v24, %v3010_v42  ;;  %4686 = vmatmul.msk.bf16.gmra.mxu2 %vm1292_vm0, %v5280_v19 }
 0x3e6   :  { %v3505_v39 = vadd.f32 %v3041_v44, %v3025_v14  ;;  %4679 = vmatmul.msk.bf16.gmra.mxu3 %vm1292_vm0, %v5314_v31  ;;  %v2528_v58 = vadd.f32 %v2527_v35, %v6940_v60 }
 0x3e7   :  { %v3317_v54 = vrot.slane %v3316_v28, 4 }
 0x3e8   :  { %2722 = vmatmul.bf16.gmra.mxu1 %v5358_v50  ;;  %v2669_v10 = vpop.f32.mrf.mxu2 }
 0x3e9   :  { %v2576_v13 = vpop.f32.mrf.mxu3  ;;  %v3318_v16 = vadd.f32 %v3317_v54, %v3316_v28  ;;  %v2670_v30 = vadd.f32 %v2669_v10, %v2621_v6  ;;  %v2622_v25 = vpop.f32.mrf.mxu0 }
 0x3ea   :  { %v2577_v20 = vadd.f32 %v2576_v13, %v2528_v58  ;;  %v2623_v55 = vadd.f32 %v2622_v25, %v6957_v63 }
 0x3eb   :  { %v3319_v56 = vrot.slane %v3318_v16, 2  ;;  %v3026_v46 = vmax.f32 %v2670_v30, 0.0 }
 0x3ec   :  { %v3057_v37 = vmax.f32 %v2577_v20, 0.0 }
 0x3ed   :  { %v2529_v17 = vpop.f32.mrf.mxu1  ;;  %v3320_v11 = vadd.f32 %v3319_v56, %v3318_v16 }
 0x3ee   :  { %v3506_v29 = vadd.f32 %v3505_v39, %v3057_v37  ;;  %v2530_v19 = vadd.f32 %v2529_v17, %v6940_v60 }
 0x3ef   :  { %v3321_v40 = vrot.slane %v3320_v11, 1 }
 0x3f0   :  { %v2671_v23 = vpop.f32.mrf.mxu2 }
 0x3f1   :  { %v2578_v52 = vpop.f32.mrf.mxu3  ;;  %v3322_v12 = vadd.f32 %v3321_v40, %v3320_v11  ;;  %v2672_v38 = vadd.f32 %v2671_v23, %v2623_v55  ;;  %v2625_v48 = vpop.f32.mrf.mxu0 }
 0x3f2   :  { %v2579_v26 = vadd.f32 %v2578_v52, %v2530_v19  ;;  %v2626_v8 = vadd.f32 %v2625_v48, %v6957_v63  ;;  %v7041_v52 = vperm.slane %v6937_v61, 6 }
 0x3f3   :  { %v3570_v7 = vmul.f32 0.015625, %v3322_v12  ;;  %v3042_v51 = vmax.f32 %v2672_v38, 0.0 }
 0x3f4   :  { %v3073_v47 = vmax.f32 %v2579_v26, 0.0  ;;  %2820 = vmatmul.bf16.gmra.mxu0 %v5358_v50 }
 0x3f5   :  { %v2532_v57 = vpop.f32.mrf.mxu1  ;;  %v3630_v5 = vrot.slane %v3570_v7, 6  ;;  %v3518_v49 = vadd.f32 %v3042_v51, %v3026_v46  ;;  %4687 = vmatmul.msk.bf16.gmra.mxu2 %vm1292_vm0, %v5314_v31 }
 0x3f6   :  { %v3507_v22 = vadd.f32 %v3506_v29, %v3073_v47  ;;  %4680 = vmatmul.msk.bf16.gmra.mxu3 %vm1292_vm0, %v5360_v53  ;;  %v2533_v62 = vadd.f32 %v2532_v57, %v6940_v60 }
 0x3f7   :  { %v7025_v18 = vsel %vm3645_vm1, %v3569_v36, %v3630_v5 }
 0x3f8   :  { %2727 = vmatmul.bf16.gmra.mxu1 %v5392_v3  ;;  %v2674_v24 = vpop.f32.mrf.mxu2 }
 0x3f9   :  { %v2581_v33 = vpop.f32.mrf.mxu3  ;;  %v2675_v9 = vadd.f32 %v2674_v24, %v2626_v8  ;;  %v2627_v41 = vpop.f32.mrf.mxu0 }
 0x3fa   :  { %v2582_v50 = vadd.f32 %v2581_v33, %v2533_v62  ;;  %v2628_v31 = vadd.f32 %v2627_v41, %v6957_v63 }
 0x3fb   :  { %v3058_v2 = vmax.f32 %v2675_v9, 0.0 }
 0x3fc   :  { %v3089_v34 = vmax.f32 %v2582_v50, 0.0 }
 0x3fd   :  { %v2534_v1 = vpop.f32.mrf.mxu1  ;;  %v3519_v43 = vadd.f32 %v3518_v49, %v3058_v2 }
 0x3fe   :  { %v3508_v14 = vadd.f32 %v3507_v22, %v3089_v34  ;;  %v2535_v59 = vadd.f32 %v2534_v1, %v6940_v60  ;;  %v7051_v34 = vperm.slane %v6937_v61, 7 }
 0x400   :  { %v2676_v44 = vpop.f32.mrf.mxu2 }
 0x401   :  { %v2583_v32 = vpop.f32.mrf.mxu3  ;;  %v2677_v45 = vadd.f32 %v2676_v44, %v2628_v31  ;;  %v2630_v6 = vpop.f32.mrf.mxu0 }
 0x402   :  { %v2584_v42 = vadd.f32 %v2583_v32, %v2535_v59  ;;  %v2631_v28 = vadd.f32 %v2630_v6, %v6957_v63 }
 0x403   :  { %v3074_v39 = vmax.f32 %v2677_v45, 0.0 }
 0x404   :  { %v3105_v35 = vmax.f32 %v2584_v42, 0.0  ;;  %2825 = vmatmul.bf16.gmra.mxu0 %v5392_v3 }
 0x405   :  { %v2537_v58 = vpop.f32.mrf.mxu1  ;;  %v3520_v15 = vadd.f32 %v3519_v43, %v3074_v39  ;;  %4688 = vmatmul.msk.bf16.gmra.mxu2 %vm1292_vm0, %v5360_v53 }
 0x406   :  { %v3509_v54 = vadd.f32 %v3508_v14, %v3105_v35  ;;  %4681 = vmatmul.msk.bf16.gmra.mxu3 %vm1292_vm0, %v5394_v4  ;;  %v2538_v13 = vadd.f32 %v2537_v58, %v6940_v60 }
 0x408   :  { %2732 = vmatmul.bf16.gmra.mxu1 %v5432_v21  ;;  %v2679_v16 = vpop.f32.mrf.mxu2 }
 0x409   :  { %v2586_v10 = vpop.f32.mrf.mxu3  ;;  %v2680_v30 = vadd.f32 %v2679_v16, %v2631_v28  ;;  %v2632_v25 = vpop.f32.mrf.mxu0 }
 0x40a   :  { %v2587_v20 = vadd.f32 %v2586_v10, %v2538_v13  ;;  %v2633_v29 = vadd.f32 %v2632_v25, %v6957_v63 }
 0x40b   :  { %v3090_v3 = vmax.f32 %v2680_v30, 0.0 }
 0x40c   :  { %v3121_v56 = vmax.f32 %v2587_v20, 0.0 }
 0x40d   :  { %v2539_v37 = vpop.f32.mrf.mxu1  ;;  %v3521_v17 = vadd.f32 %v3520_v15, %v3090_v3 }
 0x40e   :  { %v3510_v0 = vadd.f32 %v3509_v54, %v3121_v56  ;;  %v2540_v11 = vadd.f32 %v2539_v37, %v6940_v60 }
 0x410   :  { %v2681_v53 = vpop.f32.mrf.mxu2 }
 0x411   :  { %v2588_v19 = vpop.f32.mrf.mxu3  ;;  %v2682_v55 = vadd.f32 %v2681_v53, %v2633_v29  ;;  %v2635_v27 = vpop.f32.mrf.mxu0 }
 0x412   :  { %v2589_v40 = vadd.f32 %v2588_v19, %v2540_v11  ;;  %v2636_v7 = vadd.f32 %v2635_v27, %v6957_v63 }
 0x413   :  { %v3106_v12 = vmax.f32 %v2682_v55, 0.0 }
 0x414   :  { %v3137_v23 = vmax.f32 %v2589_v40, 0.0  ;;  %2830 = vmatmul.bf16.gmra.mxu0 %v5432_v21 }
 0x415   :  { %v2698_v26 = vpop.f32.mrf.mxu1  ;;  %v3522_v48 = vadd.f32 %v3521_v17, %v3106_v12  ;;  %4689 = vmatmul.msk.bf16.gmra.mxu2 %vm1292_vm0, %v5394_v4 }
 0x416   :  { %v3511_v38 = vadd.f32 %v3510_v0, %v3137_v23  ;;  %v2699_v60 = vadd.f32 %v2698_v26, %v7041_v52 }
 0x418   :  { %v2684_v46 = vpop.f32.mrf.mxu2  ;;  %v3512_v5 = vrot.slane %v3511_v38, 4 }
 0x419   :  { %v2747_v47 = vpop.f32.mrf.mxu3  ;;  %v2685_v51 = vadd.f32 %v2684_v46, %v2636_v7  ;;  %v2637_v8 = vpop.f32.mrf.mxu0 }
 0x41a   :  { %v2748_v36 = vadd.f32 %v2747_v47, %v2699_v60  ;;  %v2638_v62 = vadd.f32 %v2637_v8, %v6957_v63  ;;  %v3513_v33 = vadd.f32 %v3512_v5, %v3511_v38 }
 0x41b   :  { %v3122_v57 = vmax.f32 %v2685_v51, 0.0 }
 0x41c   :  { %v2899_v9 = vmax.f32 %v2748_v36, 0.0  ;;  %v3514_v43 = vrot.slane %v3513_v33, 2 }
 0x41d   :  { %v2700_v22 = vpop.f32.mrf.mxu1  ;;  %v3523_v49 = vadd.f32 %v3522_v48, %v3122_v57 }
 0x41e   :  { %v2701_v21 = vadd.f32 %v2700_v22, %v7041_v52  ;;  %v3515_v45 = vadd.f32 %v3514_v43, %v3513_v33 }
 0x420   :  { %v2686_v24 = vpop.f32.mrf.mxu2  ;;  %v3516_v13 = vrot.slane %v3515_v45, 1 }
 0x421   :  { %v2749_v50 = vpop.f32.mrf.mxu3  ;;  %v2687_v4 = vadd.f32 %v2686_v24, %v2638_v62  ;;  %v2796_v2 = vpop.f32.mrf.mxu0 }
 0x422   :  { %v2750_v41 = vadd.f32 %v2749_v50, %v2701_v21  ;;  %v2797_v44 = vadd.f32 %v2796_v2, %v7051_v34  ;;  %v3517_v3 = vadd.f32 %v3516_v13, %v3515_v45 }
 0x423   :  { %v3138_v1 = vmax.f32 %v2687_v4, 0.0 }
 0x424   :  { %v2915_v14 = vmax.f32 %v2750_v41, 0.0  ;;  %v3585_v23 = vmul.f32 0.015625, %v3517_v3 }
 0x425   :  { %v2703_v59 = vpop.f32.mrf.mxu1  ;;  %v3524_v31 = vadd.f32 %v3523_v49, %v3138_v1 }
 0x426   :  { %v3323_v32 = vadd.f32 %v2915_v14, %v2899_v9  ;;  %v2704_v63 = vadd.f32 %v2703_v59, %v7041_v52 }
 0x427   :  { %v3525_v42 = vrot.slane %v3524_v31, 4 }
 0x428   :  { %v2845_v35 = vpop.f32.mrf.mxu2 }
 0x429   :  { %v2752_v6 = vpop.f32.mrf.mxu3  ;;  %v3526_v39 = vadd.f32 %v3525_v42, %v3524_v31  ;;  %v2846_v58 = vadd.f32 %v2845_v35, %v2797_v44  ;;  %v2798_v61 = vpop.f32.mrf.mxu0 }
 0x42a   :  { %v2753_v28 = vadd.f32 %v2752_v6, %v2704_v63  ;;  %v2799_v56 = vadd.f32 %v2798_v61, %v7051_v34 }
 0x42b   :  { %v3527_v54 = vrot.slane %v3526_v39, 2  ;;  %v2900_v40 = vmax.f32 %v2846_v58, 0.0 }
 0x42c   :  { %v2931_v15 = vmax.f32 %v2753_v28, 0.0 }
 0x42d   :  { %v2705_v10 = vpop.f32.mrf.mxu1  ;;  %v3528_v16 = vadd.f32 %v3527_v54, %v3526_v39 }
 0x42e   :  { %v3324_v20 = vadd.f32 %v3323_v32, %v2931_v15  ;;  %v2706_v30 = vadd.f32 %v2705_v10, %v7041_v52 }
 0x42f   :  { %v3529_v25 = vrot.slane %v3528_v16, 1 }
 0x430   :  { %v2847_v0 = vpop.f32.mrf.mxu2 }
 0x431   :  { %v2754_v37 = vpop.f32.mrf.mxu3  ;;  %v3530_v17 = vadd.f32 %v3529_v25, %v3528_v16  ;;  %v2848_v29 = vadd.f32 %v2847_v0, %v2799_v56  ;;  %v2801_v19 = vpop.f32.mrf.mxu0 }
 0x432   :  { %v2755_v11 = vadd.f32 %v2754_v37, %v2706_v30  ;;  %v2802_v12 = vadd.f32 %v2801_v19, %v7051_v34 }
 0x433   :  { %v3586_v53 = vmul.f32 0.015625, %v3530_v17  ;;  %v2916_v27 = vmax.f32 %v2848_v29, 0.0 }
 0x434   :  { %v2947_v55 = vmax.f32 %v2755_v11, 0.0 }
 0x435   :  { %v2708_v26 = vpop.f32.mrf.mxu1  ;;  %v3642_v38 = vrot.slane %v3586_v53, 6  ;;  %v3336_v7 = vadd.f32 %v2916_v27, %v2900_v40 }
 0x436   :  { %v3325_v48 = vadd.f32 %v3324_v20, %v2947_v55  ;;  %v2709_v60 = vadd.f32 %v2708_v26, %v7041_v52 }
 0x437   :  { %v7060_v46 = vsel %vm3645_vm1, %v3585_v23, %v3642_v38 }
 0x438   :  { %v2850_v51 = vpop.f32.mrf.mxu2 }
 0x439   :  { %v2757_v47 = vpop.f32.mrf.mxu3  ;;  %v2851_v8 = vadd.f32 %v2850_v51, %v2802_v12  ;;  %v2803_v57 = vpop.f32.mrf.mxu0 }
 0x43a   :  { %v2758_v36 = vadd.f32 %v2757_v47, %v2709_v60  ;;  %v2804_v24 = vadd.f32 %v2803_v57, %v7051_v34 }
 0x43b   :  { %v2932_v22 = vmax.f32 %v2851_v8, 0.0 }
 0x43c   :  { %v2963_v5 = vmax.f32 %v2758_v36, 0.0 }
 0x43d   :  { %v2710_v49 = vpop.f32.mrf.mxu1  ;;  %v3337_v62 = vadd.f32 %v3336_v7, %v2932_v22 }
 0x43e   :  { %v3326_v21 = vadd.f32 %v3325_v48, %v2963_v5  ;;  %v2711_v33 = vadd.f32 %v2710_v49, %v7041_v52 }
 0x440   :  { %v2852_v9 = vpop.f32.mrf.mxu2 }
 0x441   :  { %v2759_v50 = vpop.f32.mrf.mxu3  ;;  %v2853_v41 = vadd.f32 %v2852_v9, %v2804_v24  ;;  %v2806_v2 = vpop.f32.mrf.mxu0 }
 0x442   :  { %v2760_v4 = vadd.f32 %v2759_v50, %v2711_v33  ;;  %v2807_v32 = vadd.f32 %v2806_v2, %v7051_v34 }
 0x443   :  { %v2948_v14 = vmax.f32 %v2853_v41, 0.0 }
 0x444   :  { %v2979_v1 = vmax.f32 %v2760_v4, 0.0 }
 0x445   :  { %v2713_v43 = vpop.f32.mrf.mxu1  ;;  %v3338_v31 = vadd.f32 %v3337_v62, %v2948_v14 }
 0x446   :  { %v3327_v59 = vadd.f32 %v3326_v21, %v2979_v1  ;;  %v2714_v44 = vadd.f32 %v2713_v43, %v7041_v52 }
 0x448   :  { %v2855_v42 = vpop.f32.mrf.mxu2 }
 0x449   :  { %v2762_v63 = vpop.f32.mrf.mxu3  ;;  %v2856_v6 = vadd.f32 %v2855_v42, %v2807_v32  ;;  %v2808_v35 = vpop.f32.mrf.mxu0 }
 0x44a   :  { %v2763_v45 = vadd.f32 %v2762_v63, %v2714_v44  ;;  %v2809_v13 = vadd.f32 %v2808_v35, %v7051_v34 }
 0x44b   :  { %v2964_v28 = vmax.f32 %v2856_v6, 0.0 }
 0x44c   :  { %v2995_v39 = vmax.f32 %v2763_v45, 0.0 }
 0x44d   :  { %v2715_v58 = vpop.f32.mrf.mxu1  ;;  %v3339_v54 = vadd.f32 %v3338_v31, %v2964_v28 }
 0x44e   :  { %v3328_v61 = vadd.f32 %v3327_v59, %v2995_v39  ;;  %v2716_v15 = vadd.f32 %v2715_v58, %v7041_v52 }
 0x450   :  { %v2857_v16 = vpop.f32.mrf.mxu2 }
 0x451   :  { %v2764_v10 = vpop.f32.mrf.mxu3  ;;  %v2858_v30 = vadd.f32 %v2857_v16, %v2809_v13  ;;  %v2811_v25 = vpop.f32.mrf.mxu0 }
 0x452   :  { %v2765_v20 = vadd.f32 %v2764_v10, %v2716_v15  ;;  %v2812_v11 = vadd.f32 %v2811_v25, %v7051_v34 }
 0x453   :  { %v2980_v3 = vmax.f32 %v2858_v30, 0.0 }
 0x454   :  { %v3011_v56 = vmax.f32 %v2765_v20, 0.0 }
 0x455   :  { %v2718_v37 = vpop.f32.mrf.mxu1  ;;  %v3340_v17 = vadd.f32 %v3339_v54, %v2980_v3 }
 0x456   :  { %v3329_v0 = vadd.f32 %v3328_v61, %v3011_v56  ;;  %v2719_v58 = vadd.f32 %v2718_v37, %v7041_v52 }
 0x458   :  { %v2860_v19 = vpop.f32.mrf.mxu2  ;;  %v3330_v53 = vrot.slane %v3329_v0, 4 }
 0x459   :  { %v2767_v29 = vpop.f32.mrf.mxu3  ;;  %v2861_v40 = vadd.f32 %v2860_v19, %v2812_v11  ;;  %v2813_v55 = vpop.f32.mrf.mxu0 }
 0x45a   :  { %v3331_v12 = vadd.f32 %v3330_v53, %v3329_v0  ;;  %v2814_v38 = vadd.f32 %v2813_v55, %v7051_v34  ;;  %v2768_v15 = vadd.f32 %v2767_v29, %v2719_v58 }
 0x45b   :  { %v2996_v27 = vmax.f32 %v2861_v40, 0.0 }
 0x45c   :  { %v3332_v60 = vrot.slane %v3331_v12, 2  ;;  %v3027_v56 = vmax.f32 %v2768_v15, 0.0 }
 0x45d   :  { %v2720_v23 = vpop.f32.mrf.mxu1  ;;  %v3341_v26 = vadd.f32 %v3340_v17, %v2996_v27 }
 0x45e   :  { %v3333_v57 = vadd.f32 %v3332_v60, %v3331_v12  ;;  %v2721_v61 = vadd.f32 %v2720_v23, %v7041_v52 }
 0x460   :  { %v2862_v7 = vpop.f32.mrf.mxu2  ;;  %v3334_v62 = vrot.slane %v3333_v57, 1 }
 0x461   :  { %v2769_v48 = vpop.f32.mrf.mxu3  ;;  %v2863_v47 = vadd.f32 %v2862_v7, %v2814_v38  ;;  %v7070_v51 = vpop.f32.mrf.mxu0 }
 0x462   :  { %v3335_v4 = vadd.f32 %v3334_v62, %v3333_v57  ;;  %v2770_v13 = vadd.f32 %v2769_v48, %v2721_v61  ;;  %v2817_v57 = vadd.f32 %v7070_v51, %v7051_v34 }
 0x463   :  { %v3012_v36 = vmax.f32 %v2863_v47, 0.0 }
 0x464   :  { %v3571_v43 = vmul.f32 0.015625, %v3335_v4 }
 0x465   :  { %v2723_v8 = vpop.f32.mrf.mxu1  ;;  %v3342_v5 = vadd.f32 %v3341_v26, %v3012_v36 }
 0x466   :  { %v3631_v63 = vrot.slane %v3571_v43, 4  ;;  %v2724_v10 = vadd.f32 %v2723_v8, %v7041_v52 }
 0x467   :  { %v3343_v22 = vrot.slane %v3342_v5, 4 }
 0x468   :  { %v7072_v21 = vpop.f32.mrf.mxu2 }
 0x469   :  { %v2772_v49 = vpop.f32.mrf.mxu3  ;;  %v3344_v33 = vadd.f32 %v3343_v22, %v3342_v5  ;;  %v2818_v24 = vpop.f32.mrf.mxu0 }
 0x46a   :  { %v2773_v3 = vadd.f32 %v2772_v49, %v2724_v10  ;;  %v2819_v22 = vadd.f32 %v2818_v24, %v7051_v34 }
 0x46b   :  { %v3345_v50 = vrot.slane %v3344_v33, 2 }
 0x46c   :  { %v3059_v53 = vmax.f32 %v2773_v3, 0.0 }
 0x46d   :  { %v2725_v9 = vpop.f32.mrf.mxu1  ;;  %v3346_v41 = vadd.f32 %v3345_v50, %v3344_v33 }
 0x46e   :  { %v2726_v30 = vadd.f32 %v2725_v9, %v7041_v52 }
 0x46f   :  { %v3347_v2 = vrot.slane %v3346_v41, 1 }
 0x470   :  { %v2867_v14 = vpop.f32.mrf.mxu2 }
 0x471   :  { %v2774_v1 = vpop.f32.mrf.mxu3  ;;  %v3348_v59 = vadd.f32 %v3347_v2, %v3346_v41  ;;  %v2821_v31 = vpop.f32.mrf.mxu0  ;;  %v2868_v9 = vadd.f32 %v2867_v14, %v2819_v22  ;;  %v2866_v2 = vadd.f32 %v7072_v21, %v2817_v57 }
 0x472   :  { %v2775_v11 = vadd.f32 %v2774_v1, %v2726_v30  ;;  %v2822_v5 = vadd.f32 %v2821_v31, %v7051_v34 }
 0x473   :  { %v3572_v32 = vmul.f32 0.015625, %v3348_v59  ;;  %v3044_v31 = vmax.f32 %v2868_v9, 0.0 }
 0x474   :  { %v3075_v23 = vmax.f32 %v2775_v11, 0.0 }
 0x475   :  { %v2728_v44 = vpop.f32.mrf.mxu1  ;;  %v3632_v42 = vrot.slane %v3572_v32, 2 }
 0x476   :  { %v2729_v0 = vadd.f32 %v2728_v44, %v7041_v52 }
 0x477   :  { %v3658_v45 = vsel %vm3647_vm2, %v3631_v63, %v3632_v42  ;;  %v3028_v63 = vmax.f32 %v2866_v2, 0.0 }
 0x478   :  { %v7077_v6 = vsel %vm3649_vm3, %v7025_v18, %v3658_v45  ;;  %v2870_v39 = vpop.f32.mrf.mxu2  ;;  %v3043_v18 = vmax.f32 %v2770_v13, 0.0 }
 0x479   :  { %v2777_v35 = vpop.f32.mrf.mxu3  ;;  %v2823_v28 = vpop.f32.mrf.mxu0  ;;  %v2871_v1 = vadd.f32 %v2870_v39, %v2822_v5  ;;  %v3544_v21 = vadd.f32 %v3044_v31, %v3028_v63 }
 0x47a   :  { %v3531_v19 = vadd.f32 %v3043_v18, %v3027_v56  ;;  %v2778_v29 = vadd.f32 %v2777_v35, %v2729_v0 }
 0x47b   :  { %v3060_v42 = vmax.f32 %v2871_v1, 0.0 }
 0x47c   :  { %v3532_v38 = vadd.f32 %v3531_v19, %v3059_v53  ;;  %v3091_v48 = vmax.f32 %v2778_v29, 0.0 }
 0x47d   :  { %v2730_v54 = vpop.f32.mrf.mxu1 }
 0x47e   :  { %v2731_v37 = vadd.f32 %v2730_v54, %v7041_v52  ;;  %v3533_v47 = vadd.f32 %v3532_v38, %v3075_v23 }
 0x480   :  { %v2872_v20 = vpop.f32.mrf.mxu2  ;;  %v3534_v49 = vadd.f32 %v3533_v47, %v3091_v48 }
 0x481   :  { %v2779_v16 = vpop.f32.mrf.mxu3  ;;  %v2826_v25 = vpop.f32.mrf.mxu0 }
 0x482   :  { %v2780_v12 = vadd.f32 %v2779_v16, %v2731_v37  ;;  %v2827_v59 = vadd.f32 %v2826_v25, %v7051_v34 }
 0x484   :  { %v3107_v36 = vmax.f32 %v2780_v12, 0.0 }
 0x485   :  { %v2733_v17 = vpop.f32.mrf.mxu1 }
 0x486   :  { %v2734_v40 = vadd.f32 %v2733_v17, %v7041_v52  ;;  %v3535_v4 = vadd.f32 %v3534_v49, %v3107_v36 }
 0x488   :  { %v2875_v27 = vpop.f32.mrf.mxu2 }
 0x489   :  { %v2782_v55 = vpop.f32.mrf.mxu3  ;;  %v2828_v26 = vpop.f32.mrf.mxu0  ;;  %v2876_v45 = vadd.f32 %v2875_v27, %v2827_v59 }
 0x48a   :  { %v2783_v7 = vadd.f32 %v2782_v55, %v2734_v40  ;;  %v2829_v14 = vadd.f32 %v2828_v26, %v7051_v34 }
 0x48b   :  { %v3092_v15 = vmax.f32 %v2876_v45, 0.0 }
 0x48c   :  { %v3123_v62 = vmax.f32 %v2783_v7, 0.0 }
 0x48d   :  { %v2735_v60 = vpop.f32.mrf.mxu1 }
 0x48e   :  { %v2736_v8 = vadd.f32 %v2735_v60, %v7041_v52  ;;  %v2824_v52 = vadd.f32 %v2823_v28, %v7051_v34  ;;  %v3536_v51 = vadd.f32 %v3535_v4, %v3123_v62  ;;  %v3545_v28 = vadd.f32 %v3544_v21, %v3060_v42 }
 0x490   :  { %v2877_v50 = vpop.f32.mrf.mxu2  ;;  %v2873_v44 = vadd.f32 %v2872_v20, %v2824_v52 }
 0x491   :  { %v2784_v33 = vpop.f32.mrf.mxu3  ;;  %v2831_v43 = vpop.f32.mrf.mxu0  ;;  %v2878_v54 = vadd.f32 %v2877_v50, %v2829_v14 }
 0x492   :  { %v2785_v41 = vadd.f32 %v2784_v33, %v2736_v8  ;;  %v2832_v35 = vadd.f32 %v2831_v43, %v7051_v34  ;;  %v3076_v39 = vmax.f32 %v2873_v44, 0.0 }
 0x493   :  { %v3108_v20 = vmax.f32 %v2878_v54, 0.0 }
 0x494   :  { %v3139_v32 = vmax.f32 %v2785_v41, 0.0  ;;  %v3546_v16 = vadd.f32 %v3545_v28, %v3076_v39 }
 0x496   :  { %v3537_v24 = vadd.f32 %v3536_v51, %v3139_v32  ;;  %v3547_v25 = vadd.f32 %v3546_v16, %v3092_v15 }
 0x498   :  { %v2880_v58 = vpop.f32.mrf.mxu2  ;;  %v3538_v61 = vrot.slane %v3537_v24, 4  ;;  %v3548_v17 = vadd.f32 %v3547_v25, %v3108_v20 }
 0x499   :  { %v2881_v13 = vadd.f32 %v2880_v58, %v2832_v35  ;;  %v2833_v10 = vpop.f32.mrf.mxu0 }
 0x49a   :  { %v3539_v30 = vadd.f32 %v3538_v61, %v3537_v24  ;;  %v2834_v18 = vadd.f32 %v2833_v10, %v7051_v34 }
 0x49b   :  { %v3124_v56 = vmax.f32 %v2881_v13, 0.0 }
 0x49c   :  { %v3540_v0 = vrot.slane %v3539_v30, 2 }
 0x49d   :  { %v3549_v37 = vadd.f32 %v3548_v17, %v3124_v56 }
 0x49e   :  { %v3541_v53 = vadd.f32 %v3540_v0, %v3539_v30 }
 0x4a0   :  { %v2882_v3 = vpop.f32.mrf.mxu2  ;;  %v3542_v55 = vrot.slane %v3541_v53, 1 }
 0x4a1   :  { %v2883_v11 = vadd.f32 %v2882_v3, %v2834_v18 }
 0x4a2   :  { %v3543_v12 = vadd.f32 %v3542_v55, %v3541_v53 }
 0x4a3   :  { %v3140_v19 = vmax.f32 %v2883_v11, 0.0 }
 0x4a4   :  { %v3587_v48 = vmul.f32 0.015625, %v3543_v12 }
 0x4a5   :  { %v3550_v29 = vadd.f32 %v3549_v37, %v3140_v19 }
 0x4a6   :  { %v3643_v47 = vrot.slane %v3587_v48, 4 }
 0x4a7   :  { %v3551_v40 = vrot.slane %v3550_v29, 4 }
 0x4a9   :  { %v3552_v27 = vadd.f32 %v3551_v40, %v3550_v29 }
 0x4ab   :  { %v3553_v23 = vrot.slane %v3552_v27, 2 }
 0x4ad   :  { %v3554_v26 = vadd.f32 %v3553_v23, %v3552_v27 }
 0x4af   :  { %v3555_v38 = vrot.slane %v3554_v26, 1 }
 0x4b1   :  { %v3556_v7 = vadd.f32 %v3555_v38, %v3554_v26 }
 0x4b3   :  { %v3588_v60 = vmul.f32 0.015625, %v3556_v7 }
 0x4b5   :  { %v3644_v34 = vrot.slane %v3588_v60, 2 }
 0x4b7   :  { %v3670_v36 = vsel %vm3647_vm2, %v3643_v47, %v3644_v34 }
 0x4b8   :  { %v3671_v8 = vsel %vm3649_vm3, %v7060_v46, %v3670_v36 }
 0x4b9   :  { %v3701_v57 = vrot.slane %v3671_v8, 7 }
 0x4bb   :  { %v3702_v5 = vsel %vm3677_vm4, %v3701_v57, %v7077_v6 }
 0x4bc   :  { %v3703_v22 = vsel %vm3679_vm5, %v3701_v57, %v3702_v5 }
 0x4bd   :  { %v3704_v49 = vsel %vm3681_vm6, %v3701_v57, %v3703_v22 }
 0x4be   :  { %v3705_v62 = vsel %vm3683_vm7, %v3701_v57, %v3704_v49 }
 0x4bf   :  { %3713 = vst [vmem:[#allocation2 + $0x18] sm:$0xff] %v3705_v62 }
 0x4c0   :  { %3724 = dma.vmem_to_hbm [thread:$0]  %s3720_s20, 512, %s3722_s23, [#allocation3]  }
 0x4c1   :  { %4925 = dma.done.wait [#allocation3], 512  }
 0x4c2   :  { %4926 = vsyncadd [#allocation3], 4294966784 }
 0x4c3   :  { %3729 = vsyncpa [#allocation3], 1 }

</bundles_post_ra>
